<compile_context>
chip_gen: v5e
topology: v5e:2x2
jax: 0.10.0
libtpu: 0.0.40
codegen_flags: <defaults>
</compile_context>

<pallas_src>
import jax
import jax.numpy as jnp
from jax.experimental import pallas as pl
from jax.experimental.pallas import tpu as pltpu

# ----------------------------- model config ---------------------------------
SEQ_INPUT_DIM = 16
GROUP_INPUT_DIM = 4
OUTPUT_DIM = 3
NUM_HEADS = 4
NUM_LAYERS = 2
HIDDEN_DIM = 32
DIM_FEEDFORWARD = 2048          # PyTorch TransformerEncoderLayer default
LN_EPS = 1e-5
HEAD_DIM = HIDDEN_DIM // NUM_HEADS

BATCH = 2
SEQ_LEN = 8
TOKENS = SEQ_LEN + 1            # +1 for the cls token
BT = BATCH * TOKENS             # 18 tokens total in the fused slab
LANES = 128                     # lane-dense output width

_PER_LAYER_REFS = 12            # in_proj(w,b), out_proj(w,b), lin1(w,b), lin2(w,b), ln1(g,b), ln2(g,b)


# ----------------------------- kernel helpers --------------------------------
def _layernorm(x, gamma, beta):
    # Biased variance over last dim, matching PyTorch nn.LayerNorm.
    mu = jnp.mean(x, axis=-1, keepdims=True)
    d = x - mu
    var = jnp.mean(d * d, axis=-1, keepdims=True)
    inv = jax.lax.rsqrt(var + LN_EPS)                 # EUP rsqrt
    return d * inv * gamma + beta


def _softmax_rows(s):
    s = s - jnp.max(s, axis=-1, keepdims=True)
    p = jnp.exp(s)
    return p * pl.reciprocal(jnp.sum(p, axis=-1, keepdims=True), approx=True)


# ----------------------------- fused kernel ----------------------------------
def _fused_forward_kernel(x_seq_ref, emb_bias_ref, mask_ref, x_group_ref, *refs):
    """Single grid step == whole batch.  Entire model resident in VMEM."""
    out_ref = refs[-1]
    w = refs[:-1]

    emb_w = w[0][...]                                              # [seq_in, H]

    # ---- embedding (cls prepend folded into padded input + bias table) ------
    x = jnp.dot(x_seq_ref[...], emb_w,
                preferred_element_type=jnp.float32) + emb_bias_ref[...]   # [BT, H]

    mask_add = mask_ref[...]                                       # [BT, BT], 0 / -1e30
    scale = 1.0 / (HEAD_DIM ** 0.5)

    # ---- TransformerEncoder (post-norm), layers fully unrolled --------------
    for l in range(NUM_LAYERS):
        base = 1 + l * _PER_LAYER_REFS
        in_proj_w, in_proj_b = w[base + 0][...], w[base + 1][...]
        out_proj_w, out_proj_b = w[base + 2][...], w[base + 3][...]
        lin1_w, lin1_b = w[base + 4][...], w[base + 5][...]
        lin2_w, lin2_b = w[base + 6][...], w[base + 7][...]
        ln1_g, ln1_beta = w[base + 8][...], w[base + 9][...]
        ln2_g, ln2_beta = w[base + 10][...], w[base + 11][...]

        # -- self attention: heads from the QKV slab, batch fused, masked ------
        qkv = jnp.dot(x, in_proj_w, preferred_element_type=jnp.float32) + in_proj_b
        q = qkv[:, 0:HIDDEN_DIM]
        k = qkv[:, HIDDEN_DIM:2 * HIDDEN_DIM]
        v = qkv[:, 2 * HIDDEN_DIM:3 * HIDDEN_DIM]

        head_outs = []
        for hd in range(NUM_HEADS):
            lo, hi = hd * HEAD_DIM, (hd + 1) * HEAD_DIM
            qh, kh, vh = q[:, lo:hi], k[:, lo:hi], v[:, lo:hi]     # [BT, dh]
            # contract feature dims directly (no explicit kh.T transpose)
            s = jax.lax.dot_general(qh, kh, (((1,), (1,)), ((), ())),
                                    preferred_element_type=jnp.float32)  # [BT, BT]
            p = _softmax_rows(s * scale + mask_add)
            head_outs.append(jnp.dot(p, vh, preferred_element_type=jnp.float32))
        attn = jnp.concatenate(head_outs, axis=1)                  # [BT, H]
        attn = jnp.dot(attn, out_proj_w,
                       preferred_element_type=jnp.float32) + out_proj_b
        x = _layernorm(x + attn, ln1_g, ln1_beta)                  # norm1(x + sa(x))

        # -- feed forward (bf16 weights, f32 accumulation) ---------------------
        h1 = jnp.dot(x.astype(lin1_w.dtype), lin1_w,
                     preferred_element_type=jnp.float32) + lin1_b  # [BT, 2048]
        h1 = jnp.maximum(h1, 0.0)
        h2 = jnp.dot(h1.astype(lin2_w.dtype), lin2_w,
                     preferred_element_type=jnp.float32) + lin2_b  # [BT, H]
        x = _layernorm(x + h2, ln2_g, ln2_beta)                    # norm2(x + ff(x))

    # ---- pooled cls tokens + group features -> MLP head ----------------------
    hbase = 1 + NUM_LAYERS * _PER_LAYER_REFS
    head1_wa = w[hbase + 0][...]      # [H, H//2]    (pooled path)
    head1_wb = w[hbase + 1][...]      # [G, H//2]    (group path)
    head1_b = w[hbase + 2][...]       # [1, H//2]
    head2_w = w[hbase + 3][...]       # [H//2, 128]  (zero padded past OUTPUT_DIM)
    head2_b = w[hbase + 4][...]       # [1, 128]

    # cls token of each batch element (rows 0, TOKENS, 2*TOKENS, ...)
    pooled = jnp.concatenate(
        [x[b * TOKENS:b * TOKENS + 1, :] for b in range(BATCH)], axis=0)   # [B, H]

    hmid = (jnp.dot(pooled, head1_wa, preferred_element_type=jnp.float32)
            + jnp.dot(x_group_ref[...], head1_wb, preferred_element_type=jnp.float32)
            + head1_b)
    hmid = jnp.maximum(hmid, 0.0)
    out = jnp.dot(hmid, head2_w, preferred_element_type=jnp.float32) + head2_b  # [B, 128]
    out_ref[...] = out.astype(out_ref.dtype)


# ----------------------------- parameters ------------------------------------
def init_params(key):
    def dense(k, fan_in, fan_out):
        kw, kb = jax.random.split(k)
        w_t = jax.random.normal(kw, (fan_in, fan_out), jnp.float32) * 0.05
        b = jax.random.normal(kb, (fan_out,), jnp.float32) * 0.05
        return w_t, b

    keys = jax.random.split(key, 4 + NUM_LAYERS)
    params = {}
    params["emb_w_t"], params["emb_b"] = dense(keys[0], SEQ_INPUT_DIM, HIDDEN_DIM)
    params["cls_token"] = jnp.zeros((1, 1, HIDDEN_DIM), jnp.float32)  # nn.Parameter(zeros)

    layers = []
    for l in range(NUM_LAYERS):
        lk = jax.random.split(keys[4 + l], 4)
        layer = {}
        layer["in_proj_w_t"], layer["in_proj_b"] = dense(lk[0], HIDDEN_DIM, 3 * HIDDEN_DIM)
        layer["out_proj_w_t"], layer["out_proj_b"] = dense(lk[1], HIDDEN_DIM, HIDDEN_DIM)
        layer["lin1_w_t"], layer["lin1_b"] = dense(lk[2], HIDDEN_DIM, DIM_FEEDFORWARD)
        layer["lin2_w_t"], layer["lin2_b"] = dense(lk[3], DIM_FEEDFORWARD, HIDDEN_DIM)
        layer["ln1_g"] = jnp.ones((HIDDEN_DIM,), jnp.float32)
        layer["ln1_b"] = jnp.zeros((HIDDEN_DIM,), jnp.float32)
        layer["ln2_g"] = jnp.ones((HIDDEN_DIM,), jnp.float32)
        layer["ln2_b"] = jnp.zeros((HIDDEN_DIM,), jnp.float32)
        layers.append(layer)
    params["layers"] = layers

    params["head1_w_t"], params["head1_b"] = dense(
        keys[1], HIDDEN_DIM + GROUP_INPUT_DIM, HIDDEN_DIM // 2)
    params["head2_w_t"], params["head2_b"] = dense(keys[2], HIDDEN_DIM // 2, OUTPUT_DIM)
    return params


# ----------------------------- forward pass -----------------------------------
@jax.jit
def forward(params, x_seq, x_group):
    B, S, _ = x_seq.shape
    T = S + 1
    bt = B * T
    H = HIDDEN_DIM

    # cls prepend folded into padded input + bias table (wrapper-side plumbing)
    x_seq_pad = jnp.pad(x_seq, ((0, 0), (1, 0), (0, 0)))             # [B, T, seq_in]
    x_seq_flat = x_seq_pad.reshape(bt, SEQ_INPUT_DIM)

    cls = params["cls_token"].reshape(1, H)
    emb_b = params["emb_b"].reshape(1, H)
    bias_table = jnp.concatenate([cls, jnp.broadcast_to(emb_b, (S, H))], axis=0)  # [T, H]
    bias_table = jnp.tile(bias_table, (B, 1))                                     # [BT, H]

    # block-diagonal additive attention mask: no cross-batch attention
    batch_ids = jnp.repeat(jnp.arange(B), T)
    attn_mask = jnp.where(batch_ids[:, None] == batch_ids[None, :],
                          0.0, -1e30).astype(jnp.float32)                         # [BT, BT]

    # head MLP: split first weight (avoids lane concat), pad last proj to 128 lanes
    head1_wa = params["head1_w_t"][:H, :]                            # [H, H//2]
    head1_wb = params["head1_w_t"][H:, :]                            # [G, H//2]
    head1_b = params["head1_b"].reshape(1, H // 2)
    head2_w = jnp.zeros((H // 2, LANES), jnp.float32).at[:, :OUTPUT_DIM].set(
        params["head2_w_t"])
    head2_b = jnp.zeros((1, LANES), jnp.float32).at[:, :OUTPUT_DIM].set(
        params["head2_b"].reshape(1, OUTPUT_DIM))

    flat = [params["emb_w_t"]]
    for layer in params["layers"]:
        flat += [
            layer["in_proj_w_t"], layer["in_proj_b"].reshape(1, 3 * H),
            layer["out_proj_w_t"], layer["out_proj_b"].reshape(1, H),
            layer["lin1_w_t"].astype(jnp.bfloat16),                  # bf16 FFN weights
            layer["lin1_b"].reshape(1, DIM_FEEDFORWARD),
            layer["lin2_w_t"].astype(jnp.bfloat16),
            layer["lin2_b"].reshape(1, H),
            layer["ln1_g"].reshape(1, H), layer["ln1_b"].reshape(1, H),
            layer["ln2_g"].reshape(1, H), layer["ln2_b"].reshape(1, H),
        ]
    flat += [head1_wa, head1_wb, head1_b, head2_w, head2_b]

    inputs = [x_seq_flat, bias_table, attn_mask, x_group] + flat

    def full_spec(arr):
        return pl.BlockSpec(arr.shape, lambda i: (0,) * arr.ndim)

    out = pl.pallas_call(
        _fused_forward_kernel,
        out_shape=jax.ShapeDtypeStruct((B, LANES), jnp.float32),
        grid=(1,),                                                   # whole batch, one step
        in_specs=[full_spec(a) for a in inputs],
        out_specs=pl.BlockSpec((B, LANES), lambda i: (0, 0)),
        compiler_params=pltpu.CompilerParams(
            dimension_semantics=("arbitrary",),
            vmem_limit_bytes=32 * 1024 * 1024,
        ),
    )(*inputs)
    return out[:, :OUTPUT_DIM]


# ----------------------------- main --------------------------------------------
if __name__ == "__main__":
    key = jax.random.PRNGKey(0)
    k_params, k_seq, k_group = jax.random.split(key, 3)

    params = init_params(k_params)
    x_seq = jax.random.normal(k_seq, (BATCH, SEQ_LEN, SEQ_INPUT_DIM), jnp.float32)
    x_group = jax.random.normal(k_group, (BATCH, GROUP_INPUT_DIM), jnp.float32)

    out = forward(params, x_seq, x_group)
    out = jax.block_until_ready(out)
    assert out.shape == (BATCH, OUTPUT_DIM), out.shape
    print("KERNEL_OK")
</pallas_src>

<mosaic_0001>
module attributes {stable_mosaic.version = 11 : i64} {
  func.func @_fused_forward_kernel(%arg0: i32, %arg1: memref<18x16xf32, #tpu.memory_space<vmem>>, %arg2: memref<18x32xf32, #tpu.memory_space<vmem>>, %arg3: memref<18x18xf32, #tpu.memory_space<vmem>>, %arg4: memref<2x4xf32, #tpu.memory_space<vmem>>, %arg5: memref<16x32xf32, #tpu.memory_space<vmem>>, %arg6: memref<32x96xf32, #tpu.memory_space<vmem>>, %arg7: memref<1x96xf32, #tpu.memory_space<vmem>>, %arg8: memref<32x32xf32, #tpu.memory_space<vmem>>, %arg9: memref<1x32xf32, #tpu.memory_space<vmem>>, %arg10: memref<32x2048xbf16, #tpu.memory_space<vmem>>, %arg11: memref<1x2048xf32, #tpu.memory_space<vmem>>, %arg12: memref<2048x32xbf16, #tpu.memory_space<vmem>>, %arg13: memref<1x32xf32, #tpu.memory_space<vmem>>, %arg14: memref<1x32xf32, #tpu.memory_space<vmem>>, %arg15: memref<1x32xf32, #tpu.memory_space<vmem>>, %arg16: memref<1x32xf32, #tpu.memory_space<vmem>>, %arg17: memref<1x32xf32, #tpu.memory_space<vmem>>, %arg18: memref<32x96xf32, #tpu.memory_space<vmem>>, %arg19: memref<1x96xf32, #tpu.memory_space<vmem>>, %arg20: memref<32x32xf32, #tpu.memory_space<vmem>>, %arg21: memref<1x32xf32, #tpu.memory_space<vmem>>, %arg22: memref<32x2048xbf16, #tpu.memory_space<vmem>>, %arg23: memref<1x2048xf32, #tpu.memory_space<vmem>>, %arg24: memref<2048x32xbf16, #tpu.memory_space<vmem>>, %arg25: memref<1x32xf32, #tpu.memory_space<vmem>>, %arg26: memref<1x32xf32, #tpu.memory_space<vmem>>, %arg27: memref<1x32xf32, #tpu.memory_space<vmem>>, %arg28: memref<1x32xf32, #tpu.memory_space<vmem>>, %arg29: memref<1x32xf32, #tpu.memory_space<vmem>>, %arg30: memref<32x16xf32, #tpu.memory_space<vmem>>, %arg31: memref<4x16xf32, #tpu.memory_space<vmem>>, %arg32: memref<1x16xf32, #tpu.memory_space<vmem>>, %arg33: memref<16x128xf32, #tpu.memory_space<vmem>>, %arg34: memref<1x128xf32, #tpu.memory_space<vmem>>, %arg35: memref<2x128xf32, #tpu.memory_space<vmem>>) attributes {dimension_semantics = [#tpu.dimension_semantics<arbitrary>], iteration_bounds = array<i64: 1>, scalar_prefetch = 0 : i64, scratch_operands = 0 : i64, tpu.core_type = #tpu.core_type<tc>, window_params = [{pipeline_mode = #tpu.pipeline_mode<synchronous>, transform_indices = @transform_0, window_bounds = array<i64: 18, 16>}, {pipeline_mode = #tpu.pipeline_mode<synchronous>, transform_indices = @transform_1, window_bounds = array<i64: 18, 32>}, {pipeline_mode = #tpu.pipeline_mode<synchronous>, transform_indices = @transform_2, window_bounds = array<i64: 18, 18>}, {pipeline_mode = #tpu.pipeline_mode<synchronous>, transform_indices = @transform_3, window_bounds = array<i64: 2, 4>}, {pipeline_mode = #tpu.pipeline_mode<synchronous>, transform_indices = @transform_4, window_bounds = array<i64: 16, 32>}, {pipeline_mode = #tpu.pipeline_mode<synchronous>, transform_indices = @transform_5, window_bounds = array<i64: 32, 96>}, {pipeline_mode = #tpu.pipeline_mode<synchronous>, transform_indices = @transform_6, window_bounds = array<i64: 1, 96>}, {pipeline_mode = #tpu.pipeline_mode<synchronous>, transform_indices = @transform_7, window_bounds = array<i64: 32, 32>}, {pipeline_mode = #tpu.pipeline_mode<synchronous>, transform_indices = @transform_8, window_bounds = array<i64: 1, 32>}, {pipeline_mode = #tpu.pipeline_mode<synchronous>, transform_indices = @transform_9, window_bounds = array<i64: 32, 2048>}, {pipeline_mode = #tpu.pipeline_mode<synchronous>, transform_indices = @transform_10, window_bounds = array<i64: 1, 2048>}, {pipeline_mode = #tpu.pipeline_mode<synchronous>, transform_indices = @transform_11, window_bounds = array<i64: 2048, 32>}, {pipeline_mode = #tpu.pipeline_mode<synchronous>, transform_indices = @transform_12, window_bounds = array<i64: 1, 32>}, {pipeline_mode = #tpu.pipeline_mode<synchronous>, transform_indices = @transform_13, window_bounds = array<i64: 1, 32>}, {pipeline_mode = #tpu.pipeline_mode<synchronous>, transform_indices = @transform_14, window_bounds = array<i64: 1, 32>}, {pipeline_mode = #tpu.pipeline_mode<synchronous>, transform_indices = @transform_15, window_bounds = array<i64: 1, 32>}, {pipeline_mode = #tpu.pipeline_mode<synchronous>, transform_indices = @transform_16, window_bounds = array<i64: 1, 32>}, {pipeline_mode = #tpu.pipeline_mode<synchronous>, transform_indices = @transform_17, window_bounds = array<i64: 32, 96>}, {pipeline_mode = #tpu.pipeline_mode<synchronous>, transform_indices = @transform_18, window_bounds = array<i64: 1, 96>}, {pipeline_mode = #tpu.pipeline_mode<synchronous>, transform_indices = @transform_19, window_bounds = array<i64: 32, 32>}, {pipeline_mode = #tpu.pipeline_mode<synchronous>, transform_indices = @transform_20, window_bounds = array<i64: 1, 32>}, {pipeline_mode = #tpu.pipeline_mode<synchronous>, transform_indices = @transform_21, window_bounds = array<i64: 32, 2048>}, {pipeline_mode = #tpu.pipeline_mode<synchronous>, transform_indices = @transform_22, window_bounds = array<i64: 1, 2048>}, {pipeline_mode = #tpu.pipeline_mode<synchronous>, transform_indices = @transform_23, window_bounds = array<i64: 2048, 32>}, {pipeline_mode = #tpu.pipeline_mode<synchronous>, transform_indices = @transform_24, window_bounds = array<i64: 1, 32>}, {pipeline_mode = #tpu.pipeline_mode<synchronous>, transform_indices = @transform_25, window_bounds = array<i64: 1, 32>}, {pipeline_mode = #tpu.pipeline_mode<synchronous>, transform_indices = @transform_26, window_bounds = array<i64: 1, 32>}, {pipeline_mode = #tpu.pipeline_mode<synchronous>, transform_indices = @transform_27, window_bounds = array<i64: 1, 32>}, {pipeline_mode = #tpu.pipeline_mode<synchronous>, transform_indices = @transform_28, window_bounds = array<i64: 1, 32>}, {pipeline_mode = #tpu.pipeline_mode<synchronous>, transform_indices = @transform_29, window_bounds = array<i64: 32, 16>}, {pipeline_mode = #tpu.pipeline_mode<synchronous>, transform_indices = @transform_30, window_bounds = array<i64: 4, 16>}, {pipeline_mode = #tpu.pipeline_mode<synchronous>, transform_indices = @transform_31, window_bounds = array<i64: 1, 16>}, {pipeline_mode = #tpu.pipeline_mode<synchronous>, transform_indices = @transform_32, window_bounds = array<i64: 16, 128>}, {pipeline_mode = #tpu.pipeline_mode<synchronous>, transform_indices = @transform_33, window_bounds = array<i64: 1, 128>}, {pipeline_mode = #tpu.pipeline_mode<synchronous>, transform_indices = @transform_34, window_bounds = array<i64: 2, 128>}]} {
    %c0 = arith.constant 0 : index
    %c0_0 = arith.constant 0 : index
    %0 = vector.load %arg5[%c0, %c0_0] : memref<16x32xf32, #tpu.memory_space<vmem>>, vector<16x32xf32>
    %c0_1 = arith.constant 0 : index
    %c0_2 = arith.constant 0 : index
    %1 = vector.load %arg1[%c0_1, %c0_2] : memref<18x16xf32, #tpu.memory_space<vmem>>, vector<18x16xf32>
    %cst = arith.constant dense<0.000000e+00> : vector<18x32xf32>
    %2 = tpu.matmul %1, %0, %cst {dimension_numbers = #tpu.dot_dimension_numbers<[1], [0], [0], [1], [0, 0, 1, 1], [], []>} : vector<18x16xf32>, vector<16x32xf32>, vector<18x32xf32> -> vector<18x32xf32>
    %c0_3 = arith.constant 0 : index
    %c0_4 = arith.constant 0 : index
    %3 = vector.load %arg2[%c0_3, %c0_4] : memref<18x32xf32, #tpu.memory_space<vmem>>, vector<18x32xf32>
    %4 = arith.addf %2, %3 : vector<18x32xf32>
    %c0_5 = arith.constant 0 : index
    %c0_6 = arith.constant 0 : index
    %5 = vector.load %arg3[%c0_5, %c0_6] : memref<18x18xf32, #tpu.memory_space<vmem>>, vector<18x18xf32>
    %c0_7 = arith.constant 0 : index
    %c0_8 = arith.constant 0 : index
    %6 = vector.load %arg6[%c0_7, %c0_8] : memref<32x96xf32, #tpu.memory_space<vmem>>, vector<32x96xf32>
    %c0_9 = arith.constant 0 : index
    %c0_10 = arith.constant 0 : index
    %7 = vector.load %arg7[%c0_9, %c0_10] : memref<1x96xf32, #tpu.memory_space<vmem>>, vector<1x96xf32>
    %c0_11 = arith.constant 0 : index
    %c0_12 = arith.constant 0 : index
    %8 = vector.load %arg8[%c0_11, %c0_12] : memref<32x32xf32, #tpu.memory_space<vmem>>, vector<32x32xf32>
    %c0_13 = arith.constant 0 : index
    %c0_14 = arith.constant 0 : index
    %9 = vector.load %arg9[%c0_13, %c0_14] : memref<1x32xf32, #tpu.memory_space<vmem>>, vector<1x32xf32>
    %c0_15 = arith.constant 0 : index
    %c0_16 = arith.constant 0 : index
    %10 = vector.load %arg10[%c0_15, %c0_16] : memref<32x2048xbf16, #tpu.memory_space<vmem>>, vector<32x2048xbf16>
    %c0_17 = arith.constant 0 : index
    %c0_18 = arith.constant 0 : index
    %11 = vector.load %arg11[%c0_17, %c0_18] : memref<1x2048xf32, #tpu.memory_space<vmem>>, vector<1x2048xf32>
    %c0_19 = arith.constant 0 : index
    %c0_20 = arith.constant 0 : index
    %12 = vector.load %arg12[%c0_19, %c0_20] : memref<2048x32xbf16, #tpu.memory_space<vmem>>, vector<2048x32xbf16>
    %c0_21 = arith.constant 0 : index
    %c0_22 = arith.constant 0 : index
    %13 = vector.load %arg13[%c0_21, %c0_22] : memref<1x32xf32, #tpu.memory_space<vmem>>, vector<1x32xf32>
    %c0_23 = arith.constant 0 : index
    %c0_24 = arith.constant 0 : index
    %14 = vector.load %arg14[%c0_23, %c0_24] : memref<1x32xf32, #tpu.memory_space<vmem>>, vector<1x32xf32>
    %c0_25 = arith.constant 0 : index
    %c0_26 = arith.constant 0 : index
    %15 = vector.load %arg15[%c0_25, %c0_26] : memref<1x32xf32, #tpu.memory_space<vmem>>, vector<1x32xf32>
    %c0_27 = arith.constant 0 : index
    %c0_28 = arith.constant 0 : index
    %16 = vector.load %arg16[%c0_27, %c0_28] : memref<1x32xf32, #tpu.memory_space<vmem>>, vector<1x32xf32>
    %c0_29 = arith.constant 0 : index
    %c0_30 = arith.constant 0 : index
    %17 = vector.load %arg17[%c0_29, %c0_30] : memref<1x32xf32, #tpu.memory_space<vmem>>, vector<1x32xf32>
    %cst_31 = arith.constant dense<0.000000e+00> : vector<18x96xf32>
    %18 = tpu.matmul %4, %6, %cst_31 {dimension_numbers = #tpu.dot_dimension_numbers<[1], [0], [0], [1], [0, 0, 1, 1], [], []>} : vector<18x32xf32>, vector<32x96xf32>, vector<18x96xf32> -> vector<18x96xf32>
    %19 = vector.broadcast %7 : vector<1x96xf32> to vector<18x96xf32>
    %20 = arith.addf %18, %19 : vector<18x96xf32>
    %21 = vector.extract_strided_slice %20 {offsets = [0, 0], sizes = [18, 32], strides = [1, 1]} : vector<18x96xf32> to vector<18x32xf32>
    %22 = vector.extract_strided_slice %20 {offsets = [0, 32], sizes = [18, 32], strides = [1, 1]} : vector<18x96xf32> to vector<18x32xf32>
    %23 = vector.extract_strided_slice %20 {offsets = [0, 64], sizes = [18, 32], strides = [1, 1]} : vector<18x96xf32> to vector<18x32xf32>
    %24 = vector.extract_strided_slice %21 {offsets = [0, 0], sizes = [18, 8], strides = [1, 1]} : vector<18x32xf32> to vector<18x8xf32>
    %25 = vector.extract_strided_slice %22 {offsets = [0, 0], sizes = [18, 8], strides = [1, 1]} : vector<18x32xf32> to vector<18x8xf32>
    %26 = vector.extract_strided_slice %23 {offsets = [0, 0], sizes = [18, 8], strides = [1, 1]} : vector<18x32xf32> to vector<18x8xf32>
    %cst_32 = arith.constant dense<0.000000e+00> : vector<18x18xf32>
    %27 = tpu.matmul %24, %25, %cst_32 {dimension_numbers = #tpu.dot_dimension_numbers<[1], [1], [0], [0], [0, 0, 1, 0], [], []>} : vector<18x8xf32>, vector<18x8xf32>, vector<18x18xf32> -> vector<18x18xf32>
    %cst_33 = arith.constant 0.353553385 : f32
    %28 = vector.broadcast %cst_33 : f32 to vector<18x18xf32>
    %29 = arith.mulf %27, %28 : vector<18x18xf32>
    %30 = arith.addf %29, %5 : vector<18x18xf32>
    %cst_34 = arith.constant dense<0xFF800000> : vector<18xf32>
    %31 = vector.multi_reduction <maximumf>, %30, %cst_34 [1] : vector<18x18xf32> to vector<18xf32>
    %32 = vector.shape_cast %31 : vector<18xf32> to vector<18x1xf32>
    %33 = vector.broadcast %32 : vector<18x1xf32> to vector<18x18xf32>
    %34 = arith.subf %30, %33 : vector<18x18xf32>
    %35 = math.exp %34 : vector<18x18xf32>
    %cst_35 = arith.constant dense<0.000000e+00> : vector<18xf32>
    %36 = vector.multi_reduction <add>, %35, %cst_35 [1] : vector<18x18xf32> to vector<18xf32>
    %37 = vector.shape_cast %36 : vector<18xf32> to vector<18x1xf32>
    %38 = tpu.reciprocal %37 {approx = true} : vector<18x1xf32> -> vector<18x1xf32>
    %39 = vector.broadcast %38 : vector<18x1xf32> to vector<18x18xf32>
    %40 = arith.mulf %35, %39 : vector<18x18xf32>
    %cst_36 = arith.constant dense<0.000000e+00> : vector<18x8xf32>
    %41 = tpu.matmul %40, %26, %cst_36 {dimension_numbers = #tpu.dot_dimension_numbers<[1], [0], [0], [1], [0, 0, 1, 1], [], []>} : vector<18x18xf32>, vector<18x8xf32>, vector<18x8xf32> -> vector<18x8xf32>
    %42 = vector.extract_strided_slice %21 {offsets = [0, 8], sizes = [18, 8], strides = [1, 1]} : vector<18x32xf32> to vector<18x8xf32>
    %43 = vector.extract_strided_slice %22 {offsets = [0, 8], sizes = [18, 8], strides = [1, 1]} : vector<18x32xf32> to vector<18x8xf32>
    %44 = vector.extract_strided_slice %23 {offsets = [0, 8], sizes = [18, 8], strides = [1, 1]} : vector<18x32xf32> to vector<18x8xf32>
    %cst_37 = arith.constant dense<0.000000e+00> : vector<18x18xf32>
    %45 = tpu.matmul %42, %43, %cst_37 {dimension_numbers = #tpu.dot_dimension_numbers<[1], [1], [0], [0], [0, 0, 1, 0], [], []>} : vector<18x8xf32>, vector<18x8xf32>, vector<18x18xf32> -> vector<18x18xf32>
    %cst_38 = arith.constant 0.353553385 : f32
    %46 = vector.broadcast %cst_38 : f32 to vector<18x18xf32>
    %47 = arith.mulf %45, %46 : vector<18x18xf32>
    %48 = arith.addf %47, %5 : vector<18x18xf32>
    %cst_39 = arith.constant dense<0xFF800000> : vector<18xf32>
    %49 = vector.multi_reduction <maximumf>, %48, %cst_39 [1] : vector<18x18xf32> to vector<18xf32>
    %50 = vector.shape_cast %49 : vector<18xf32> to vector<18x1xf32>
    %51 = vector.broadcast %50 : vector<18x1xf32> to vector<18x18xf32>
    %52 = arith.subf %48, %51 : vector<18x18xf32>
    %53 = math.exp %52 : vector<18x18xf32>
    %cst_40 = arith.constant dense<0.000000e+00> : vector<18xf32>
    %54 = vector.multi_reduction <add>, %53, %cst_40 [1] : vector<18x18xf32> to vector<18xf32>
    %55 = vector.shape_cast %54 : vector<18xf32> to vector<18x1xf32>
    %56 = tpu.reciprocal %55 {approx = true} : vector<18x1xf32> -> vector<18x1xf32>
    %57 = vector.broadcast %56 : vector<18x1xf32> to vector<18x18xf32>
    %58 = arith.mulf %53, %57 : vector<18x18xf32>
    %cst_41 = arith.constant dense<0.000000e+00> : vector<18x8xf32>
    %59 = tpu.matmul %58, %44, %cst_41 {dimension_numbers = #tpu.dot_dimension_numbers<[1], [0], [0], [1], [0, 0, 1, 1], [], []>} : vector<18x18xf32>, vector<18x8xf32>, vector<18x8xf32> -> vector<18x8xf32>
    %60 = vector.extract_strided_slice %21 {offsets = [0, 16], sizes = [18, 8], strides = [1, 1]} : vector<18x32xf32> to vector<18x8xf32>
    %61 = vector.extract_strided_slice %22 {offsets = [0, 16], sizes = [18, 8], strides = [1, 1]} : vector<18x32xf32> to vector<18x8xf32>
    %62 = vector.extract_strided_slice %23 {offsets = [0, 16], sizes = [18, 8], strides = [1, 1]} : vector<18x32xf32> to vector<18x8xf32>
    %cst_42 = arith.constant dense<0.000000e+00> : vector<18x18xf32>
    %63 = tpu.matmul %60, %61, %cst_42 {dimension_numbers = #tpu.dot_dimension_numbers<[1], [1], [0], [0], [0, 0, 1, 0], [], []>} : vector<18x8xf32>, vector<18x8xf32>, vector<18x18xf32> -> vector<18x18xf32>
    %cst_43 = arith.constant 0.353553385 : f32
    %64 = vector.broadcast %cst_43 : f32 to vector<18x18xf32>
    %65 = arith.mulf %63, %64 : vector<18x18xf32>
    %66 = arith.addf %65, %5 : vector<18x18xf32>
    %cst_44 = arith.constant dense<0xFF800000> : vector<18xf32>
    %67 = vector.multi_reduction <maximumf>, %66, %cst_44 [1] : vector<18x18xf32> to vector<18xf32>
    %68 = vector.shape_cast %67 : vector<18xf32> to vector<18x1xf32>
    %69 = vector.broadcast %68 : vector<18x1xf32> to vector<18x18xf32>
    %70 = arith.subf %66, %69 : vector<18x18xf32>
    %71 = math.exp %70 : vector<18x18xf32>
    %cst_45 = arith.constant dense<0.000000e+00> : vector<18xf32>
    %72 = vector.multi_reduction <add>, %71, %cst_45 [1] : vector<18x18xf32> to vector<18xf32>
    %73 = vector.shape_cast %72 : vector<18xf32> to vector<18x1xf32>
    %74 = tpu.reciprocal %73 {approx = true} : vector<18x1xf32> -> vector<18x1xf32>
    %75 = vector.broadcast %74 : vector<18x1xf32> to vector<18x18xf32>
    %76 = arith.mulf %71, %75 : vector<18x18xf32>
    %cst_46 = arith.constant dense<0.000000e+00> : vector<18x8xf32>
    %77 = tpu.matmul %76, %62, %cst_46 {dimension_numbers = #tpu.dot_dimension_numbers<[1], [0], [0], [1], [0, 0, 1, 1], [], []>} : vector<18x18xf32>, vector<18x8xf32>, vector<18x8xf32> -> vector<18x8xf32>
    %78 = vector.extract_strided_slice %21 {offsets = [0, 24], sizes = [18, 8], strides = [1, 1]} : vector<18x32xf32> to vector<18x8xf32>
    %79 = vector.extract_strided_slice %22 {offsets = [0, 24], sizes = [18, 8], strides = [1, 1]} : vector<18x32xf32> to vector<18x8xf32>
    %80 = vector.extract_strided_slice %23 {offsets = [0, 24], sizes = [18, 8], strides = [1, 1]} : vector<18x32xf32> to vector<18x8xf32>
    %cst_47 = arith.constant dense<0.000000e+00> : vector<18x18xf32>
    %81 = tpu.matmul %78, %79, %cst_47 {dimension_numbers = #tpu.dot_dimension_numbers<[1], [1], [0], [0], [0, 0, 1, 0], [], []>} : vector<18x8xf32>, vector<18x8xf32>, vector<18x18xf32> -> vector<18x18xf32>
    %cst_48 = arith.constant 0.353553385 : f32
    %82 = vector.broadcast %cst_48 : f32 to vector<18x18xf32>
    %83 = arith.mulf %81, %82 : vector<18x18xf32>
    %84 = arith.addf %83, %5 : vector<18x18xf32>
    %cst_49 = arith.constant dense<0xFF800000> : vector<18xf32>
    %85 = vector.multi_reduction <maximumf>, %84, %cst_49 [1] : vector<18x18xf32> to vector<18xf32>
    %86 = vector.shape_cast %85 : vector<18xf32> to vector<18x1xf32>
    %87 = vector.broadcast %86 : vector<18x1xf32> to vector<18x18xf32>
    %88 = arith.subf %84, %87 : vector<18x18xf32>
    %89 = math.exp %88 : vector<18x18xf32>
    %cst_50 = arith.constant dense<0.000000e+00> : vector<18xf32>
    %90 = vector.multi_reduction <add>, %89, %cst_50 [1] : vector<18x18xf32> to vector<18xf32>
    %91 = vector.shape_cast %90 : vector<18xf32> to vector<18x1xf32>
    %92 = tpu.reciprocal %91 {approx = true} : vector<18x1xf32> -> vector<18x1xf32>
    %93 = vector.broadcast %92 : vector<18x1xf32> to vector<18x18xf32>
    %94 = arith.mulf %89, %93 : vector<18x18xf32>
    %cst_51 = arith.constant dense<0.000000e+00> : vector<18x8xf32>
    %95 = tpu.matmul %94, %80, %cst_51 {dimension_numbers = #tpu.dot_dimension_numbers<[1], [0], [0], [1], [0, 0, 1, 1], [], []>} : vector<18x18xf32>, vector<18x8xf32>, vector<18x8xf32> -> vector<18x8xf32>
    %96 = tpu.concatenate %41, %59, %77, %95 in 1 : vector<18x8xf32>, vector<18x8xf32>, vector<18x8xf32>, vector<18x8xf32> -> vector<18x32xf32>
    %cst_52 = arith.constant dense<0.000000e+00> : vector<18x32xf32>
    %97 = tpu.matmul %96, %8, %cst_52 {dimension_numbers = #tpu.dot_dimension_numbers<[1], [0], [0], [1], [0, 0, 1, 1], [], []>} : vector<18x32xf32>, vector<32x32xf32>, vector<18x32xf32> -> vector<18x32xf32>
    %98 = vector.broadcast %9 : vector<1x32xf32> to vector<18x32xf32>
    %99 = arith.addf %97, %98 : vector<18x32xf32>
    %100 = arith.addf %4, %99 : vector<18x32xf32>
    %cst_53 = arith.constant dense<0.000000e+00> : vector<18xf32>
    %101 = vector.multi_reduction <add>, %100, %cst_53 [1] : vector<18x32xf32> to vector<18xf32>
    %102 = vector.shape_cast %101 : vector<18xf32> to vector<18x1xf32>
    %cst_54 = arith.constant 3.200000e+01 : f32
    %103 = vector.broadcast %cst_54 : f32 to vector<18x1xf32>
    %104 = arith.divf %102, %103 : vector<18x1xf32>
    %105 = vector.broadcast %104 : vector<18x1xf32> to vector<18x32xf32>
    %106 = arith.subf %100, %105 : vector<18x32xf32>
    %107 = arith.mulf %106, %106 : vector<18x32xf32>
    %cst_55 = arith.constant dense<0.000000e+00> : vector<18xf32>
    %108 = vector.multi_reduction <add>, %107, %cst_55 [1] : vector<18x32xf32> to vector<18xf32>
    %109 = vector.shape_cast %108 : vector<18xf32> to vector<18x1xf32>
    %cst_56 = arith.constant 3.200000e+01 : f32
    %110 = vector.broadcast %cst_56 : f32 to vector<18x1xf32>
    %111 = arith.divf %109, %110 : vector<18x1xf32>
    %cst_57 = arith.constant 9.99999974E-6 : f32
    %112 = vector.broadcast %cst_57 : f32 to vector<18x1xf32>
    %113 = arith.addf %111, %112 : vector<18x1xf32>
    %114 = math.rsqrt %113 : vector<18x1xf32>
    %115 = vector.broadcast %114 : vector<18x1xf32> to vector<18x32xf32>
    %116 = arith.mulf %106, %115 : vector<18x32xf32>
    %117 = vector.broadcast %14 : vector<1x32xf32> to vector<18x32xf32>
    %118 = arith.mulf %116, %117 : vector<18x32xf32>
    %119 = vector.broadcast %15 : vector<1x32xf32> to vector<18x32xf32>
    %120 = arith.addf %118, %119 : vector<18x32xf32>
    %121 = arith.truncf %120 : vector<18x32xf32> to vector<18x32xbf16>
    %cst_58 = arith.constant dense<0.000000e+00> : vector<18x2048xf32>
    %122 = tpu.matmul %121, %10, %cst_58 {dimension_numbers = #tpu.dot_dimension_numbers<[1], [0], [0], [1], [0, 0, 1, 1], [], []>} : vector<18x32xbf16>, vector<32x2048xbf16>, vector<18x2048xf32> -> vector<18x2048xf32>
    %123 = vector.broadcast %11 : vector<1x2048xf32> to vector<18x2048xf32>
    %124 = arith.addf %122, %123 : vector<18x2048xf32>
    %cst_59 = arith.constant 0.000000e+00 : f32
    %125 = vector.broadcast %cst_59 : f32 to vector<18x2048xf32>
    %126 = arith.maximumf %124, %125 : vector<18x2048xf32>
    %127 = arith.truncf %126 : vector<18x2048xf32> to vector<18x2048xbf16>
    %cst_60 = arith.constant dense<0.000000e+00> : vector<18x32xf32>
    %128 = tpu.matmul %127, %12, %cst_60 {dimension_numbers = #tpu.dot_dimension_numbers<[1], [0], [0], [1], [0, 0, 1, 1], [], []>} : vector<18x2048xbf16>, vector<2048x32xbf16>, vector<18x32xf32> -> vector<18x32xf32>
    %129 = vector.broadcast %13 : vector<1x32xf32> to vector<18x32xf32>
    %130 = arith.addf %128, %129 : vector<18x32xf32>
    %131 = arith.addf %120, %130 : vector<18x32xf32>
    %cst_61 = arith.constant dense<0.000000e+00> : vector<18xf32>
    %132 = vector.multi_reduction <add>, %131, %cst_61 [1] : vector<18x32xf32> to vector<18xf32>
    %133 = vector.shape_cast %132 : vector<18xf32> to vector<18x1xf32>
    %cst_62 = arith.constant 3.200000e+01 : f32
    %134 = vector.broadcast %cst_62 : f32 to vector<18x1xf32>
    %135 = arith.divf %133, %134 : vector<18x1xf32>
    %136 = vector.broadcast %135 : vector<18x1xf32> to vector<18x32xf32>
    %137 = arith.subf %131, %136 : vector<18x32xf32>
    %138 = arith.mulf %137, %137 : vector<18x32xf32>
    %cst_63 = arith.constant dense<0.000000e+00> : vector<18xf32>
    %139 = vector.multi_reduction <add>, %138, %cst_63 [1] : vector<18x32xf32> to vector<18xf32>
    %140 = vector.shape_cast %139 : vector<18xf32> to vector<18x1xf32>
    %cst_64 = arith.constant 3.200000e+01 : f32
    %141 = vector.broadcast %cst_64 : f32 to vector<18x1xf32>
    %142 = arith.divf %140, %141 : vector<18x1xf32>
    %cst_65 = arith.constant 9.99999974E-6 : f32
    %143 = vector.broadcast %cst_65 : f32 to vector<18x1xf32>
    %144 = arith.addf %142, %143 : vector<18x1xf32>
    %145 = math.rsqrt %144 : vector<18x1xf32>
    %146 = vector.broadcast %145 : vector<18x1xf32> to vector<18x32xf32>
    %147 = arith.mulf %137, %146 : vector<18x32xf32>
    %148 = vector.broadcast %16 : vector<1x32xf32> to vector<18x32xf32>
    %149 = arith.mulf %147, %148 : vector<18x32xf32>
    %150 = vector.broadcast %17 : vector<1x32xf32> to vector<18x32xf32>
    %151 = arith.addf %149, %150 : vector<18x32xf32>
    %c0_66 = arith.constant 0 : index
    %c0_67 = arith.constant 0 : index
    %152 = vector.load %arg18[%c0_66, %c0_67] : memref<32x96xf32, #tpu.memory_space<vmem>>, vector<32x96xf32>
    %c0_68 = arith.constant 0 : index
    %c0_69 = arith.constant 0 : index
    %153 = vector.load %arg19[%c0_68, %c0_69] : memref<1x96xf32, #tpu.memory_space<vmem>>, vector<1x96xf32>
    %c0_70 = arith.constant 0 : index
    %c0_71 = arith.constant 0 : index
    %154 = vector.load %arg20[%c0_70, %c0_71] : memref<32x32xf32, #tpu.memory_space<vmem>>, vector<32x32xf32>
    %c0_72 = arith.constant 0 : index
    %c0_73 = arith.constant 0 : index
    %155 = vector.load %arg21[%c0_72, %c0_73] : memref<1x32xf32, #tpu.memory_space<vmem>>, vector<1x32xf32>
    %c0_74 = arith.constant 0 : index
    %c0_75 = arith.constant 0 : index
    %156 = vector.load %arg22[%c0_74, %c0_75] : memref<32x2048xbf16, #tpu.memory_space<vmem>>, vector<32x2048xbf16>
    %c0_76 = arith.constant 0 : index
    %c0_77 = arith.constant 0 : index
    %157 = vector.load %arg23[%c0_76, %c0_77] : memref<1x2048xf32, #tpu.memory_space<vmem>>, vector<1x2048xf32>
    %c0_78 = arith.constant 0 : index
    %c0_79 = arith.constant 0 : index
    %158 = vector.load %arg24[%c0_78, %c0_79] : memref<2048x32xbf16, #tpu.memory_space<vmem>>, vector<2048x32xbf16>
    %c0_80 = arith.constant 0 : index
    %c0_81 = arith.constant 0 : index
    %159 = vector.load %arg25[%c0_80, %c0_81] : memref<1x32xf32, #tpu.memory_space<vmem>>, vector<1x32xf32>
    %c0_82 = arith.constant 0 : index
    %c0_83 = arith.constant 0 : index
    %160 = vector.load %arg26[%c0_82, %c0_83] : memref<1x32xf32, #tpu.memory_space<vmem>>, vector<1x32xf32>
    %c0_84 = arith.constant 0 : index
    %c0_85 = arith.constant 0 : index
    %161 = vector.load %arg27[%c0_84, %c0_85] : memref<1x32xf32, #tpu.memory_space<vmem>>, vector<1x32xf32>
    %c0_86 = arith.constant 0 : index
    %c0_87 = arith.constant 0 : index
    %162 = vector.load %arg28[%c0_86, %c0_87] : memref<1x32xf32, #tpu.memory_space<vmem>>, vector<1x32xf32>
    %c0_88 = arith.constant 0 : index
    %c0_89 = arith.constant 0 : index
    %163 = vector.load %arg29[%c0_88, %c0_89] : memref<1x32xf32, #tpu.memory_space<vmem>>, vector<1x32xf32>
    %cst_90 = arith.constant dense<0.000000e+00> : vector<18x96xf32>
    %164 = tpu.matmul %151, %152, %cst_90 {dimension_numbers = #tpu.dot_dimension_numbers<[1], [0], [0], [1], [0, 0, 1, 1], [], []>} : vector<18x32xf32>, vector<32x96xf32>, vector<18x96xf32> -> vector<18x96xf32>
    %165 = vector.broadcast %153 : vector<1x96xf32> to vector<18x96xf32>
    %166 = arith.addf %164, %165 : vector<18x96xf32>
    %167 = vector.extract_strided_slice %166 {offsets = [0, 0], sizes = [18, 32], strides = [1, 1]} : vector<18x96xf32> to vector<18x32xf32>
    %168 = vector.extract_strided_slice %166 {offsets = [0, 32], sizes = [18, 32], strides = [1, 1]} : vector<18x96xf32> to vector<18x32xf32>
    %169 = vector.extract_strided_slice %166 {offsets = [0, 64], sizes = [18, 32], strides = [1, 1]} : vector<18x96xf32> to vector<18x32xf32>
    %170 = vector.extract_strided_slice %167 {offsets = [0, 0], sizes = [18, 8], strides = [1, 1]} : vector<18x32xf32> to vector<18x8xf32>
    %171 = vector.extract_strided_slice %168 {offsets = [0, 0], sizes = [18, 8], strides = [1, 1]} : vector<18x32xf32> to vector<18x8xf32>
    %172 = vector.extract_strided_slice %169 {offsets = [0, 0], sizes = [18, 8], strides = [1, 1]} : vector<18x32xf32> to vector<18x8xf32>
    %cst_91 = arith.constant dense<0.000000e+00> : vector<18x18xf32>
    %173 = tpu.matmul %170, %171, %cst_91 {dimension_numbers = #tpu.dot_dimension_numbers<[1], [1], [0], [0], [0, 0, 1, 0], [], []>} : vector<18x8xf32>, vector<18x8xf32>, vector<18x18xf32> -> vector<18x18xf32>
    %cst_92 = arith.constant 0.353553385 : f32
    %174 = vector.broadcast %cst_92 : f32 to vector<18x18xf32>
    %175 = arith.mulf %173, %174 : vector<18x18xf32>
    %176 = arith.addf %175, %5 : vector<18x18xf32>
    %cst_93 = arith.constant dense<0xFF800000> : vector<18xf32>
    %177 = vector.multi_reduction <maximumf>, %176, %cst_93 [1] : vector<18x18xf32> to vector<18xf32>
    %178 = vector.shape_cast %177 : vector<18xf32> to vector<18x1xf32>
    %179 = vector.broadcast %178 : vector<18x1xf32> to vector<18x18xf32>
    %180 = arith.subf %176, %179 : vector<18x18xf32>
    %181 = math.exp %180 : vector<18x18xf32>
    %cst_94 = arith.constant dense<0.000000e+00> : vector<18xf32>
    %182 = vector.multi_reduction <add>, %181, %cst_94 [1] : vector<18x18xf32> to vector<18xf32>
    %183 = vector.shape_cast %182 : vector<18xf32> to vector<18x1xf32>
    %184 = tpu.reciprocal %183 {approx = true} : vector<18x1xf32> -> vector<18x1xf32>
    %185 = vector.broadcast %184 : vector<18x1xf32> to vector<18x18xf32>
    %186 = arith.mulf %181, %185 : vector<18x18xf32>
    %cst_95 = arith.constant dense<0.000000e+00> : vector<18x8xf32>
    %187 = tpu.matmul %186, %172, %cst_95 {dimension_numbers = #tpu.dot_dimension_numbers<[1], [0], [0], [1], [0, 0, 1, 1], [], []>} : vector<18x18xf32>, vector<18x8xf32>, vector<18x8xf32> -> vector<18x8xf32>
    %188 = vector.extract_strided_slice %167 {offsets = [0, 8], sizes = [18, 8], strides = [1, 1]} : vector<18x32xf32> to vector<18x8xf32>
    %189 = vector.extract_strided_slice %168 {offsets = [0, 8], sizes = [18, 8], strides = [1, 1]} : vector<18x32xf32> to vector<18x8xf32>
    %190 = vector.extract_strided_slice %169 {offsets = [0, 8], sizes = [18, 8], strides = [1, 1]} : vector<18x32xf32> to vector<18x8xf32>
    %cst_96 = arith.constant dense<0.000000e+00> : vector<18x18xf32>
    %191 = tpu.matmul %188, %189, %cst_96 {dimension_numbers = #tpu.dot_dimension_numbers<[1], [1], [0], [0], [0, 0, 1, 0], [], []>} : vector<18x8xf32>, vector<18x8xf32>, vector<18x18xf32> -> vector<18x18xf32>
    %cst_97 = arith.constant 0.353553385 : f32
    %192 = vector.broadcast %cst_97 : f32 to vector<18x18xf32>
    %193 = arith.mulf %191, %192 : vector<18x18xf32>
    %194 = arith.addf %193, %5 : vector<18x18xf32>
    %cst_98 = arith.constant dense<0xFF800000> : vector<18xf32>
    %195 = vector.multi_reduction <maximumf>, %194, %cst_98 [1] : vector<18x18xf32> to vector<18xf32>
    %196 = vector.shape_cast %195 : vector<18xf32> to vector<18x1xf32>
    %197 = vector.broadcast %196 : vector<18x1xf32> to vector<18x18xf32>
    %198 = arith.subf %194, %197 : vector<18x18xf32>
    %199 = math.exp %198 : vector<18x18xf32>
    %cst_99 = arith.constant dense<0.000000e+00> : vector<18xf32>
    %200 = vector.multi_reduction <add>, %199, %cst_99 [1] : vector<18x18xf32> to vector<18xf32>
    %201 = vector.shape_cast %200 : vector<18xf32> to vector<18x1xf32>
    %202 = tpu.reciprocal %201 {approx = true} : vector<18x1xf32> -> vector<18x1xf32>
    %203 = vector.broadcast %202 : vector<18x1xf32> to vector<18x18xf32>
    %204 = arith.mulf %199, %203 : vector<18x18xf32>
    %cst_100 = arith.constant dense<0.000000e+00> : vector<18x8xf32>
    %205 = tpu.matmul %204, %190, %cst_100 {dimension_numbers = #tpu.dot_dimension_numbers<[1], [0], [0], [1], [0, 0, 1, 1], [], []>} : vector<18x18xf32>, vector<18x8xf32>, vector<18x8xf32> -> vector<18x8xf32>
    %206 = vector.extract_strided_slice %167 {offsets = [0, 16], sizes = [18, 8], strides = [1, 1]} : vector<18x32xf32> to vector<18x8xf32>
    %207 = vector.extract_strided_slice %168 {offsets = [0, 16], sizes = [18, 8], strides = [1, 1]} : vector<18x32xf32> to vector<18x8xf32>
    %208 = vector.extract_strided_slice %169 {offsets = [0, 16], sizes = [18, 8], strides = [1, 1]} : vector<18x32xf32> to vector<18x8xf32>
    %cst_101 = arith.constant dense<0.000000e+00> : vector<18x18xf32>
    %209 = tpu.matmul %206, %207, %cst_101 {dimension_numbers = #tpu.dot_dimension_numbers<[1], [1], [0], [0], [0, 0, 1, 0], [], []>} : vector<18x8xf32>, vector<18x8xf32>, vector<18x18xf32> -> vector<18x18xf32>
    %cst_102 = arith.constant 0.353553385 : f32
    %210 = vector.broadcast %cst_102 : f32 to vector<18x18xf32>
    %211 = arith.mulf %209, %210 : vector<18x18xf32>
    %212 = arith.addf %211, %5 : vector<18x18xf32>
    %cst_103 = arith.constant dense<0xFF800000> : vector<18xf32>
    %213 = vector.multi_reduction <maximumf>, %212, %cst_103 [1] : vector<18x18xf32> to vector<18xf32>
    %214 = vector.shape_cast %213 : vector<18xf32> to vector<18x1xf32>
    %215 = vector.broadcast %214 : vector<18x1xf32> to vector<18x18xf32>
    %216 = arith.subf %212, %215 : vector<18x18xf32>
    %217 = math.exp %216 : vector<18x18xf32>
    %cst_104 = arith.constant dense<0.000000e+00> : vector<18xf32>
    %218 = vector.multi_reduction <add>, %217, %cst_104 [1] : vector<18x18xf32> to vector<18xf32>
    %219 = vector.shape_cast %218 : vector<18xf32> to vector<18x1xf32>
    %220 = tpu.reciprocal %219 {approx = true} : vector<18x1xf32> -> vector<18x1xf32>
    %221 = vector.broadcast %220 : vector<18x1xf32> to vector<18x18xf32>
    %222 = arith.mulf %217, %221 : vector<18x18xf32>
    %cst_105 = arith.constant dense<0.000000e+00> : vector<18x8xf32>
    %223 = tpu.matmul %222, %208, %cst_105 {dimension_numbers = #tpu.dot_dimension_numbers<[1], [0], [0], [1], [0, 0, 1, 1], [], []>} : vector<18x18xf32>, vector<18x8xf32>, vector<18x8xf32> -> vector<18x8xf32>
    %224 = vector.extract_strided_slice %167 {offsets = [0, 24], sizes = [18, 8], strides = [1, 1]} : vector<18x32xf32> to vector<18x8xf32>
    %225 = vector.extract_strided_slice %168 {offsets = [0, 24], sizes = [18, 8], strides = [1, 1]} : vector<18x32xf32> to vector<18x8xf32>
    %226 = vector.extract_strided_slice %169 {offsets = [0, 24], sizes = [18, 8], strides = [1, 1]} : vector<18x32xf32> to vector<18x8xf32>
    %cst_106 = arith.constant dense<0.000000e+00> : vector<18x18xf32>
    %227 = tpu.matmul %224, %225, %cst_106 {dimension_numbers = #tpu.dot_dimension_numbers<[1], [1], [0], [0], [0, 0, 1, 0], [], []>} : vector<18x8xf32>, vector<18x8xf32>, vector<18x18xf32> -> vector<18x18xf32>
    %cst_107 = arith.constant 0.353553385 : f32
    %228 = vector.broadcast %cst_107 : f32 to vector<18x18xf32>
    %229 = arith.mulf %227, %228 : vector<18x18xf32>
    %230 = arith.addf %229, %5 : vector<18x18xf32>
    %cst_108 = arith.constant dense<0xFF800000> : vector<18xf32>
    %231 = vector.multi_reduction <maximumf>, %230, %cst_108 [1] : vector<18x18xf32> to vector<18xf32>
    %232 = vector.shape_cast %231 : vector<18xf32> to vector<18x1xf32>
    %233 = vector.broadcast %232 : vector<18x1xf32> to vector<18x18xf32>
    %234 = arith.subf %230, %233 : vector<18x18xf32>
    %235 = math.exp %234 : vector<18x18xf32>
    %cst_109 = arith.constant dense<0.000000e+00> : vector<18xf32>
    %236 = vector.multi_reduction <add>, %235, %cst_109 [1] : vector<18x18xf32> to vector<18xf32>
    %237 = vector.shape_cast %236 : vector<18xf32> to vector<18x1xf32>
    %238 = tpu.reciprocal %237 {approx = true} : vector<18x1xf32> -> vector<18x1xf32>
    %239 = vector.broadcast %238 : vector<18x1xf32> to vector<18x18xf32>
    %240 = arith.mulf %235, %239 : vector<18x18xf32>
    %cst_110 = arith.constant dense<0.000000e+00> : vector<18x8xf32>
    %241 = tpu.matmul %240, %226, %cst_110 {dimension_numbers = #tpu.dot_dimension_numbers<[1], [0], [0], [1], [0, 0, 1, 1], [], []>} : vector<18x18xf32>, vector<18x8xf32>, vector<18x8xf32> -> vector<18x8xf32>
    %242 = tpu.concatenate %187, %205, %223, %241 in 1 : vector<18x8xf32>, vector<18x8xf32>, vector<18x8xf32>, vector<18x8xf32> -> vector<18x32xf32>
    %cst_111 = arith.constant dense<0.000000e+00> : vector<18x32xf32>
    %243 = tpu.matmul %242, %154, %cst_111 {dimension_numbers = #tpu.dot_dimension_numbers<[1], [0], [0], [1], [0, 0, 1, 1], [], []>} : vector<18x32xf32>, vector<32x32xf32>, vector<18x32xf32> -> vector<18x32xf32>
    %244 = vector.broadcast %155 : vector<1x32xf32> to vector<18x32xf32>
    %245 = arith.addf %243, %244 : vector<18x32xf32>
    %246 = arith.addf %151, %245 : vector<18x32xf32>
    %cst_112 = arith.constant dense<0.000000e+00> : vector<18xf32>
    %247 = vector.multi_reduction <add>, %246, %cst_112 [1] : vector<18x32xf32> to vector<18xf32>
    %248 = vector.shape_cast %247 : vector<18xf32> to vector<18x1xf32>
    %cst_113 = arith.constant 3.200000e+01 : f32
    %249 = vector.broadcast %cst_113 : f32 to vector<18x1xf32>
    %250 = arith.divf %248, %249 : vector<18x1xf32>
    %251 = vector.broadcast %250 : vector<18x1xf32> to vector<18x32xf32>
    %252 = arith.subf %246, %251 : vector<18x32xf32>
    %253 = arith.mulf %252, %252 : vector<18x32xf32>
    %cst_114 = arith.constant dense<0.000000e+00> : vector<18xf32>
    %254 = vector.multi_reduction <add>, %253, %cst_114 [1] : vector<18x32xf32> to vector<18xf32>
    %255 = vector.shape_cast %254 : vector<18xf32> to vector<18x1xf32>
    %cst_115 = arith.constant 3.200000e+01 : f32
    %256 = vector.broadcast %cst_115 : f32 to vector<18x1xf32>
    %257 = arith.divf %255, %256 : vector<18x1xf32>
    %cst_116 = arith.constant 9.99999974E-6 : f32
    %258 = vector.broadcast %cst_116 : f32 to vector<18x1xf32>
    %259 = arith.addf %257, %258 : vector<18x1xf32>
    %260 = math.rsqrt %259 : vector<18x1xf32>
    %261 = vector.broadcast %260 : vector<18x1xf32> to vector<18x32xf32>
    %262 = arith.mulf %252, %261 : vector<18x32xf32>
    %263 = vector.broadcast %160 : vector<1x32xf32> to vector<18x32xf32>
    %264 = arith.mulf %262, %263 : vector<18x32xf32>
    %265 = vector.broadcast %161 : vector<1x32xf32> to vector<18x32xf32>
    %266 = arith.addf %264, %265 : vector<18x32xf32>
    %267 = arith.truncf %266 : vector<18x32xf32> to vector<18x32xbf16>
    %cst_117 = arith.constant dense<0.000000e+00> : vector<18x2048xf32>
    %268 = tpu.matmul %267, %156, %cst_117 {dimension_numbers = #tpu.dot_dimension_numbers<[1], [0], [0], [1], [0, 0, 1, 1], [], []>} : vector<18x32xbf16>, vector<32x2048xbf16>, vector<18x2048xf32> -> vector<18x2048xf32>
    %269 = vector.broadcast %157 : vector<1x2048xf32> to vector<18x2048xf32>
    %270 = arith.addf %268, %269 : vector<18x2048xf32>
    %cst_118 = arith.constant 0.000000e+00 : f32
    %271 = vector.broadcast %cst_118 : f32 to vector<18x2048xf32>
    %272 = arith.maximumf %270, %271 : vector<18x2048xf32>
    %273 = arith.truncf %272 : vector<18x2048xf32> to vector<18x2048xbf16>
    %cst_119 = arith.constant dense<0.000000e+00> : vector<18x32xf32>
    %274 = tpu.matmul %273, %158, %cst_119 {dimension_numbers = #tpu.dot_dimension_numbers<[1], [0], [0], [1], [0, 0, 1, 1], [], []>} : vector<18x2048xbf16>, vector<2048x32xbf16>, vector<18x32xf32> -> vector<18x32xf32>
    %275 = vector.broadcast %159 : vector<1x32xf32> to vector<18x32xf32>
    %276 = arith.addf %274, %275 : vector<18x32xf32>
    %277 = arith.addf %266, %276 : vector<18x32xf32>
    %cst_120 = arith.constant dense<0.000000e+00> : vector<18xf32>
    %278 = vector.multi_reduction <add>, %277, %cst_120 [1] : vector<18x32xf32> to vector<18xf32>
    %279 = vector.shape_cast %278 : vector<18xf32> to vector<18x1xf32>
    %cst_121 = arith.constant 3.200000e+01 : f32
    %280 = vector.broadcast %cst_121 : f32 to vector<18x1xf32>
    %281 = arith.divf %279, %280 : vector<18x1xf32>
    %282 = vector.broadcast %281 : vector<18x1xf32> to vector<18x32xf32>
    %283 = arith.subf %277, %282 : vector<18x32xf32>
    %284 = arith.mulf %283, %283 : vector<18x32xf32>
    %cst_122 = arith.constant dense<0.000000e+00> : vector<18xf32>
    %285 = vector.multi_reduction <add>, %284, %cst_122 [1] : vector<18x32xf32> to vector<18xf32>
    %286 = vector.shape_cast %285 : vector<18xf32> to vector<18x1xf32>
    %cst_123 = arith.constant 3.200000e+01 : f32
    %287 = vector.broadcast %cst_123 : f32 to vector<18x1xf32>
    %288 = arith.divf %286, %287 : vector<18x1xf32>
    %cst_124 = arith.constant 9.99999974E-6 : f32
    %289 = vector.broadcast %cst_124 : f32 to vector<18x1xf32>
    %290 = arith.addf %288, %289 : vector<18x1xf32>
    %291 = math.rsqrt %290 : vector<18x1xf32>
    %292 = vector.broadcast %291 : vector<18x1xf32> to vector<18x32xf32>
    %293 = arith.mulf %283, %292 : vector<18x32xf32>
    %294 = vector.broadcast %162 : vector<1x32xf32> to vector<18x32xf32>
    %295 = arith.mulf %293, %294 : vector<18x32xf32>
    %296 = vector.broadcast %163 : vector<1x32xf32> to vector<18x32xf32>
    %297 = arith.addf %295, %296 : vector<18x32xf32>
    %c0_125 = arith.constant 0 : index
    %c0_126 = arith.constant 0 : index
    %298 = vector.load %arg30[%c0_125, %c0_126] : memref<32x16xf32, #tpu.memory_space<vmem>>, vector<32x16xf32>
    %c0_127 = arith.constant 0 : index
    %c0_128 = arith.constant 0 : index
    %299 = vector.load %arg31[%c0_127, %c0_128] : memref<4x16xf32, #tpu.memory_space<vmem>>, vector<4x16xf32>
    %c0_129 = arith.constant 0 : index
    %c0_130 = arith.constant 0 : index
    %300 = vector.load %arg32[%c0_129, %c0_130] : memref<1x16xf32, #tpu.memory_space<vmem>>, vector<1x16xf32>
    %c0_131 = arith.constant 0 : index
    %c0_132 = arith.constant 0 : index
    %301 = vector.load %arg33[%c0_131, %c0_132] : memref<16x128xf32, #tpu.memory_space<vmem>>, vector<16x128xf32>
    %c0_133 = arith.constant 0 : index
    %c0_134 = arith.constant 0 : index
    %302 = vector.load %arg34[%c0_133, %c0_134] : memref<1x128xf32, #tpu.memory_space<vmem>>, vector<1x128xf32>
    %303 = vector.extract_strided_slice %297 {offsets = [0, 0], sizes = [1, 32], strides = [1, 1]} : vector<18x32xf32> to vector<1x32xf32>
    %304 = vector.extract_strided_slice %297 {offsets = [9, 0], sizes = [1, 32], strides = [1, 1]} : vector<18x32xf32> to vector<1x32xf32>
    %305 = tpu.concatenate %303, %304 in 0 : vector<1x32xf32>, vector<1x32xf32> -> vector<2x32xf32>
    %cst_135 = arith.constant dense<0.000000e+00> : vector<2x16xf32>
    %306 = tpu.matmul %305, %298, %cst_135 {dimension_numbers = #tpu.dot_dimension_numbers<[1], [0], [0], [1], [0, 0, 1, 1], [], []>} : vector<2x32xf32>, vector<32x16xf32>, vector<2x16xf32> -> vector<2x16xf32>
    %c0_136 = arith.constant 0 : index
    %c0_137 = arith.constant 0 : index
    %307 = vector.load %arg4[%c0_136, %c0_137] : memref<2x4xf32, #tpu.memory_space<vmem>>, vector<2x4xf32>
    %cst_138 = arith.constant dense<0.000000e+00> : vector<2x16xf32>
    %308 = tpu.matmul %307, %299, %cst_138 {dimension_numbers = #tpu.dot_dimension_numbers<[1], [0], [0], [1], [0, 0, 1, 1], [], []>} : vector<2x4xf32>, vector<4x16xf32>, vector<2x16xf32> -> vector<2x16xf32>
    %309 = arith.addf %306, %308 : vector<2x16xf32>
    %310 = vector.broadcast %300 : vector<1x16xf32> to vector<2x16xf32>
    %311 = arith.addf %309, %310 : vector<2x16xf32>
    %cst_139 = arith.constant 0.000000e+00 : f32
    %312 = vector.broadcast %cst_139 : f32 to vector<2x16xf32>
    %313 = arith.maximumf %311, %312 : vector<2x16xf32>
    %cst_140 = arith.constant dense<0.000000e+00> : vector<2x128xf32>
    %314 = tpu.matmul %313, %301, %cst_140 {dimension_numbers = #tpu.dot_dimension_numbers<[1], [0], [0], [1], [0, 0, 1, 1], [], []>} : vector<2x16xf32>, vector<16x128xf32>, vector<2x128xf32> -> vector<2x128xf32>
    %315 = vector.broadcast %302 : vector<1x128xf32> to vector<2x128xf32>
    %316 = arith.addf %314, %315 : vector<2x128xf32>
    %c0_141 = arith.constant 0 : index
    %c0_142 = arith.constant 0 : index
    %317 = vector.load %arg35[%c0_141, %c0_142] : memref<2x128xf32, #tpu.memory_space<vmem>>, vector<2x128xf32>
    tpu.vector_store %arg35[%c0_141, %c0_142], %316 {strides = array<i32>} : memref<2x128xf32, #tpu.memory_space<vmem>>, vector<2x128xf32>,
    return
  }
  func.func @transform_0(%arg0: i32) -> (i32, i32) {
    %c0_i32 = arith.constant 0 : i32
    %c0_i32_0 = arith.constant 0 : i32
    %c0_i32_1 = arith.constant 0 : i32
    return %c0_i32, %c0_i32_0 : i32, i32
  }
  func.func @transform_1(%arg0: i32) -> (i32, i32) {
    %c0_i32 = arith.constant 0 : i32
    %c0_i32_0 = arith.constant 0 : i32
    %c0_i32_1 = arith.constant 0 : i32
    return %c0_i32, %c0_i32_0 : i32, i32
  }
  func.func @transform_2(%arg0: i32) -> (i32, i32) {
    %c0_i32 = arith.constant 0 : i32
    %c0_i32_0 = arith.constant 0 : i32
    %c0_i32_1 = arith.constant 0 : i32
    return %c0_i32, %c0_i32_0 : i32, i32
  }
  func.func @transform_3(%arg0: i32) -> (i32, i32) {
    %c0_i32 = arith.constant 0 : i32
    %c0_i32_0 = arith.constant 0 : i32
    %c0_i32_1 = arith.constant 0 : i32
    return %c0_i32, %c0_i32_0 : i32, i32
  }
  func.func @transform_4(%arg0: i32) -> (i32, i32) {
    %c0_i32 = arith.constant 0 : i32
    %c0_i32_0 = arith.constant 0 : i32
    %c0_i32_1 = arith.constant 0 : i32
    return %c0_i32, %c0_i32_0 : i32, i32
  }
  func.func @transform_5(%arg0: i32) -> (i32, i32) {
    %c0_i32 = arith.constant 0 : i32
    %c0_i32_0 = arith.constant 0 : i32
    %c0_i32_1 = arith.constant 0 : i32
    return %c0_i32, %c0_i32_0 : i32, i32
  }
  func.func @transform_6(%arg0: i32) -> (i32, i32) {
    %c0_i32 = arith.constant 0 : i32
    %c0_i32_0 = arith.constant 0 : i32
    %c0_i32_1 = arith.constant 0 : i32
    return %c0_i32, %c0_i32_0 : i32, i32
  }
  func.func @transform_7(%arg0: i32) -> (i32, i32) {
    %c0_i32 = arith.constant 0 : i32
    %c0_i32_0 = arith.constant 0 : i32
    %c0_i32_1 = arith.constant 0 : i32
    return %c0_i32, %c0_i32_0 : i32, i32
  }
  func.func @transform_8(%arg0: i32) -> (i32, i32) {
    %c0_i32 = arith.constant 0 : i32
    %c0_i32_0 = arith.constant 0 : i32
    %c0_i32_1 = arith.constant 0 : i32
    return %c0_i32, %c0_i32_0 : i32, i32
  }
  func.func @transform_9(%arg0: i32) -> (i32, i32) {
    %c0_i32 = arith.constant 0 : i32
    %c0_i32_0 = arith.constant 0 : i32
    %c0_i32_1 = arith.constant 0 : i32
    return %c0_i32, %c0_i32_0 : i32, i32
  }
  func.func @transform_10(%arg0: i32) -> (i32, i32) {
    %c0_i32 = arith.constant 0 : i32
    %c0_i32_0 = arith.constant 0 : i32
    %c0_i32_1 = arith.constant 0 : i32
    return %c0_i32, %c0_i32_0 : i32, i32
  }
  func.func @transform_11(%arg0: i32) -> (i32, i32) {
    %c0_i32 = arith.constant 0 : i32
    %c0_i32_0 = arith.constant 0 : i32
    %c0_i32_1 = arith.constant 0 : i32
    return %c0_i32, %c0_i32_0 : i32, i32
  }
  func.func @transform_12(%arg0: i32) -> (i32, i32) {
    %c0_i32 = arith.constant 0 : i32
    %c0_i32_0 = arith.constant 0 : i32
    %c0_i32_1 = arith.constant 0 : i32
    return %c0_i32, %c0_i32_0 : i32, i32
  }
  func.func @transform_13(%arg0: i32) -> (i32, i32) {
    %c0_i32 = arith.constant 0 : i32
    %c0_i32_0 = arith.constant 0 : i32
    %c0_i32_1 = arith.constant 0 : i32
    return %c0_i32, %c0_i32_0 : i32, i32
  }
  func.func @transform_14(%arg0: i32) -> (i32, i32) {
    %c0_i32 = arith.constant 0 : i32
    %c0_i32_0 = arith.constant 0 : i32
    %c0_i32_1 = arith.constant 0 : i32
    return %c0_i32, %c0_i32_0 : i32, i32
  }
  func.func @transform_15(%arg0: i32) -> (i32, i32) {
    %c0_i32 = arith.constant 0 : i32
    %c0_i32_0 = arith.constant 0 : i32
    %c0_i32_1 = arith.constant 0 : i32
    return %c0_i32, %c0_i32_0 : i32, i32
  }
  func.func @transform_16(%arg0: i32) -> (i32, i32) {
    %c0_i32 = arith.constant 0 : i32
    %c0_i32_0 = arith.constant 0 : i32
    %c0_i32_1 = arith.constant 0 : i32
    return %c0_i32, %c0_i32_0 : i32, i32
  }
  func.func @transform_17(%arg0: i32) -> (i32, i32) {
    %c0_i32 = arith.constant 0 : i32
    %c0_i32_0 = arith.constant 0 : i32
    %c0_i32_1 = arith.constant 0 : i32
    return %c0_i32, %c0_i32_0 : i32, i32
  }
  func.func @transform_18(%arg0: i32) -> (i32, i32) {
    %c0_i32 = arith.constant 0 : i32
    %c0_i32_0 = arith.constant 0 : i32
    %c0_i32_1 = arith.constant 0 : i32
    return %c0_i32, %c0_i32_0 : i32, i32
  }
  func.func @transform_19(%arg0: i32) -> (i32, i32) {
    %c0_i32 = arith.constant 0 : i32
    %c0_i32_0 = arith.constant 0 : i32
    %c0_i32_1 = arith.constant 0 : i32
    return %c0_i32, %c0_i32_0 : i32, i32
  }
  func.func @transform_20(%arg0: i32) -> (i32, i32) {
    %c0_i32 = arith.constant 0 : i32
    %c0_i32_0 = arith.constant 0 : i32
    %c0_i32_1 = arith.constant 0 : i32
    return %c0_i32, %c0_i32_0 : i32, i32
  }
  func.func @transform_21(%arg0: i32) -> (i32, i32) {
    %c0_i32 = arith.constant 0 : i32
    %c0_i32_0 = arith.constant 0 : i32
    %c0_i32_1 = arith.constant 0 : i32
    return %c0_i32, %c0_i32_0 : i32, i32
  }
  func.func @transform_22(%arg0: i32) -> (i32, i32) {
    %c0_i32 = arith.constant 0 : i32
    %c0_i32_0 = arith.constant 0 : i32
    %c0_i32_1 = arith.constant 0 : i32
    return %c0_i32, %c0_i32_0 : i32, i32
  }
  func.func @transform_23(%arg0: i32) -> (i32, i32) {
    %c0_i32 = arith.constant 0 : i32
    %c0_i32_0 = arith.constant 0 : i32
    %c0_i32_1 = arith.constant 0 : i32
    return %c0_i32, %c0_i32_0 : i32, i32
  }
  func.func @transform_24(%arg0: i32) -> (i32, i32) {
    %c0_i32 = arith.constant 0 : i32
    %c0_i32_0 = arith.constant 0 : i32
    %c0_i32_1 = arith.constant 0 : i32
    return %c0_i32, %c0_i32_0 : i32, i32
  }
  func.func @transform_25(%arg0: i32) -> (i32, i32) {
    %c0_i32 = arith.constant 0 : i32
    %c0_i32_0 = arith.constant 0 : i32
    %c0_i32_1 = arith.constant 0 : i32
    return %c0_i32, %c0_i32_0 : i32, i32
  }
  func.func @transform_26(%arg0: i32) -> (i32, i32) {
    %c0_i32 = arith.constant 0 : i32
    %c0_i32_0 = arith.constant 0 : i32
    %c0_i32_1 = arith.constant 0 : i32
    return %c0_i32, %c0_i32_0 : i32, i32
  }
  func.func @transform_27(%arg0: i32) -> (i32, i32) {
    %c0_i32 = arith.constant 0 : i32
    %c0_i32_0 = arith.constant 0 : i32
    %c0_i32_1 = arith.constant 0 : i32
    return %c0_i32, %c0_i32_0 : i32, i32
  }
  func.func @transform_28(%arg0: i32) -> (i32, i32) {
    %c0_i32 = arith.constant 0 : i32
    %c0_i32_0 = arith.constant 0 : i32
    %c0_i32_1 = arith.constant 0 : i32
    return %c0_i32, %c0_i32_0 : i32, i32
  }
  func.func @transform_29(%arg0: i32) -> (i32, i32) {
    %c0_i32 = arith.constant 0 : i32
    %c0_i32_0 = arith.constant 0 : i32
    %c0_i32_1 = arith.constant 0 : i32
    return %c0_i32, %c0_i32_0 : i32, i32
  }
  func.func @transform_30(%arg0: i32) -> (i32, i32) {
    %c0_i32 = arith.constant 0 : i32
    %c0_i32_0 = arith.constant 0 : i32
    %c0_i32_1 = arith.constant 0 : i32
    return %c0_i32, %c0_i32_0 : i32, i32
  }
  func.func @transform_31(%arg0: i32) -> (i32, i32) {
    %c0_i32 = arith.constant 0 : i32
    %c0_i32_0 = arith.constant 0 : i32
    %c0_i32_1 = arith.constant 0 : i32
    return %c0_i32, %c0_i32_0 : i32, i32
  }
  func.func @transform_32(%arg0: i32) -> (i32, i32) {
    %c0_i32 = arith.constant 0 : i32
    %c0_i32_0 = arith.constant 0 : i32
    %c0_i32_1 = arith.constant 0 : i32
    return %c0_i32, %c0_i32_0 : i32, i32
  }
  func.func @transform_33(%arg0: i32) -> (i32, i32) {
    %c0_i32 = arith.constant 0 : i32
    %c0_i32_0 = arith.constant 0 : i32
    %c0_i32_1 = arith.constant 0 : i32
    return %c0_i32, %c0_i32_0 : i32, i32
  }
  func.func @transform_34(%arg0: i32) -> (i32, i32) {
    %c0_i32 = arith.constant 0 : i32
    %c0_i32_0 = arith.constant 0 : i32
    %c0_i32_1 = arith.constant 0 : i32
    return %c0_i32, %c0_i32_0 : i32, i32
  }
}

</mosaic_0001>

<bundles_post_ra>
// kernel: tile.9
= control target key start
LH: loop header
LB: loop body
LE: loop exit
PB: predicated region body
PF: predicated region fallthrough
CT: control target
= control target key end

     0   :  { %vm3_vm0 = vcmask 261120   ;;  %s6_s6 = smov 3  ;;  %s48_s0 = inlined_call_operand.vmem [shape: f32[2,9,32], index: 0, kind: input, shape index: {}]   ;;  %s49_s1 = inlined_call_operand.vmem [shape: f32[18,32], index: 1, kind: output, shape index: {}]  }
   0x1   :  { %v2_v0 = vld [vmem:[%s48_s0] sm:$0xff]   ;;  %v18_v2 = vld [vmem:[%s48_s0 + $0x11] sm:$0xff]  }
   0x2   :  { %v16_v1 = vld [vmem:[%s48_s0 + $0x8] ss:$8 sm:%s6_s6]   ;;  %4 = vst.msk [vmem:[%s49_s1] sm:$0xff] %vm3_vm0, %v2_v0  }
   0x3   :  { %17 = vst.msk [vmem:[%s49_s1 + $0x8] sm:$0x3] %vm3_vm0, %v16_v1  }
   0x4   :  { %19 = vst.msk [vmem:[%s49_s1 + $0xa] sm:$0xff] %vm3_vm0, %v18_v2  }

// kernel: eq.8
= control target key start
LH: loop header
LB: loop body
LE: loop exit
PB: predicated region body
PF: predicated region fallthrough
CT: control target
= control target key end

     0   :  { %vm7_vm0 = vcmask 72704   ;;  %vm13_vm1 = vcmask 146504   ;;  %s39_s0 = inlined_call_operand.vmem [shape: s32[2,9], index: 0, kind: input, shape index: {}]   ;;  %s40_s1 = inlined_call_operand.vmem [shape: s32[18], index: 1, kind: output, shape index: {}]  }
   0x1   :  { %v4_v0 = vld [vmem:[%s39_s0] sm:$0x3]  ;;  %s22_s0 = smov 9  }
   0x2   :  { %5 = vst [vmem:[#allocation1] sm:$0x3] %v4_v0 }
   0x9   :  { %v10_v1 = vld [vmem:[#allocation1 + $0x1] sm:$0x1]   ;;  %v6_v2 = vld [vmem:[#allocation1] sm:$0x1]  }
   0xa   :  { %11 = vrot.lane.b32.xlu0 %v10_v1, %s22_s0  ;;  %8 = vst.msk [vmem:[#allocation0] sm:$0x1] %vm7_vm0, %v6_v2  }
  0x7c   :  { %v12_v3 = vpop.permute.xlu0 %11  }
  0x7d   :  { %14 = vst.msk [vmem:[#allocation0] sm:$0x1] %vm13_vm1, %v12_v3  }
  0x84   :  { %v17_v4 = vld [vmem:[#allocation0] sm:$0x1] }
  0x85   :  { %20 = vst [vmem:[%s40_s1] sm:$0x1] %v17_v4 }

// kernel: forward.1
= control target key start
LH: loop header
LB: loop body
LE: loop exit
PB: predicated region body
PF: predicated region fallthrough
CT: control target
= control target key end

     0   :  { %s7829_s6 = smov 1   ;;  %s7830_s10 = smov 2   ;;  %s9402_s0 = inlined_call_operand.smem [shape: u32[35], index: -1, kind: input, shape index: {}] }
   0x1   :  { %s7887_s5 = sld [smem:[%s9402_s0]]   ;;  %s7831_s14 = smov 3  }
   0x2   :  { %s7892_s9 = sld [smem:[%s9402_s0 + %s7829_s6]]   ;;  %s7832_s18 = smov 4  }
   0x3   :  { %s7897_s13 = sld [smem:[%s9402_s0 + %s7830_s10]]   ;;  %s7833_s22 = smov 5  }
   0x4   :  { %s7902_s17 = sld [smem:[%s9402_s0 + %s7831_s14]]   ;;  %s7834_s26 = smov 6  }
   0x5   :  { %s7907_s21 = sld [smem:[%s9402_s0 + %s7832_s18]]   ;;  %s7835_s30 = smov 7  }
   0x6   :  { %s7912_s25 = sld [smem:[%s9402_s0 + %s7833_s22]]   ;;  %s7836_s4 = smov 8  }
   0x7   :  { %s7917_s29 = sld [smem:[%s9402_s0 + %s7834_s26]]   ;;  %s7837_s10 = smov 9  }
   0x8   :  { %s7922_s3 = sld [smem:[%s9402_s0 + %s7835_s30]]   ;;  %s7838_s15 = smov 10  }
   0x9   :  { %s7927_s8 = sld [smem:[%s9402_s0 + %s7836_s4]]   ;;  %s7839_s20 = smov 11  }
   0xa   :  { %9409 = sst [smem:[#allocation5_spill]] %s7902_s17  ;;  %s7840_s26 = smov 12  }
   0xb   :  { %s7932_s14 = sld [smem:[%s9402_s0 + %s7837_s10]]   ;;  %s7841_s1 = smov 13  }
   0xc   :  { %s7937_s19 = sld [smem:[%s9402_s0 + %s7838_s15]]   ;;  %s7842_s7 = smov 14  }
   0xd   :  { %s7942_s24 = sld [smem:[%s9402_s0 + %s7839_s20]]   ;;  %s7843_s15 = smov 15  }
   0xe   :  { %s7947_s30 = sld [smem:[%s9402_s0 + %s7840_s26]]   ;;  %s7844_s22 = smov 16  }
   0xf   :  { %s7952_s6 = sld [smem:[%s9402_s0 + %s7841_s1]]   ;;  %s7845_s28 = smov 17  }
  0x10   :  { %s7957_s12 = sld [smem:[%s9402_s0 + %s7842_s7]]   ;;  %s7846_s7 = smov 18  }
  0x11   :  { %s7962_s20 = sld [smem:[%s9402_s0 + %s7843_s15]]   ;;  %s7847_s15 = smov 19  }
  0x12   :  { %s7967_s27 = sld [smem:[%s9402_s0 + %s7844_s22]]   ;;  %s7848_s22 = smov 20  }
  0x13   :  { %s7972_s4 = sld [smem:[%s9402_s0 + %s7845_s28]]   ;;  %s7849_s28 = smov 21  }
  0x14   :  { %s7977_s17 = sld [smem:[%s9402_s0 + %s7846_s7]]   ;;  %s7850_s7 = smov 22  }
  0x17   :  { %9410 = sst [smem:[#allocation6_spill]] %s7962_s20 }
  0x18   :  { %9411 = sst [smem:[#allocation7_spill]] %s7967_s27 }
  0x19   :  { %9412 = sst [smem:[#allocation8_spill]] %s7972_s4 }
  0x1a   :  { %9413 = sst [smem:[#allocation9_spill]] %s7977_s17 }
  0x1b   :  { %s7982_s20 = sld [smem:[%s9402_s0 + %s7847_s15]]   ;;  %s7851_s15 = smov 23  }
  0x1c   :  { %s7987_s27 = sld [smem:[%s9402_s0 + %s7848_s22]]   ;;  %s7852_s22 = smov 24  }
  0x1d   :  { %s7992_s4 = sld [smem:[%s9402_s0 + %s7849_s28]]   ;;  %s7853_s28 = smov 25  }
  0x1e   :  { %s7997_s17 = sld [smem:[%s9402_s0 + %s7850_s7]]   ;;  %s7854_s7 = smov 26  }
  0x21   :  { %9414 = sst [smem:[#allocation10_spill]] %s7982_s20 }
  0x22   :  { %9415 = sst [smem:[#allocation11_spill]] %s7987_s27 }
  0x23   :  { %9416 = sst [smem:[#allocation12_spill]] %s7992_s4 }
  0x24   :  { %9417 = sst [smem:[#allocation13_spill]] %s7997_s17 }
  0x25   :  { %s8002_s20 = sld [smem:[%s9402_s0 + %s7851_s15]]   ;;  %s7855_s15 = smov 27  }
  0x26   :  { %s8007_s27 = sld [smem:[%s9402_s0 + %s7852_s22]]   ;;  %s7856_s22 = smov 28  }
  0x27   :  { %s8012_s4 = sld [smem:[%s9402_s0 + %s7853_s28]]   ;;  %s7857_s28 = smov 29  }
  0x28   :  { %s8017_s17 = sld [smem:[%s9402_s0 + %s7854_s7]]   ;;  %s7858_s7 = smov 30  }
  0x2b   :  { %9418 = sst [smem:[#allocation14_spill]] %s8002_s20 }
  0x2c   :  { %9419 = sst [smem:[#allocation15_spill]] %s8007_s27 }
  0x2d   :  { %9420 = sst [smem:[#allocation16_spill]] %s8012_s4 }
  0x2e   :  { %9421 = sst [smem:[#allocation17_spill]] %s8017_s17 }
  0x2f   :  { %s8022_s20 = sld [smem:[%s9402_s0 + %s7855_s15]]   ;;  %s7859_s15 = smov 31  }
  0x30   :  { %s8027_s27 = sld [smem:[%s9402_s0 + %s7856_s22]]   ;;  %s7860_s22 = smov 32  }
  0x31   :  { %s8032_s4 = sld [smem:[%s9402_s0 + %s7857_s28]]   ;;  %s7861_s28 = smov 33  }
  0x32   :  { %s8037_s17 = sld [smem:[%s9402_s0 + %s7858_s7]]   ;;  %s7862_s7 = smov 34  }
  0x35   :  { %9422 = sst [smem:[#allocation18_spill]] %s8022_s20 }
  0x36   :  { %9423 = sst [smem:[#allocation19_spill]] %s8027_s27 }
  0x37   :  { %9424 = sst [smem:[#allocation20_spill]] %s8032_s4 }
  0x38   :  { %9425 = sst [smem:[#allocation21_spill]] %s8037_s17 }
  0x39   :  { %s8042_s20 = sld [smem:[%s9402_s0 + %s7859_s15]]  }
  0x3a   :  { %s8047_s27 = sld [smem:[%s9402_s0 + %s7860_s22]]  }
  0x3b   :  { %s8052_s4 = sld [smem:[%s9402_s0 + %s7861_s28]]  }
  0x3c   :  { %s8057_s17 = sld [smem:[%s9402_s0 + %s7862_s7]]  }
  0x3d   :  { %v145_v0 = vld [vmem:[%s7907_s21 + $0x8] sm:$0xff]  ;;  %v144_v1 = vld [vmem:[%s7907_s21] sm:$0xff]  ;;  %vm152_vm0 = vcmask 130048   ;;  %v148_v3 = vld [vmem:[%s7887_s5 + $0x10] sm:$0x3] }
  0x3e   :  { %176 = vmatpush.msra.mxu0 %v145_v0  ;;  %v146_v2 = vld [vmem:[%s7887_s5] sm:$0xff]  ;;  %7572 = vmatpush.msra.mxu3 %v145_v0  ;;  %v194_v4 = vld [vmem:[%s7912_s25 + $0x18] sm:$0xff]  ;;  %v193_v5 = vld [vmem:[%s7912_s25 + $0x10] sm:$0xff] }
  0x3f   :  { %521 = vmatpush.msra.mxu1 %v194_v4 }
  0x40   :  { %177 = vmatpush.msra.mxu0 %v144_v1  ;;  %7573 = vmatpush.msra.mxu3 %v144_v1 }
  0x41   :  { %5809 = vmatmul.msk.f32.vlgmr.msra.gmra.mxu0 %vm152_vm0, %v146_v2  ;;  %5811 = vmatmul.msk.f32.vlgmr.msra.gmra.mxu3 %vm152_vm0, %v148_v3 }
  0x42   :  { %522 = vmatpush.msra.mxu1 %v193_v5 }
  0x43   :  { %74 = vsyncpa [#allocation3], 0  ;;  %v147_v6 = vld [vmem:[%s7887_s5 + $0x8] sm:$0xff]  ;;  %v191_v8 = vld [vmem:[%s7912_s25] sm:$0xff]  ;;  %vm499_vm1 = vcmask 261120   ;;  %s7863_s0 = smov 96  }
  0x44   :  { %v192_v7 = vld [vmem:[%s7912_s25 + $0x8] sm:$0xff]  ;;  %v149_v9 = vld [vmem:[%s7892_s9] sm:$0xff]  ;;  %v151_v15 = vld [vmem:[%s7892_s9 + $0x10] sm:$0x3]  ;;  %s7864_s5 = smov 88   ;;  %s7866_s21 = smov 120  }
  0x45   :  { %523 = vmatpush.msra.mxu1 %v192_v7  ;;  %v150_v12 = vld [vmem:[%s7892_s9 + $0x8] sm:$0xff]  ;;  %v7664_v18 = vld [vmem:[%s7917_s29] ss:$0 sm:$0xff]  ;;  %s7865_s9 = smov 80   ;;  %s7867_s25 = smov 72   ;;  %vm544_vm2 = vcmask 64512  }
  0x46   :  { %s7868_s29 = smov 112   ;;  %s7869_s15 = smov 104   ;;  %vm641_vm3 = vcmask 1041408   ;;  %v8166_v48 = vld [vmem:[%s7897_s13] sm:$0xff]  ;;  %vm589_vm4 = vcmask 146432   ;;  %v189_v58 = vld [vmem:[%s7897_s13 + $0x8] sm:$0xff] }
  0x47   :  { %524 = vmatpush.msra.mxu1 %v191_v8  ;;  %s7870_s16 = smov 64   ;;  %v190_v3 = vld [vmem:[%s7897_s13 + $0x10] sm:$0x3]  ;;  %vm596_vm5 = vcmask 140288   ;;  %s7871_s18 = smov 56   ;;  %vm1114_vm6 = vcmask 195584  }
  0x48   :  { %s7872_s22 = smov 40   ;;  %s7873_s23 = smov 48   ;;  %vm1165_vm7 = vcmask 254976  }
  0x49   :  { %5810 = vmatmul.msk.f32.gmra.mxu0 %vm152_vm0, %v147_v6  ;;  %s7874_s26 = smov 8   ;;  %s7875_s28 = smov 16  }
  0x4a   :  { %s7876_s1 = smov 24   ;;  %s9441_s2 = sld [smem:[#allocation14_spill]] }
  0x4b   :  { %s9442_s7 = sld [smem:[#allocation13_spill]] }
  0x4c   :  { %s9443_s10 = sld [smem:[#allocation15_spill]] }
  0x4d   :  { %s9444_s11 = sld [smem:[#allocation21_spill]] }
  0xbe   :  { %v179_v10 = vpop.f32.mrf.mxu0 }
  0xbf   :  { %v8072_v11 = vadd.f32 %v179_v10, %v149_v9 }
  0xc1   :  { %5812 = vmatmul.msk.f32.vlgmr.msra.gmra.mxu1 %vm499_vm1, %v8072_v11 }
  0xc4   :  { %v185_v16 = vpop.f32.mrf.mxu3 }
  0xc5   :  { %v8082_v17 = vadd.f32 %v185_v16, %v151_v15 }
  0xc6   :  { %v182_v13 = vpop.f32.mrf.mxu0 }
  0xc7   :  { %v8077_v14 = vadd.f32 %v182_v13, %v150_v12 }
  0xc9   :  { %5813 = vmatmul.msk.f32.gmra.mxu1 %vm499_vm1, %v8077_v14 }
  0xd1   :  { %5814 = vmatmul.msk.f32.gmra.mxu1 %vm499_vm1, %v8082_v17 }
 0x13e   :  { %v526_v19 = vpop.f32.mrf.mxu1 }
 0x13f   :  { %v8087_v20 = vadd.f32 %v7664_v18, %v526_v19 }
 0x141   :  { %538 = vrot.lane.b32.xlu1 %v8087_v20, %s7863_s0 }
 0x146   :  { %v529_v21 = vpop.f32.mrf.mxu1 }
 0x147   :  { %v8091_v22 = vadd.f32 %v7664_v18, %v529_v21 }
 0x149   :  { %678 = vrot.lane.b32.xlu2 %v8091_v22, %s7864_s5 }
 0x14e   :  { %v532_v23 = vpop.f32.mrf.mxu1 }
 0x14f   :  { %v8095_v24 = vadd.f32 %v7664_v18, %v532_v23 }
 0x151   :  { %542 = vrot.lane.b32.xlu0 %v8095_v24, %s7863_s0  ;;  %676 = vrot.lane.b32.xlu2 %v8087_v20, %s7864_s5 }
 0x152   :  { %680 = vrot.lane.b32.xlu1 %v8095_v24, %s7864_s5 }
 0x159   :  { %540 = vrot.lane.b32.xlu0 %v8091_v22, %s7863_s0  ;;  %814 = vrot.lane.b32.xlu2 %v8095_v24, %s7865_s9 }
 0x15a   :  { %672 = vrot.lane.b32.xlu1 %v8091_v22, %s7866_s21 }
 0x161   :  { %670 = vrot.lane.b32.xlu0 %v8087_v20, %s7866_s21  ;;  %812 = vrot.lane.b32.xlu2 %v8091_v22, %s7865_s9 }
 0x162   :  { %810 = vrot.lane.b32.xlu1 %v8087_v20, %s7865_s9 }
 0x169   :  { %948 = vrot.lane.b32.xlu0 %v8095_v24, %s7867_s25  ;;  %944 = vrot.lane.b32.xlu2 %v8087_v20, %s7867_s25 }
 0x16a   :  { %674 = vrot.lane.b32.xlu1 %v8095_v24, %s7866_s21 }
 0x171   :  { %946 = vrot.lane.b32.xlu0 %v8091_v22, %s7867_s25  ;;  %806 = vrot.lane.b32.xlu2 %v8091_v22, %s7868_s29 }
 0x172   :  { %938 = vrot.lane.b32.xlu1 %v8087_v20, %s7869_s15 }
 0x179   :  { %804 = vrot.lane.b32.xlu0 %v8087_v20, %s7868_s29  ;;  %942 = vrot.lane.b32.xlu2 %v8095_v24, %s7869_s15 }
 0x17a   :  { %808 = vrot.lane.b32.xlu1 %v8095_v24, %s7868_s29 }
 0x181   :  { %940 = vrot.lane.b32.xlu0 %v8091_v22, %s7869_s15 }
 0x182   :  { %628 = vrot.lane.b32.xlu1 %v8095_v24, %s7870_s16 }
 0x1a3   :  { %v679_v25 = vpop.permute.xlu2 %678 }
 0x1ab   :  { %v677_v26 = vpop.permute.xlu2 %676 }
 0x1b3   :  { %v815_v27 = vpop.permute.xlu2 %814  ;;  %v539_v29 = vpop.permute.xlu1 %538 }
 0x1b4   :  { %5835 = vmatpush.xpose.msk.msrb.mxu1 %vm544_vm2, %v815_v27 }
 0x1bb   :  { %v813_v28 = vpop.permute.xlu2 %812 }
 0x1bc   :  { %5836 = vmatpush.xpose.msk.msrb.mxu1 %vm544_vm2, %v813_v28 }
 0x1c3   :  { %v543_v30 = vpop.permute.xlu0 %542  ;;  %v945_v40 = vpop.permute.xlu2 %944 }
 0x1c4   :  { %v681_v31 = vpop.permute.xlu1 %680  ;;  %5815 = vmatpush.xpose.msk.msra.mxu2 %vm544_vm2, %v543_v30 }
 0x1c5   :  { %5825 = vmatpush.xpose.msk.msrb.mxu0 %vm544_vm2, %v681_v31 }
 0x1c9   :  { %5826 = vmatpush.xpose.msk.msrb.mxu0 %vm544_vm2, %v679_v25 }
 0x1cb   :  { %v541_v32 = vpop.permute.xlu0 %540  ;;  %v807_v43 = vpop.permute.xlu2 %806 }
 0x1cc   :  { %v673_v33 = vpop.permute.xlu1 %672  ;;  %5816 = vmatpush.xpose.msk.msra.mxu2 %vm544_vm2, %v541_v32 }
 0x1cd   :  { %5827 = vmatpush.xpose.msk.msrb.mxu0 %vm544_vm2, %v677_v26 }
 0x1d0   :  { %5817 = vmatpush.xpose.msk.msra.mxu2 %vm544_vm2, %v539_v29 }
 0x1d3   :  { %v671_v34 = vpop.permute.xlu0 %670  ;;  %5818 = vmatmul.msk.f32.vlgmr.msra.gmra.mxu2 %vm544_vm2, %v8087_v20  ;;  %v943_v46 = vpop.permute.xlu2 %942 }
 0x1d4   :  { %v811_v35 = vpop.permute.xlu1 %810  ;;  %5828 = vmatmul.msk.f32.vlgmr.msrb.gmra.mxu0 %vm544_vm2, %v671_v34  ;;  %v8217_v34 = vpack.i.bf16 %v8087_v20, %v8091_v22 }
 0x1d5   :  { %5837 = vmatpush.xpose.msk.msrb.mxu1 %vm544_vm2, %v811_v35 }
 0x1db   :  { %v949_v36 = vpop.permute.xlu0 %948  ;;  %5819 = vmatmul.msk.f32.gmra.mxu2 %vm544_vm2, %v8091_v22 }
 0x1dc   :  { %v675_v37 = vpop.permute.xlu1 %674  ;;  %5829 = vmatmul.msk.f32.gmra.mxu0 %vm544_vm2, %v673_v33 }
 0x1dd   :  { %5845 = vmatpush.xpose.msk.msra.mxu0 %vm544_vm2, %v949_v36 }
 0x1e3   :  { %v947_v38 = vpop.permute.xlu0 %946  ;;  %5820 = vmatmul.msk.f32.gmra.mxu2 %vm544_vm2, %v8095_v24 }
 0x1e4   :  { %v939_v39 = vpop.permute.xlu1 %938  ;;  %5830 = vmatmul.msk.f32.gmra.mxu0 %vm544_vm2, %v675_v37 }
 0x1e5   :  { %5846 = vmatpush.xpose.msk.msra.mxu0 %vm544_vm2, %v947_v38 }
 0x1e9   :  { %5847 = vmatpush.xpose.msk.msra.mxu0 %vm544_vm2, %v945_v40 }
 0x1eb   :  { %v805_v41 = vpop.permute.xlu0 %804 }
 0x1ec   :  { %v809_v42 = vpop.permute.xlu1 %808  ;;  %5838 = vmatmul.msk.f32.vlgmr.msrb.gmra.mxu1 %vm544_vm2, %v805_v41  ;;  %5848 = vmatmul.msk.f32.vlgmr.msra.gmra.mxu0 %vm544_vm2, %v939_v39 }
 0x1f3   :  { %v941_v44 = vpop.permute.xlu0 %940 }
 0x1f4   :  { %v629_v45 = vpop.permute.xlu1 %628  ;;  %5839 = vmatmul.msk.f32.gmra.mxu1 %vm544_vm2, %v807_v43  ;;  %5849 = vmatmul.msk.f32.gmra.mxu0 %vm544_vm2, %v941_v44 }
 0x1f5   :  { %5821 = vmatpush.msk.msrb.mxu3 %vm641_vm3, %v629_v45 }
 0x1fc   :  { %5840 = vmatmul.msk.f32.gmra.mxu1 %vm544_vm2, %v809_v42  ;;  %5850 = vmatmul.msk.f32.gmra.mxu0 %vm544_vm2, %v943_v46 }
 0x251   :  { %v711_v47 = vpop.f32.mrf.mxu0 }
 0x252   :  { %v720_v49 = vmul.f32 0.35355338, %v711_v47 }
 0x254   :  { %v8169_v50 = vadd.f32 %v720_v49, %v8166_v48 }
 0x256   :  { %v574_v51 = vpop.f32.mrf.mxu2  ;;  %v726_v52 = vsel %vm589_vm4, %v8169_v50, -inf }
 0x257   :  { %v583_v53 = vmul.f32 0.35355338, %v574_v51  ;;  %727 = vmax.xlane.f32.xlu2 %v726_v52 }
 0x259   :  { %v714_v54 = vpop.f32.mrf.mxu0  ;;  %v8174_v55 = vadd.f32 %v583_v53, %v8166_v48 }
 0x25a   :  { %v721_v56 = vmul.f32 0.35355338, %v714_v54 }
 0x25b   :  { %v590_v57 = vsel %vm589_vm4, %v8174_v55, -inf }
 0x25c   :  { %591 = vmax.xlane.f32.xlu0 %v590_v57  ;;  %v8179_v61 = vadd.f32 %v721_v56, %v189_v58 }
 0x25e   :  { %v577_v59 = vpop.f32.mrf.mxu2  ;;  %v729_v2 = vsel %vm589_vm4, %v8179_v61, -inf }
 0x25f   :  { %v584_v60 = vmul.f32 0.35355338, %v577_v59 }
 0x261   :  { %v717_v62 = vpop.f32.mrf.mxu0  ;;  %v8181_v63 = vadd.f32 %v584_v60, %v189_v58 }
 0x262   :  { %v722_v0 = vmul.f32 0.35355338, %v717_v62 }
 0x263   :  { %v593_v1 = vsel %vm589_vm4, %v8181_v63, -inf }
 0x264   :  { %594 = vmax.xlane.f32.xlu1 %v593_v1  ;;  %730 = vmax.xlane.f32.xlu0 %v729_v2  ;;  %v8188_v4 = vadd.f32 %v722_v0, %v190_v3 }
 0x266   :  { %v732_v8 = vsel %vm596_vm5, %v8188_v4, -inf  ;;  %v580_v16 = vpop.f32.mrf.mxu2 }
 0x267   :  { %v585_v19 = vmul.f32 0.35355338, %v580_v16 }
 0x269   :  { %v845_v5 = vpop.f32.mrf.mxu1  ;;  %v979_v6 = vpop.f32.mrf.mxu0  ;;  %v8201_v28 = vadd.f32 %v585_v19, %v190_v3 }
 0x26a   :  { %v854_v7 = vmul.f32 0.35355338, %v845_v5  ;;  %v988_v35 = vmul.f32 0.35355338, %v979_v6 }
 0x26b   :  { %v597_v31 = vsel %vm596_vm5, %v8201_v28, -inf }
 0x26c   :  { %733 = vmax.xlane.f32.xlu1 %v732_v8  ;;  %v8193_v9 = vadd.f32 %v854_v7, %v8166_v48  ;;  %v8226_v36 = vadd.f32 %v988_v35, %v8166_v48 }
 0x26e   :  { %v860_v10 = vsel %vm589_vm4, %v8193_v9, -inf  ;;  %v994_v38 = vsel %vm589_vm4, %v8226_v36, -inf }
 0x26f   :  { %861 = vmax.xlane.f32.xlu2 %v860_v10 }
 0x271   :  { %v848_v12 = vpop.f32.mrf.mxu1  ;;  %v982_v13 = vpop.f32.mrf.mxu0 }
 0x272   :  { %v855_v15 = vmul.f32 0.35355338, %v848_v12  ;;  %v989_v37 = vmul.f32 0.35355338, %v982_v13 }
 0x274   :  { %v8197_v18 = vadd.f32 %v855_v15, %v189_v58  ;;  %v8230_v20 = vadd.f32 %v989_v37, %v189_v58 }
 0x276   :  { %v863_v21 = vsel %vm589_vm4, %v8197_v18, -inf  ;;  %v997_v41 = vsel %vm589_vm4, %v8230_v20, -inf }
 0x277   :  { %864 = vmax.xlane.f32.xlu2 %v863_v21 }
 0x279   :  { %v851_v23 = vpop.f32.mrf.mxu1  ;;  %v985_v25 = vpop.f32.mrf.mxu0 }
 0x27a   :  { %v856_v26 = vmul.f32 0.35355338, %v851_v23  ;;  %v990_v27 = vmul.f32 0.35355338, %v985_v25 }
 0x27c   :  { %v8203_v29 = vadd.f32 %v990_v27, %v190_v3  ;;  %v8205_v30 = vadd.f32 %v856_v26, %v190_v3 }
 0x27e   :  { %v1000_v32 = vsel %vm596_vm5, %v8203_v29, -inf  ;;  %v866_v33 = vsel %vm596_vm5, %v8205_v30, -inf }
 0x27f   :  { %598 = vmax.xlane.f32.xlu2 %v597_v31  ;;  %1001 = vmax.xlane.f32.xlu1 %v1000_v32 }
 0x280   :  { %867 = vmax.xlane.f32.xlu0 %v866_v33 }
 0x294   :  { %763 = vrot.lane.b32.xlu0 %v8095_v24, %s7871_s18 }
 0x297   :  { %7625 = vrot.lane.b32.xlu2 %v8217_v34, %s7870_s16 }
 0x298   :  { %1031 = vrot.lane.b32.xlu1 %v8095_v24, %s7872_s22 }
 0x29c   :  { %7630 = vrot.lane.b32.xlu0 %v8217_v34, %s7871_s18 }
 0x2c6   :  { %995 = vmax.xlane.f32.xlu0 %v994_v38 }
 0x2ca   :  { %v728_v22 = vpop.xlane.xlu2 %727 }
 0x2cb   :  { %v735_v39 = vsub.f32 %v8169_v50, %v728_v22 }
 0x2cd   :  { %v738_v40 = vmul.f32 1.442695, %v735_v39 }
 0x2ce   :  { %998 = vmax.xlane.f32.xlu0 %v997_v41 }
 0x2cf   :  { %7680 = vpow2.f32 %v738_v40  ;;  %v592_v42 = vpop.xlane.xlu0 %591 }
 0x2d0   :  { %v600_v43 = vsub.f32 %v8174_v55, %v592_v42 }
 0x2d2   :  { %v603_v44 = vmul.f32 1.442695, %v600_v43 }
 0x2d4   :  { %7682 = vpow2.f32 %v603_v44 }
 0x2d5   :  { %v8236_v45 = vpop.eup %7680 }
 0x2d6   :  { %v744_v46 = vsel %vm589_vm4, %v8236_v45, 0.0 }
 0x2d7   :  { %v731_v47 = vpop.xlane.xlu0 %730  ;;  %745 = vadd.xlane.f32.xlu2 %v744_v46  ;;  %v595_v48 = vpop.xlane.xlu1 %594 }
 0x2d8   :  { %v736_v49 = vsub.f32 %v8179_v61, %v731_v47  ;;  %v601_v52 = vsub.f32 %v8181_v63, %v595_v48 }
 0x2da   :  { %v8241_v50 = vpop.eup %7682  ;;  %v740_v51 = vmul.f32 1.442695, %v736_v49  ;;  %v605_v54 = vmul.f32 1.442695, %v601_v52 }
 0x2db   :  { %v609_v53 = vsel %vm589_vm4, %v8241_v50, 0.0 }
 0x2dc   :  { %7684 = vpow2.f32 %v740_v51  ;;  %610 = vadd.xlane.f32.xlu1 %v609_v53 }
 0x2dd   :  { %7686 = vpow2.f32 %v605_v54 }
 0x2df   :  { %v734_v55 = vpop.xlane.xlu1 %733 }
 0x2e0   :  { %v737_v56 = vsub.f32 %v8188_v4, %v734_v55 }
 0x2e2   :  { %v8247_v57 = vpop.eup %7684  ;;  %v742_v58 = vmul.f32 1.442695, %v737_v56  ;;  %v862_v59 = vpop.xlane.xlu2 %861 }
 0x2e3   :  { %v747_v60 = vsel %vm589_vm4, %v8247_v57, 0.0  ;;  %v8251_v61 = vpop.eup %7686 }
 0x2e4   :  { %7688 = vpow2.f32 %v742_v58  ;;  %748 = vadd.xlane.f32.xlu0 %v747_v60  ;;  %v612_v0 = vsel %vm589_vm4, %v8251_v61, 0.0 }
 0x2ea   :  { %v8253_v62 = vpop.eup %7688  ;;  %v865_v63 = vpop.xlane.xlu2 %864 }
 0x2eb   :  { %v750_v1 = vsel %vm596_vm5, %v8253_v62, 0.0  ;;  %v870_v16 = vsub.f32 %v8197_v18, %v865_v63 }
 0x2ec   :  { %613 = vadd.xlane.f32.xlu0 %v612_v0  ;;  %751 = vadd.xlane.f32.xlu1 %v750_v1 }
 0x2ed   :  { %v874_v25 = vmul.f32 1.442695, %v870_v16 }
 0x2ef   :  { %897 = vrot.lane.b32.xlu2 %v8095_v24, %s7873_s23  ;;  %v869_v24 = vsub.f32 %v8193_v9, %v862_v59 }
 0x2f1   :  { %v872_v15 = vmul.f32 1.442695, %v869_v24 }
 0x2f2   :  { %v599_v2 = vpop.xlane.xlu2 %598  ;;  %v1002_v26 = vpop.xlane.xlu1 %1001 }
 0x2f3   :  { %v602_v3 = vsub.f32 %v8201_v28, %v599_v2  ;;  %v868_v10 = vpop.xlane.xlu0 %867  ;;  %v1005_v9 = vsub.f32 %v8203_v29, %v1002_v26 }
 0x2f4   :  { %v871_v29 = vsub.f32 %v8205_v30, %v868_v10 }
 0x2f5   :  { %v607_v4 = vmul.f32 1.442695, %v602_v3  ;;  %v1010_v18 = vmul.f32 1.442695, %v1005_v9 }
 0x2f6   :  { %v876_v35 = vmul.f32 1.442695, %v871_v29 }
 0x2f7   :  { %7690 = vpow2.f32 %v607_v4 }
 0x2f8   :  { %7692 = vpow2.f32 %v872_v15 }
 0x2f9   :  { %7694 = vpow2.f32 %v874_v25 }
 0x2fa   :  { %v7626_v5 = vpop.permute.xlu2 %7625  ;;  %7696 = vpow2.f32 %v1010_v18 }
 0x2fb   :  { %v7627_v6 = vunpack.i.l.bf16 %v7626_v5  ;;  %v7628_v8 = vunpack.i.h.bf16 %v7626_v5  ;;  %7698 = vpow2.f32 %v876_v35 }
 0x2fd   :  { %v8262_v7 = vpop.eup %7690  ;;  %658 = vmatpush.msrb.mxu3 %v7627_v6 }
 0x2fe   :  { %v615_v12 = vsel %vm596_vm5, %v8262_v7, 0.0  ;;  %v8273_v27 = vpop.eup %7692 }
 0x2ff   :  { %659 = vmatpush.msrb.mxu3 %v7628_v8  ;;  %616 = vadd.xlane.f32.xlu0 %v615_v12  ;;  %v878_v28 = vsel %vm589_vm4, %v8273_v27, 0.0  ;;  %v8278_v31 = vpop.eup %7694 }
 0x300   :  { %v881_v32 = vsel %vm589_vm4, %v8278_v31, 0.0  ;;  %v8282_v33 = vpop.eup %7696 }
 0x301   :  { %v8287_v37 = vpop.eup %7698 }
 0x302   :  { %v884_v40 = vsel %vm596_vm5, %v8287_v37, 0.0 }
 0x305   :  { %7640 = vrot.lane.b32.xlu1 %v8217_v34, %s7872_s22 }
 0x306   :  { %v764_v13 = vpop.permute.xlu0 %763 }
 0x307   :  { %5831 = vmatpush.msk.msra.mxu3 %vm641_vm3, %v764_v13 }
 0x30a   :  { %v1032_v46 = vpop.permute.xlu1 %1031 }
 0x30e   :  { %v7631_v19 = vpop.permute.xlu0 %7630 }
 0x30f   :  { %v7632_v21 = vunpack.i.l.bf16 %v7631_v19  ;;  %v7633_v23 = vunpack.i.h.bf16 %v7631_v19 }
 0x311   :  { %792 = vmatpush.msra.mxu3 %v7632_v21 }
 0x313   :  { %793 = vmatpush.msra.mxu3 %v7633_v23  ;;  %7635 = vrot.lane.b32.xlu0 %v8217_v34, %s7873_s23  ;;  %v1018_v34 = vsel %vm596_vm5, %v8282_v33, 0.0 }
 0x318   :  { %879 = vadd.xlane.f32.xlu2 %v878_v28 }
 0x320   :  { %882 = vadd.xlane.f32.xlu2 %v881_v32 }
 0x328   :  { %1019 = vadd.xlane.f32.xlu2 %v1018_v34 }
 0x339   :  { %v996_v38 = vpop.xlane.xlu0 %995 }
 0x33a   :  { %v1003_v22 = vsub.f32 %v8226_v36, %v996_v38 }
 0x33c   :  { %v1006_v39 = vmul.f32 1.442695, %v1003_v22 }
 0x33d   :  { %885 = vadd.xlane.f32.xlu0 %v884_v40 }
 0x33e   :  { %7700 = vpow2.f32 %v1006_v39 }
 0x341   :  { %v999_v41 = vpop.xlane.xlu0 %998 }
 0x342   :  { %v1004_v42 = vsub.f32 %v8230_v20, %v999_v41 }
 0x344   :  { %v8293_v43 = vpop.eup %7700  ;;  %v1008_v44 = vmul.f32 1.442695, %v1004_v42 }
 0x345   :  { %v1012_v30 = vsel %vm589_vm4, %v8293_v43, 0.0 }
 0x346   :  { %7702 = vpow2.f32 %v1008_v44  ;;  %1013 = vadd.xlane.f32.xlu1 %v1012_v30  ;;  %v198_v44 = vld [vmem:[%s7922_s3 + $0x10] sm:$0xff]  ;;  %v197_v30 = vld [vmem:[%s7922_s3 + $0x8] sm:$0xff] }
 0x34a   :  { %v746_v47 = vpop.xlane.xlu2 %745 }
 0x34c   :  { %v8297_v36 = vpop.eup %7702 }
 0x34d   :  { %v1015_v48 = vsel %vm589_vm4, %v8297_v36, 0.0 }
 0x34e   :  { %1016 = vadd.xlane.f32.xlu1 %v1015_v48 }
 0x34f   :  { %v611_v49 = vpop.xlane.xlu1 %610 }
 0x350   :  { %7704 = vrcp.f32 %v611_v49 }
 0x352   :  { %v898_v51 = vpop.permute.xlu2 %897 }
 0x353   :  { %5841 = vmatpush.msk.msrb.mxu2 %vm641_vm3, %v898_v51 }
 0x356   :  { %v7705_v20 = vpop.eup %7704 }
 0x357   :  { %v749_v52 = vpop.xlane.xlu0 %748  ;;  %v621_v53 = vmul.f32 %v7705_v20, %v8241_v50 }
 0x359   :  { %5822 = vmatmul.msk.f32.vlgmr.msrb.gmra.mxu3 %vm589_vm4, %v621_v53 }
 0x35a   :  { %5851 = vmatpush.msk.msrb.mxu3 %vm641_vm3, %v1032_v46  ;;  %v196_v46 = vld [vmem:[%s7922_s3] sm:$0xff] }
 0x35f   :  { %v614_v54 = vpop.xlane.xlu0 %613  ;;  %v752_v58 = vpop.xlane.xlu1 %751 }
 0x360   :  { %7706 = vrcp.f32 %v614_v54 }
 0x366   :  { %v7707_v55 = vpop.eup %7706 }
 0x367   :  { %v622_v56 = vmul.f32 %v7707_v55, %v8251_v61 }
 0x369   :  { %5823 = vmatmul.msk.f32.gmra.mxu3 %vm589_vm4, %v622_v56 }
 0x372   :  { %v617_v59 = vpop.xlane.xlu0 %616 }
 0x373   :  { %7708 = vrcp.f32 %v617_v59 }
 0x374   :  { %7710 = vrcp.f32 %v746_v47 }
 0x375   :  { %7712 = vrcp.f32 %v749_v52 }
 0x376   :  { %7714 = vrcp.f32 %v752_v58 }
 0x377   :  { %v7641_v60 = vpop.permute.xlu1 %7640 }
 0x378   :  { %v7642_v63 = vunpack.i.l.bf16 %v7641_v60  ;;  %v7643_v1 = vunpack.i.h.bf16 %v7641_v60 }
 0x379   :  { %v7709_v0 = vpop.eup %7708 }
 0x37a   :  { %1060 = vmatpush.msrb.mxu3 %v7642_v63  ;;  %v623_v50 = vmul.f32 %v7709_v0, %v8262_v7  ;;  %v7711_v2 = vpop.eup %7710 }
 0x37b   :  { %v756_v61 = vmul.f32 %v7711_v2, %v8236_v45  ;;  %v7713_v5 = vpop.eup %7712  ;;  %v7665_v2 = vld [vmem:[%s7927_s8] ss:$0 sm:$0xff]  ;;  %s9429_s8 = sld [smem:[#allocation6_spill]] }
 0x37c   :  { %5824 = vmatmul.msk.f32.gmra.mxu3 %vm589_vm4, %v623_v50  ;;  %v757_v8 = vmul.f32 %v7713_v5, %v8247_v57  ;;  %v7715_v10 = vpop.eup %7714 }
 0x37d   :  { %1061 = vmatpush.msrb.mxu3 %v7643_v1  ;;  %v758_v24 = vmul.f32 %v7715_v10, %v8253_v62 }
 0x384   :  { %5832 = vmatmul.msk.f32.vlgmr.msra.gmra.mxu3 %vm589_vm4, %v756_v61 }
 0x385   :  { %v7636_v3 = vpop.permute.xlu0 %7635 }
 0x386   :  { %v7637_v4 = vunpack.i.l.bf16 %v7636_v3  ;;  %v7638_v6 = vunpack.i.h.bf16 %v7636_v3 }
 0x388   :  { %926 = vmatpush.msrb.mxu2 %v7637_v4 }
 0x38a   :  { %927 = vmatpush.msrb.mxu2 %v7638_v6 }
 0x38b   :  { %v880_v7 = vpop.xlane.xlu2 %879 }
 0x38c   :  { %7716 = vrcp.f32 %v880_v7  ;;  %5833 = vmatmul.msk.f32.gmra.mxu3 %vm589_vm4, %v757_v8 }
 0x392   :  { %v7717_v12 = vpop.eup %7716 }
 0x393   :  { %v883_v45 = vpop.xlane.xlu2 %882  ;;  %v890_v13 = vmul.f32 %v7717_v12, %v8273_v27 }
 0x394   :  { %7718 = vrcp.f32 %v883_v45  ;;  %5834 = vmatmul.msk.f32.gmra.mxu3 %vm589_vm4, %v758_v24 }
 0x395   :  { %5842 = vmatmul.msk.f32.vlgmr.msrb.gmra.mxu2 %vm589_vm4, %v890_v13 }
 0x39a   :  { %v7719_v15 = vpop.eup %7718 }
 0x39b   :  { %v891_v16 = vmul.f32 %v7719_v15, %v8278_v31  ;;  %v1020_v27 = vpop.xlane.xlu2 %1019  ;;  %v7877_v15 = vmov 32.0  }
 0x39d   :  { %5843 = vmatmul.msk.f32.gmra.mxu2 %vm589_vm4, %v891_v16 }
 0x3b0   :  { %v886_v57 = vpop.xlane.xlu0 %885 }
 0x3b1   :  { %7720 = vrcp.f32 %v886_v57 }
 0x3b7   :  { %v7721_v19 = vpop.eup %7720 }
 0x3b8   :  { %v892_v21 = vmul.f32 %v7721_v19, %v8287_v37 }
 0x3b9   :  { %v1014_v23 = vpop.xlane.xlu1 %1013 }
 0x3ba   :  { %7722 = vrcp.f32 %v1014_v23  ;;  %5844 = vmatmul.msk.f32.gmra.mxu2 %vm589_vm4, %v892_v21 }
 0x3c0   :  { %v7723_v62 = vpop.eup %7722 }
 0x3c1   :  { %v1024_v25 = vmul.f32 %v7723_v62, %v8293_v43  ;;  %v1017_v26 = vpop.xlane.xlu1 %1016  ;;  %v199_v43 = vld [vmem:[%s7922_s3 + $0x18] sm:$0xff]  ;;  %s9428_s3 = sld [smem:[#allocation8_spill]] }
 0x3c2   :  { %7724 = vrcp.f32 %v1017_v26  ;;  %1142 = vmatpush.msra.mxu1 %v199_v43 }
 0x3c3   :  { %5852 = vmatmul.msk.f32.vlgmr.msrb.gmra.mxu3 %vm589_vm4, %v1024_v25  ;;  %7726 = vrcp.f32 %v1020_v27 }
 0x3c4   :  { %1143 = vmatpush.msra.mxu1 %v198_v44  ;;  %7728 = vrcp.f32 %v7877_v15  ;;  %v7264_v15 = vld [vmem:[%s7932_s14 + $0x5c] sm:$0xf0] }
 0x3c6   :  { %1144 = vmatpush.msra.mxu1 %v197_v30 }
 0x3c8   :  { %v7725_v9 = vpop.eup %7724  ;;  %1145 = vmatpush.msra.mxu1 %v196_v46  ;;  %v7269_v46 = vld [vmem:[%s7932_s14 + $0x8c] sm:$0xf] }
 0x3c9   :  { %v1025_v28 = vmul.f32 %v7725_v9, %v8297_v36  ;;  %v7727_v18 = vpop.eup %7726 }
 0x3ca   :  { %v1026_v31 = vmul.f32 %v7727_v18, %v8282_v33 }
 0x3cb   :  { %5853 = vmatmul.msk.f32.gmra.mxu3 %vm589_vm4, %v1025_v28 }
 0x3d3   :  { %5854 = vmatmul.msk.f32.gmra.mxu3 %vm589_vm4, %v1026_v31 }
 0x3dc   :  { %v661_v32 = vpop.f32.mrf.mxu3 }
 0x3ec   :  { %v664_v34 = vpop.f32.mrf.mxu3 }
 0x3ff   :  { %v667_v29 = vpop.f32.mrf.mxu3 }
 0x407   :  { %v795_v35 = vpop.f32.mrf.mxu3 }
 0x408   :  { %1075 = vrot.lane.b32.xlu2 %v795_v35, %s7874_s26 }
 0x40f   :  { %v798_v37 = vpop.f32.mrf.mxu3 }
 0x410   :  { %1077 = vrot.lane.b32.xlu2 %v798_v37, %s7874_s26 }
 0x417   :  { %v801_v38 = vpop.f32.mrf.mxu3 }
 0x418   :  { %v929_v22 = vpop.f32.mrf.mxu2  ;;  %1079 = vrot.lane.b32.xlu2 %v801_v38, %s7874_s26  ;;  %v5924_v38 = vld [vmem:[%s7932_s14 + $0x80] sm:$0xf] }
 0x419   :  { %1087 = vrot.lane.b32.xlu1 %v929_v22, %s7875_s28  ;;  %v7276_v22 = vld [vmem:[%s7932_s14 + $0xbc] sm:$0xf0] }
 0x420   :  { %v932_v33 = vpop.f32.mrf.mxu2 }
 0x421   :  { %1089 = vrot.lane.b32.xlu1 %v932_v33, %s7875_s28  ;;  %v7268_v33 = vld [vmem:[%s7932_s14 + $0x84] sm:$0xf] }
 0x43d   :  { %v935_v39 = vpop.f32.mrf.mxu2 }
 0x43e   :  { %1091 = vrot.lane.b32.xlu1 %v935_v39, %s7875_s28  ;;  %v5925_v39 = vor.u32 %v7276_v22, %v5924_v38  ;;  %v5876_v38 = vld [vmem:[%s7932_s14 + $0x10] sm:$0xf] }
 0x43f   :  { %v7262_v22 = vld [vmem:[%s7932_s14 + $0x4c] sm:$0xf0] }
 0x440   :  { %1453 = vmatpush.bf16.msra.mxu2 %v5925_v39 }
 0x446   :  { %v1063_v40 = vpop.f32.mrf.mxu3 }
 0x447   :  { %1099 = vrot.lane.b32.xlu0 %v1063_v40, %s7876_s1  ;;  %v5926_v40 = vld [vmem:[%s7932_s14 + $0xc0] sm:$0xf0] }
 0x448   :  { %v5929_v44 = vor.u32 %v7268_v33, %v5926_v40 }
 0x44a   :  { %1471 = vmatpush.bf16.msrb.mxu0 %v5929_v44 }
 0x44e   :  { %v1066_v41 = vpop.f32.mrf.mxu3 }
 0x44f   :  { %1101 = vrot.lane.b32.xlu0 %v1066_v41, %s7876_s1  ;;  %v5932_v41 = vld [vmem:[%s7932_s14 + $0x88] sm:$0xf] }
 0x456   :  { %v1069_v42 = vpop.f32.mrf.mxu3 }
 0x457   :  { %1103 = vrot.lane.b32.xlu0 %v1069_v42, %s7876_s1  ;;  %v7277_v42 = vld [vmem:[%s7932_s14 + $0xc4] sm:$0xf0] }
 0x458   :  { %v5933_v30 = vor.u32 %v7277_v42, %v5932_v41  ;;  %v7254_v41 = vld [vmem:[%s7932_s14 + $0x14] sm:$0xf] }
 0x459   :  { %v5878_v42 = vld [vmem:[%s7932_s14 + $0x50] sm:$0xf0] }
 0x45a   :  { %1489 = vmatpush.bf16.msra.mxu3 %v5933_v30  ;;  %v5881_v44 = vor.u32 %v7254_v41, %v5878_v42  ;;  %v7263_v30 = vld [vmem:[%s7932_s14 + $0x54] sm:$0xf0]  ;;  %v7266_v42 = vld [vmem:[%s7932_s14 + $0x6c] sm:$0xf0] }
 0x462   :  { %v1076_v47 = vpop.permute.xlu2 %1075 }
 0x463   :  { %v1108_v48 = vsel %vm544_vm2, %v661_v32, %v1076_v47  ;;  %v5934_v47 = vld [vmem:[%s7932_s14 + $0xc8] sm:$0xf0] }
 0x46a   :  { %v1078_v52 = vpop.permute.xlu2 %1077 }
 0x46b   :  { %v1109_v54 = vsel %vm544_vm2, %v664_v34, %v1078_v52 }
 0x472   :  { %v1080_v59 = vpop.permute.xlu2 %1079 }
 0x473   :  { %v1110_v63 = vsel %vm544_vm2, %v667_v29, %v1080_v59  ;;  %v7253_v59 = vld [vmem:[%s7932_s14 + $0xc] sm:$0xf] }
 0x48b   :  { %v1088_v36 = vpop.permute.xlu1 %1087 }
 0x48c   :  { %v1111_v49 = vsel %vm152_vm0, %v1108_v48, %v1088_v36  ;;  %v5937_v48 = vor.u32 %v7269_v46, %v5934_v47  ;;  %v7255_v46 = vld [vmem:[%s7932_s14 + $0x1c] sm:$0xf] }
 0x48e   :  { %1507 = vmatpush.bf16.msrb.mxu1 %v5937_v48 }
 0x493   :  { %v1090_v53 = vpop.permute.xlu1 %1089 }
 0x494   :  { %v1112_v55 = vsel %vm152_vm0, %v1109_v54, %v1090_v53  ;;  %v5862_v54 = vld [vmem:[%s7932_s14 + $0x40] sm:$0xf0] }
 0x4b0   :  { %v1092_v60 = vpop.permute.xlu1 %1091 }
 0x4b1   :  { %v1113_v0 = vsel %vm152_vm0, %v1110_v63, %v1092_v60  ;;  %v5870_v60 = vld [vmem:[%s7932_s14 + $0x48] sm:$0xf0] }
 0x4b9   :  { %v1100_v51 = vpop.permute.xlu0 %1099 }
 0x4ba   :  { %v1115_v20 = vsel %vm1114_vm6, %v1111_v49, %v1100_v51  ;;  %v5860_v49 = vld [vmem:[%s7932_s14] sm:$0xf] }
 0x4bb   :  { %5855 = vmatmul.msk.f32.vlgmr.msra.gmra.mxu1 %vm499_vm1, %v1115_v20  ;;  %v7260_v51 = vld [vmem:[%s7932_s14 + $0x3c] sm:$0xf0]  ;;  %v7252_v20 = vld [vmem:[%s7932_s14 + $0x4] sm:$0xf] }
 0x4bc   :  { %v5861_v53 = vor.u32 %v7260_v51, %v5860_v49  ;;  %v5886_v49 = vld [vmem:[%s7932_s14 + $0x58] sm:$0xf0]  ;;  %v7667_v51 = vld [vmem:[%s7957_s12] ss:$0 sm:$0xff]  ;;  %s9440_s12 = sld [smem:[#allocation17_spill]] }
 0x4be   :  { %1454 = vmatpush.bf16.msra.mxu2 %v5861_v53  ;;  %v5889_v53 = vor.u32 %v7255_v46, %v5886_v49  ;;  %v5916_v46 = vld [vmem:[%s7932_s14 + $0x38] sm:$0xf]  ;;  %v5918_v49 = vld [vmem:[%s7932_s14 + $0x78] sm:$0xf0] }
 0x4c1   :  { %v1102_v56 = vpop.permute.xlu0 %1101 }
 0x4c2   :  { %v1116_v58 = vsel %vm1114_vm6, %v1112_v55, %v1102_v56  ;;  %v5868_v55 = vld [vmem:[%s7932_s14 + $0x8] sm:$0xf]  ;;  %v5865_v56 = vor.u32 %v7252_v20, %v5862_v54 }
 0x4c3   :  { %5856 = vmatmul.msk.f32.gmra.mxu1 %vm499_vm1, %v1116_v58  ;;  %v7261_v58 = vld [vmem:[%s7932_s14 + $0x44] sm:$0xf0] }
 0x4c4   :  { %v5869_v63 = vor.u32 %v7261_v58, %v5868_v55  ;;  %1472 = vmatpush.bf16.msrb.mxu0 %v5865_v56 }
 0x4c6   :  { %1490 = vmatpush.bf16.msra.mxu3 %v5869_v63 }
 0x4c9   :  { %v1104_v50 = vpop.permute.xlu0 %1103 }
 0x4ca   :  { %v1117_v1 = vsel %vm1114_vm6, %v1113_v0, %v1104_v50  ;;  %v5873_v0 = vor.u32 %v7253_v59, %v5870_v60 }
 0x4cb   :  { %5857 = vmatmul.msk.f32.gmra.mxu1 %vm499_vm1, %v1117_v1 }
 0x4cc   :  { %1508 = vmatpush.bf16.msrb.mxu1 %v5873_v0 }
 0x538   :  { %v1147_v61 = vpop.f32.mrf.mxu1 }
 0x539   :  { %v1148_v3 = vadd.f32 %v7665_v2, %v1147_v61 }
 0x53b   :  { %v1156_v4 = vadd.f32 %v1148_v3, %v8072_v11  ;;  %v7729_v11 = vpop.eup %7728 }
 0x53c   :  { %v1170_v16 = vmul.f32 32.0, %v7729_v11  ;;  %vm1174_vm8 = vweird.f32 %v7729_v11 }
 0x53d   :  { %v1159_v5 = vsel %vm499_vm1, %v1156_v4, 0.0 }
 0x53e   :  { %1160 = vadd.xlane.f32.xlu2 %v1159_v5  ;;  %v1171_v57 = vsub.f32 1.0, %v1170_v16 }
 0x540   :  { %v1150_v6 = vpop.f32.mrf.mxu1  ;;  %v1172_v19 = vmul.f32 %v7729_v11, %v1171_v57  ;;  %v5940_v57 = vld [vmem:[%s7932_s14 + $0x90] sm:$0xf] }
 0x541   :  { %v1151_v8 = vadd.f32 %v7665_v2, %v1150_v6 }
 0x542   :  { %v1173_v21 = vadd.f32 %v7729_v11, %v1172_v19  ;;  %v7278_v19 = vld [vmem:[%s7932_s14 + $0xcc] sm:$0xf0] }
 0x543   :  { %v1157_v7 = vadd.f32 %v1151_v8, %v8077_v14 }
 0x544   :  { %v8359_v14 = vsel %vm1174_vm8, %v7729_v11, %v1173_v21  ;;  %v7666_v21 = vld [vmem:[%s7952_s6] ss:$0 sm:$0xff]  ;;  %s9435_s6 = sld [smem:[#allocation16_spill]] }
 0x545   :  { %v1162_v10 = vsel %vm499_vm1, %v1157_v7, 0.0 }
 0x546   :  { %1163 = vadd.xlane.f32.xlu1 %v1162_v10 }
 0x548   :  { %v1153_v12 = vpop.f32.mrf.mxu1 }
 0x549   :  { %v1154_v24 = vadd.f32 %v7665_v2, %v1153_v12 }
 0x54b   :  { %v1158_v45 = vadd.f32 %v1154_v24, %v8082_v17 }
 0x54d   :  { %v1166_v13 = vsel %vm1165_vm7, %v1158_v45, 0.0 }
 0x54e   :  { %1167 = vadd.xlane.f32.xlu0 %v1166_v13 }
 0x5b1   :  { %v1161_v23 = vpop.xlane.xlu2 %1160 }
 0x5b2   :  { %v1176_v62 = vmul.f32 %v8359_v14, %v1161_v23  ;;  %v5941_v23 = vor.u32 %v7278_v19, %v5940_v57 }
 0x5b4   :  { %v8362_v25 = vsub.f32 %v1156_v4, %v1176_v62  ;;  %v7270_v62 = vld [vmem:[%s7932_s14 + $0x94] sm:$0xf]  ;;  %1525 = vmatpush.bf16.msrb.mxu2 %v5941_v23  ;;  %v7265_v23 = vld [vmem:[%s7932_s14 + $0x64] sm:$0xf0] }
 0x5b6   :  { %v1182_v17 = vmul.f32 %v8362_v25, %v8362_v25 }
 0x5b8   :  { %v1185_v26 = vsel %vm499_vm1, %v1182_v17, 0.0  ;;  %v5942_v17 = vld [vmem:[%s7932_s14 + $0xd0] sm:$0xf0] }
 0x5b9   :  { %1186 = vadd.xlane.f32.xlu2 %v1185_v26  ;;  %v1164_v27 = vpop.xlane.xlu1 %1163  ;;  %v5948_v26 = vld [vmem:[%s7932_s14 + $0x98] sm:$0xf] }
 0x5ba   :  { %v1177_v9 = vmul.f32 %v8359_v14, %v1164_v27 }
 0x5bc   :  { %v8368_v28 = vsub.f32 %v1157_v7, %v1177_v9  ;;  %v5945_v9 = vor.u32 %v7270_v62, %v5942_v17  ;;  %v7257_v62 = vld [vmem:[%s7932_s14 + $0x2c] sm:$0xf] }
 0x5be   :  { %v1183_v18 = vmul.f32 %v8368_v28, %v8368_v28  ;;  %1543 = vmatpush.bf16.msra.mxu0 %v5945_v9  ;;  %v5972_v9 = vld [vmem:[%s7932_s14 + $0xb0] sm:$0xf] }
 0x5c0   :  { %v1188_v31 = vsel %vm499_vm1, %v1183_v18, 0.0  ;;  %v7279_v18 = vld [vmem:[%s7932_s14 + $0xd4] sm:$0xf0] }
 0x5c1   :  { %1189 = vadd.xlane.f32.xlu1 %v1188_v31  ;;  %v1168_v32 = vpop.xlane.xlu0 %1167  ;;  %v7271_v31 = vld [vmem:[%s7932_s14 + $0x9c] sm:$0xf] }
 0x5c2   :  { %v1178_v34 = vmul.f32 %v8359_v14, %v1168_v32  ;;  %1544 = vmatpush.bf16.msra.mxu0 %v5881_v44 }
 0x5c4   :  { %v8374_v29 = vsub.f32 %v1158_v45, %v1178_v34 }
 0x5c6   :  { %v1184_v35 = vmul.f32 %v8374_v29, %v8374_v29 }
 0x5c8   :  { %v1191_v37 = vsel %vm1165_vm7, %v1184_v35, 0.0  ;;  %v5949_v35 = vor.u32 %v7279_v18, %v5948_v26  ;;  %v5902_v26 = vld [vmem:[%s7932_s14 + $0x68] sm:$0xf0]  ;;  %v7282_v18 = vld [vmem:[%s7932_s14 + $0xec] sm:$0xf0] }
 0x5c9   :  { %1192 = vadd.xlane.f32.xlu0 %v1191_v37  ;;  %v5950_v37 = vld [vmem:[%s7932_s14 + $0xd8] sm:$0xf0] }
 0x5ca   :  { %v5953_v40 = vor.u32 %v7271_v31, %v5950_v37  ;;  %1561 = vmatpush.bf16.msrb.mxu3 %v5949_v35  ;;  %v7274_v31 = vld [vmem:[%s7932_s14 + $0xb4] sm:$0xf]  ;;  %v5980_v35 = vld [vmem:[%s7932_s14 + $0xb8] sm:$0xf] }
 0x5cb   :  { %v7283_v37 = vld [vmem:[%s7932_s14 + $0xf4] sm:$0xf0] }
 0x5cc   :  { %1579 = vmatpush.bf16.msra.mxu1 %v5953_v40  ;;  %v5908_v40 = vld [vmem:[%s7932_s14 + $0x30] sm:$0xf] }
 0x5cd   :  { %v5909_v44 = vor.u32 %v7266_v42, %v5908_v40  ;;  %v7343_v40 = vld [vmem:[%s7942_s24 + $0x1d8] sm:$0xff] }
 0x5d0   :  { %1580 = vmatpush.bf16.msra.mxu1 %v5889_v53  ;;  %v7298_v53 = vld [vmem:[%s7942_s24 + $0x70] sm:$0xff] }
 0x62c   :  { %v1187_v43 = vpop.xlane.xlu2 %1186 }
 0x62d   :  { %v1194_v36 = vmul.f32 %v1187_v43, %v8359_v14  ;;  %v5884_v43 = vld [vmem:[%s7932_s14 + $0x18] sm:$0xf] }
 0x62e   :  { %v5885_v48 = vor.u32 %v7263_v30, %v5884_v43  ;;  %v7258_v43 = vld [vmem:[%s7932_s14 + $0x34] sm:$0xf] }
 0x62f   :  { %v1197_v52 = vadd.f32 1e-05, %v1194_v36 }
 0x630   :  { %1562 = vmatpush.bf16.msrb.mxu3 %v5885_v48 }
 0x631   :  { %7730 = vrsqrt.f32 %v1197_v52  ;;  %vm1206_vm10 = vweird.f32 %v1197_v52 }
 0x634   :  { %v1190_v50 = vpop.xlane.xlu1 %1189 }
 0x635   :  { %v1195_v1 = vmul.f32 %v1190_v50, %v8359_v14 }
 0x637   :  { %v7731_v2 = vpop.eup %7730  ;;  %v1198_v61 = vadd.f32 1e-05, %v1195_v1 }
 0x638   :  { %v1201_v3 = vmul.f32 %v7731_v2, %v1197_v52  ;;  %vm1207_vm9 = vweird.f32 %v7731_v2 }
 0x639   :  { %7732 = vrsqrt.f32 %v1198_v61  ;;  %vm8401_vm11 = vmor %vm1206_vm10, %vm1207_vm9  ;;  %vm1216_vm13 = vweird.f32 %v1198_v61 }
 0x63a   :  { %v1202_v4 = vmul.f32 %v7731_v2, %v1201_v3  ;;  %v7272_v3 = vld [vmem:[%s7932_s14 + $0xa4] sm:$0xf] }
 0x63c   :  { %v1203_v5 = vmul.f32 0.5, %v1202_v4  ;;  %v1193_v6 = vpop.xlane.xlu0 %1192 }
 0x63d   :  { %v1196_v8 = vmul.f32 %v1193_v6, %v8359_v14  ;;  %v5964_v6 = vld [vmem:[%s7932_s14 + $0xa8] sm:$0xf] }
 0x63e   :  { %v1204_v7 = vsub.f32 1.5, %v1203_v5  ;;  %v5958_v5 = vld [vmem:[%s7932_s14 + $0xe0] sm:$0xf0] }
 0x63f   :  { %v7733_v10 = vpop.eup %7732  ;;  %v8398_v12 = vadd.f32 1e-05, %v1196_v8  ;;  %v7281_v8 = vld [vmem:[%s7932_s14 + $0xe4] sm:$0xf0] }
 0x640   :  { %v1205_v24 = vmul.f32 %v7731_v2, %v1204_v7  ;;  %v1211_v45 = vmul.f32 %v7733_v10, %v1198_v61  ;;  %vm1217_vm12 = vweird.f32 %v7733_v10  ;;  %v7280_v61 = vld [vmem:[%s7932_s14 + $0xdc] sm:$0xf0]  ;;  %v5961_v7 = vor.u32 %v7272_v3, %v5958_v5  ;;  %v7289_v3 = vld [vmem:[%s7942_s24 + $0x28] sm:$0xff]  ;;  %v7295_v5 = vld [vmem:[%s7942_s24 + $0x58] sm:$0xff] }
 0x641   :  { %7734 = vrsqrt.f32 %v8398_v12  ;;  %vm1218_vm14 = vmor %vm1216_vm13, %vm1217_vm12  ;;  %vm1226_vm8 = vweird.f32 %v8398_v12 }
 0x642   :  { %v1212_v13 = vmul.f32 %v7733_v10, %v1211_v45  ;;  %v1209_v11 = vsel %vm8401_vm11, %v7731_v2, %v1205_v24  ;;  %v5966_v24 = vld [vmem:[%s7932_s14 + $0xe8] sm:$0xf0]  ;;  %v5892_v45 = vld [vmem:[%s7932_s14 + $0x20] sm:$0xf] }
 0x643   :  { %v1230_v34 = vmul.f32 %v1209_v11, %v8362_v25  ;;  %v5877_v25 = vor.u32 %v7262_v22, %v5876_v38  ;;  %v7256_v11 = vld [vmem:[%s7932_s14 + $0x24] sm:$0xf]  ;;  %v5893_v57 = vor.u32 %v7264_v15, %v5892_v45  ;;  %v5981_v22 = vor.u32 %v7283_v37, %v5980_v35  ;;  %v7303_v45 = vld [vmem:[%s7942_s24 + $0x98] sm:$0xff]  ;;  %v7309_v15 = vld [vmem:[%s7942_s24 + $0xc8] sm:$0xff] }
 0x644   :  { %v1213_v16 = vmul.f32 0.5, %v1212_v13  ;;  %v7322_v35 = vld [vmem:[%s7942_s24 + $0x130] sm:$0xff] }
 0x645   :  { %v1236_v20 = vmul.f32 %v7666_v21, %v1230_v34  ;;  %1526 = vmatpush.bf16.msrb.mxu2 %v5877_v25  ;;  %v5974_v34 = vld [vmem:[%s7932_s14 + $0xf0] sm:$0xf0] }
 0x646   :  { %v1214_v27 = vsub.f32 1.5, %v1213_v16  ;;  %v5894_v16 = vld [vmem:[%s7932_s14 + $0x60] sm:$0xf0]  ;;  %v5977_v38 = vor.u32 %v7274_v31, %v5974_v34  ;;  %v5910_v25 = vld [vmem:[%s7932_s14 + $0x70] sm:$0xf0]  ;;  %v7339_v31 = vld [vmem:[%s7942_s24 + $0x1b8] sm:$0xff] }
 0x647   :  { %v7735_v32 = vpop.eup %7734  ;;  %v8429_v58 = vadd.f32 %v7667_v51, %v1236_v20  ;;  %v5897_v19 = vor.u32 %v7256_v11, %v5894_v16  ;;  %v5913_v30 = vor.u32 %v7258_v43, %v5910_v25  ;;  %v7299_v20 = vld [vmem:[%s7942_s24 + $0x78] sm:$0xff]  ;;  %v7286_v11 = vld [vmem:[%s7942_s24 + $0x10] sm:$0xff]  ;;  %v7345_v34 = vld [vmem:[%s7942_s24 + $0x1e8] sm:$0xff] }
 0x648   :  { %v1215_v33 = vmul.f32 %v7733_v10, %v1214_v27  ;;  %v1221_v39 = vmul.f32 %v7735_v32, %v8398_v12  ;;  %vm1227_vm15 = vweird.f32 %v7735_v32  ;;  %v7273_v12 = vld [vmem:[%s7932_s14 + $0xac] sm:$0xf]  ;;  %v5905_v27 = vor.u32 %v7257_v62, %v5902_v26  ;;  %v7302_v16 = vld [vmem:[%s7942_s24 + $0x90] sm:$0xff]  ;;  %v7347_v62 = vld [vmem:[%s7942_s24 + $0x1f8] sm:$0xff] }
 0x649   :  { %vm1228_vm9 = vmor %vm1226_vm8, %vm1227_vm15  ;;  %v5969_v13 = vor.u32 %v7273_v12, %v5966_v24  ;;  %v7310_v12 = vld [vmem:[%s7942_s24 + $0xd0] sm:$0xff]  ;;  %v7287_v24 = vld [vmem:[%s7942_s24 + $0x18] sm:$0xff] }
 0x64a   :  { %v1219_v47 = vsel %vm1218_vm14, %v7733_v10, %v1215_v33  ;;  %v1222_v36 = vmul.f32 %v7735_v32, %v1221_v39  ;;  %v5965_v10 = vor.u32 %v7281_v8, %v5964_v6  ;;  %v7275_v33 = vld [vmem:[%s7932_s14 + $0xbc] sm:$0xf]  ;;  %v7288_v8 = vld [vmem:[%s7942_s24 + $0x20] sm:$0xff]  ;;  %v7338_v37 = vld [vmem:[%s7942_s24 + $0x1b0] sm:$0xff] }
 0x64b   :  { %v1231_v52 = vmul.f32 %v1219_v47, %v8368_v28  ;;  %v5982_v39 = vld [vmem:[%s7932_s14 + $0xf8] sm:$0xf0]  ;;  %v7267_v47 = vld [vmem:[%s7932_s14 + $0x74] sm:$0xf0]  ;;  %v7300_v26 = vld [vmem:[%s7942_s24 + $0x80] sm:$0xff] }
 0x64c   :  { %v1223_v54 = vmul.f32 0.5, %v1222_v36  ;;  %v5985_v41 = vor.u32 %v7275_v33, %v5982_v39  ;;  %v7259_v36 = vld [vmem:[%s7932_s14 + $0x3c] sm:$0xf]  ;;  %v5917_v48 = vor.u32 %v7267_v47, %v5916_v46  ;;  %v7337_v33 = vld [vmem:[%s7942_s24 + $0x1a8] sm:$0xff]  ;;  %v7320_v25 = vld [vmem:[%s7942_s24 + $0x120] sm:$0xff] }
 0x64d   :  { %v1237_v55 = vmul.f32 %v7666_v21, %v1231_v52  ;;  %v7315_v52 = vld [vmem:[%s7942_s24 + $0xf8] sm:$0xff]  ;;  %v7326_v46 = vld [vmem:[%s7942_s24 + $0x150] sm:$0xff] }
 0x64e   :  { %v1224_v56 = vsub.f32 1.5, %v1223_v54  ;;  %v7314_v54 = vld [vmem:[%s7942_s24 + $0xf0] sm:$0xff]  ;;  %v7311_v6 = vld [vmem:[%s7942_s24 + $0xd8] sm:$0xff] }
 0x64f   :  { %v8431_v59 = vadd.f32 %v7667_v51, %v1237_v55  ;;  %v7291_v55 = vld [vmem:[%s7942_s24 + $0x38] sm:$0xff]  ;;  %v7342_v47 = vld [vmem:[%s7942_s24 + $0x1d0] sm:$0xff] }
 0x650   :  { %v1225_v60 = vmul.f32 %v7735_v32, %v1224_v56  ;;  %v7307_v56 = vld [vmem:[%s7942_s24 + $0xb8] sm:$0xff] }
 0x651   :  { %v8436_v28 = vpack.c.bf16 %v8431_v59, %v8429_v58  ;;  %v7327_v39 = vld [vmem:[%s7942_s24 + $0x158] sm:$0xff] }
 0x652   :  { %v1229_v63 = vsel %vm1228_vm9, %v7735_v32, %v1225_v60  ;;  %v5973_v32 = vor.u32 %v7282_v18, %v5972_v9  ;;  %v7297_v60 = vld [vmem:[%s7942_s24 + $0x68] sm:$0xff]  ;;  %v7346_v9 = vld [vmem:[%s7942_s24 + $0x1f0] sm:$0xff]  ;;  %v7323_v18 = vld [vmem:[%s7942_s24 + $0x138] sm:$0xff] }
 0x653   :  { %5986 = vmatmul.msk.bf16.vlgmr.msra.gmra.mxu2 %vm499_vm1, %v8436_v28  ;;  %5988 = vmatmul.msk.bf16.vlgmr.msrb.gmra.mxu0 %vm499_vm1, %v8436_v28  ;;  %v1232_v0 = vmul.f32 %v1229_v63, %v8374_v29  ;;  %v5956_v29 = vld [vmem:[%s7932_s14 + $0xa0] sm:$0xf]  ;;  %v7313_v63 = vld [vmem:[%s7942_s24 + $0xe8] sm:$0xff] }
 0x654   :  { %5990 = vmatmul.msk.bf16.vlgmr.msra.gmra.mxu3 %vm499_vm1, %v8436_v28  ;;  %5992 = vmatmul.msk.bf16.vlgmr.msrb.gmra.mxu1 %vm499_vm1, %v8436_v28  ;;  %v5957_v4 = vor.u32 %v7280_v61, %v5956_v29  ;;  %v7296_v29 = vld [vmem:[%s7942_s24 + $0x60] sm:$0xff] }
 0x655   :  { %v1238_v50 = vmul.f32 %v7666_v21, %v1232_v0  ;;  %1615 = vmatpush.bf16.msrb.mxu0 %v5961_v7  ;;  %1633 = vmatpush.bf16.msra.mxu3 %v5965_v10  ;;  %v5900_v21 = vld [vmem:[%s7932_s14 + $0x28] sm:$0xf]  ;;  %v7290_v0 = vld [vmem:[%s7942_s24 + $0x30] sm:$0xff]  ;;  %v7312_v61 = vld [vmem:[%s7942_s24 + $0xe0] sm:$0xff]  ;;  %s9430_s14 = sld [smem:[#allocation7_spill]] }
 0x656   :  { %1597 = vmatpush.bf16.msra.mxu2 %v5957_v4  ;;  %1651 = vmatpush.bf16.msrb.mxu1 %v5969_v13  ;;  %v5901_v17 = vor.u32 %v7265_v23, %v5900_v21  ;;  %v7305_v4 = vld [vmem:[%s7942_s24 + $0xa8] sm:$0xff]  ;;  %v7304_v7 = vld [vmem:[%s7942_s24 + $0xa0] sm:$0xff]  ;;  %v7294_v10 = vld [vmem:[%s7942_s24 + $0x50] sm:$0xff] }
 0x657   :  { %v8447_v1 = vadd.f32 %v7667_v51, %v1238_v50  ;;  %v5921_v51 = vor.u32 %v7259_v36, %v5918_v49  ;;  %v7306_v50 = vld [vmem:[%s7942_s24 + $0xb0] sm:$0xff]  ;;  %v7293_v13 = vld [vmem:[%s7942_s24 + $0x48] sm:$0xff]  ;;  %v7331_v23 = vld [vmem:[%s7942_s24 + $0x178] sm:$0xff] }
 0x658   :  { %v7301_v21 = vld [vmem:[%s7942_s24 + $0x88] sm:$0xff]  ;;  %v7335_v49 = vld [vmem:[%s7942_s24 + $0x198] sm:$0xff] }
 0x659   :  { %v8451_v2 = vpack.c.bf16 %v8447_v1, %v8447_v1  ;;  %1616 = vmatpush.bf16.msrb.mxu0 %v5897_v19  ;;  %1634 = vmatpush.bf16.msra.mxu3 %v5901_v17  ;;  %v7285_v19 = vld [vmem:[%s7942_s24 + $0x8] sm:$0xff]  ;;  %v7284_v17 = vld [vmem:[%s7942_s24] sm:$0xff] }
 0x65a   :  { %1598 = vmatpush.bf16.msra.mxu2 %v5893_v57  ;;  %1652 = vmatpush.bf16.msrb.mxu1 %v5905_v27  ;;  %v7308_v57 = vld [vmem:[%s7942_s24 + $0xc0] sm:$0xff]  ;;  %v7330_v27 = vld [vmem:[%s7942_s24 + $0x170] sm:$0xff] }
 0x663   :  { %5987 = vmatmul.msk.bf16.gmra.mxu2 %vm499_vm1, %v8451_v2  ;;  %5989 = vmatmul.msk.bf16.gmra.mxu0 %vm499_vm1, %v8451_v2 }
 0x664   :  { %5991 = vmatmul.msk.bf16.gmra.mxu3 %vm499_vm1, %v8451_v2  ;;  %5993 = vmatmul.msk.bf16.gmra.mxu1 %vm499_vm1, %v8451_v2 }
 0x673   :  { %5994 = vmatmul.msk.bf16.vlgmr.msrb.gmra.mxu2 %vm499_vm1, %v8436_v28  ;;  %5996 = vmatmul.msk.bf16.vlgmr.msra.gmra.mxu0 %vm499_vm1, %v8436_v28 }
 0x674   :  { %5998 = vmatmul.msk.bf16.vlgmr.msrb.gmra.mxu3 %vm499_vm1, %v8436_v28  ;;  %6000 = vmatmul.msk.bf16.vlgmr.msra.gmra.mxu1 %vm499_vm1, %v8436_v28 }
 0x675   :  { %1669 = vmatpush.bf16.msrb.mxu2 %v5973_v32  ;;  %1687 = vmatpush.bf16.msra.mxu0 %v5977_v38  ;;  %v7329_v32 = vld [vmem:[%s7942_s24 + $0x168] sm:$0xff]  ;;  %v7344_v38 = vld [vmem:[%s7942_s24 + $0x1e0] sm:$0xff] }
 0x676   :  { %1705 = vmatpush.bf16.msrb.mxu3 %v5981_v22  ;;  %1723 = vmatpush.bf16.msra.mxu1 %v5985_v41  ;;  %v7321_v22 = vld [vmem:[%s7942_s24 + $0x128] sm:$0xff]  ;;  %v8590_v41 = vld [vmem:[%s7937_s19] sm:$0xff] }
 0x677   :  { %v8600_v36 = vperm.slane %v8590_v41, 3 }
 0x679   :  { %1670 = vmatpush.bf16.msrb.mxu2 %v5909_v44  ;;  %1688 = vmatpush.bf16.msra.mxu0 %v5913_v30  ;;  %v7336_v44 = vld [vmem:[%s7942_s24 + $0x1a0] sm:$0xff]  ;;  %v8595_v30 = vperm.slane %v8590_v41, 1 }
 0x67a   :  { %1706 = vmatpush.bf16.msrb.mxu3 %v5917_v48  ;;  %1724 = vmatpush.bf16.msra.mxu1 %v5921_v51  ;;  %v7319_v48 = vld [vmem:[%s7942_s24 + $0x118] sm:$0xff] }
 0x683   :  { %5995 = vmatmul.msk.bf16.gmra.mxu2 %vm499_vm1, %v8451_v2  ;;  %5997 = vmatmul.msk.bf16.gmra.mxu0 %vm499_vm1, %v8451_v2 }
 0x684   :  { %5999 = vmatmul.msk.bf16.gmra.mxu3 %vm499_vm1, %v8451_v2  ;;  %6001 = vmatmul.msk.bf16.gmra.mxu1 %vm499_vm1, %v8451_v2 }
 0x693   :  { %6002 = vmatmul.msk.bf16.vlgmr.msra.gmra.mxu2 %vm499_vm1, %v8436_v28  ;;  %6004 = vmatmul.msk.bf16.vlgmr.msrb.gmra.mxu0 %vm499_vm1, %v8436_v28 }
 0x694   :  { %6006 = vmatmul.msk.bf16.vlgmr.msra.gmra.mxu3 %vm499_vm1, %v8436_v28  ;;  %6008 = vmatmul.msk.bf16.vlgmr.msrb.gmra.mxu1 %vm499_vm1, %v8436_v28 }
 0x695   :  { %2604 = vmatpush.bf16.msrb.mxu0 %v7299_v20  ;;  %2640 = vmatpush.bf16.msrb.mxu1 %v7315_v52 }
 0x696   :  { %2586 = vmatpush.bf16.msra.mxu2 %v7291_v55  ;;  %2622 = vmatpush.bf16.msra.mxu3 %v7307_v56 }
 0x699   :  { %2605 = vmatpush.bf16.msrb.mxu0 %v7298_v53  ;;  %2641 = vmatpush.bf16.msrb.mxu1 %v7314_v54  ;;  %v7325_v53 = vld [vmem:[%s7942_s24 + $0x148] sm:$0xff] }
 0x69a   :  { %2587 = vmatpush.bf16.msra.mxu2 %v7290_v0  ;;  %2623 = vmatpush.bf16.msra.mxu3 %v7306_v50  ;;  %v7341_v54 = vld [vmem:[%s7942_s24 + $0x1c8] sm:$0xff]  ;;  %v7318_v50 = vld [vmem:[%s7942_s24 + $0x110] sm:$0xff] }
 0x69d   :  { %2606 = vmatpush.bf16.msrb.mxu0 %v7297_v60  ;;  %2642 = vmatpush.bf16.msrb.mxu1 %v7313_v63  ;;  %v8609_v60 = vperm.slane %v8590_v41, 0 }
 0x69e   :  { %2588 = vmatpush.bf16.msra.mxu2 %v7289_v3  ;;  %2624 = vmatpush.bf16.msra.mxu3 %v7305_v4 }
 0x6a1   :  { %2607 = vmatpush.bf16.msrb.mxu0 %v7296_v29  ;;  %2643 = vmatpush.bf16.msrb.mxu1 %v7312_v61  ;;  %v7334_v29 = vld [vmem:[%s7942_s24 + $0x190] sm:$0xff]  ;;  %v8615_v61 = vperm.slane %v8590_v41, 2 }
 0x6a2   :  { %2589 = vmatpush.bf16.msra.mxu2 %v7288_v8  ;;  %2625 = vmatpush.bf16.msra.mxu3 %v7304_v7  ;;  %v7340_v8 = vld [vmem:[%s7942_s24 + $0x1c0] sm:$0xff] }
 0x6a3   :  { %6003 = vmatmul.msk.bf16.gmra.mxu2 %vm499_vm1, %v8451_v2  ;;  %6005 = vmatmul.msk.bf16.gmra.mxu0 %vm499_vm1, %v8451_v2 }
 0x6a4   :  { %6007 = vmatmul.msk.bf16.gmra.mxu3 %vm499_vm1, %v8451_v2  ;;  %6009 = vmatmul.msk.bf16.gmra.mxu1 %vm499_vm1, %v8451_v2 }
 0x6a5   :  { %2608 = vmatpush.bf16.msrb.mxu0 %v7295_v5  ;;  %2644 = vmatpush.bf16.msrb.mxu1 %v7311_v6  ;;  %v7324_v6 = vld [vmem:[%s7942_s24 + $0x140] sm:$0xff] }
 0x6a6   :  { %2590 = vmatpush.bf16.msra.mxu2 %v7287_v24  ;;  %2626 = vmatpush.bf16.msra.mxu3 %v7303_v45  ;;  %v7317_v45 = vld [vmem:[%s7942_s24 + $0x108] sm:$0xff] }
 0x6a9   :  { %2609 = vmatpush.bf16.msrb.mxu0 %v7294_v10  ;;  %2645 = vmatpush.bf16.msrb.mxu1 %v7310_v12 }
 0x6aa   :  { %2591 = vmatpush.bf16.msra.mxu2 %v7286_v11  ;;  %2627 = vmatpush.bf16.msra.mxu3 %v7302_v16 }
 0x6ad   :  { %2610 = vmatpush.bf16.msrb.mxu0 %v7293_v13  ;;  %2646 = vmatpush.bf16.msrb.mxu1 %v7309_v15  ;;  %v7333_v13 = vld [vmem:[%s7942_s24 + $0x188] sm:$0xff] }
 0x6ae   :  { %2592 = vmatpush.bf16.msra.mxu2 %v7285_v19  ;;  %2628 = vmatpush.bf16.msra.mxu3 %v7301_v21  ;;  %v7363_v19 = vld [vmem:[%s7942_s24 + $0x278] sm:$0xff] }
 0x6af   :  { %v7379_v21 = vld [vmem:[%s7942_s24 + $0x2f8] sm:$0xff] }
 0x6b1   :  { %2647 = vmatpush.bf16.msrb.mxu1 %v7308_v57 }
 0x6b2   :  { %2593 = vmatpush.bf16.msra.mxu2 %v7284_v17  ;;  %2629 = vmatpush.bf16.msra.mxu3 %v7300_v26 }
 0x6b3   :  { %6010 = vmatmul.msk.bf16.vlgmr.msrb.gmra.mxu2 %vm499_vm1, %v8436_v28  ;;  %6012 = vmatmul.msk.bf16.vlgmr.msra.gmra.mxu0 %vm499_vm1, %v8436_v28 }
 0x6b4   :  { %6014 = vmatmul.msk.bf16.vlgmr.msrb.gmra.mxu3 %vm499_vm1, %v8436_v28  ;;  %6016 = vmatmul.msk.bf16.vlgmr.msra.gmra.mxu1 %vm499_vm1, %v8436_v28  ;;  %v7292_v28 = vld [vmem:[%s7942_s24 + $0x40] sm:$0xff] }
 0x6b5   :  { %2611 = vmatpush.bf16.msrb.mxu0 %v7292_v28  ;;  %2712 = vmatpush.bf16.msra.mxu1 %v7347_v62 }
 0x6b6   :  { %2658 = vmatpush.bf16.msrb.mxu2 %v7323_v18  ;;  %2694 = vmatpush.bf16.msrb.mxu3 %v7339_v31  ;;  %v7332_v18 = vld [vmem:[%s7942_s24 + $0x180] sm:$0xff] }
 0x6b9   :  { %2676 = vmatpush.bf16.msra.mxu0 %v7331_v23  ;;  %2713 = vmatpush.bf16.msra.mxu1 %v7346_v9  ;;  %v7316_v9 = vld [vmem:[%s7942_s24 + $0x100] sm:$0xff] }
 0x6ba   :  { %2659 = vmatpush.bf16.msrb.mxu2 %v7322_v35  ;;  %2695 = vmatpush.bf16.msrb.mxu3 %v7338_v37  ;;  %v7362_v35 = vld [vmem:[%s7942_s24 + $0x270] sm:$0xff] }
 0x6bb   :  { %v7378_v37 = vld [vmem:[%s7942_s24 + $0x2f0] sm:$0xff] }
 0x6bd   :  { %2677 = vmatpush.bf16.msra.mxu0 %v7330_v27  ;;  %2714 = vmatpush.bf16.msra.mxu1 %v7345_v34 }
 0x6be   :  { %2660 = vmatpush.bf16.msrb.mxu2 %v7321_v22  ;;  %2696 = vmatpush.bf16.msrb.mxu3 %v7337_v33  ;;  %v7355_v22 = vld [vmem:[%s7942_s24 + $0x238] sm:$0xff] }
 0x6bf   :  { %v7371_v33 = vld [vmem:[%s7942_s24 + $0x2b8] sm:$0xff] }
 0x6c1   :  { %2678 = vmatpush.bf16.msra.mxu0 %v7329_v32  ;;  %2715 = vmatpush.bf16.msra.mxu1 %v7344_v38 }
 0x6c2   :  { %2661 = vmatpush.bf16.msrb.mxu2 %v7320_v25  ;;  %2697 = vmatpush.bf16.msrb.mxu3 %v7336_v44  ;;  %v7377_v25 = vld [vmem:[%s7942_s24 + $0x2e8] sm:$0xff] }
 0x6c3   :  { %6011 = vmatmul.msk.bf16.gmra.mxu2 %vm499_vm1, %v8451_v2  ;;  %6013 = vmatmul.msk.bf16.gmra.mxu0 %vm499_vm1, %v8451_v2 }
 0x6c4   :  { %6015 = vmatmul.msk.bf16.gmra.mxu3 %vm499_vm1, %v8451_v2  ;;  %6017 = vmatmul.msk.bf16.gmra.mxu1 %vm499_vm1, %v8451_v2  ;;  %v7328_v2 = vld [vmem:[%s7942_s24 + $0x160] sm:$0xff] }
 0x6c5   :  { %2679 = vmatpush.bf16.msra.mxu0 %v7328_v2  ;;  %2716 = vmatpush.bf16.msra.mxu1 %v7343_v40 }
 0x6c6   :  { %2662 = vmatpush.bf16.msrb.mxu2 %v7319_v48  ;;  %2698 = vmatpush.bf16.msrb.mxu3 %v7335_v49  ;;  %v7370_v48 = vld [vmem:[%s7942_s24 + $0x2b0] sm:$0xff] }
 0x6c9   :  { %2680 = vmatpush.bf16.msra.mxu0 %v7327_v39  ;;  %2717 = vmatpush.bf16.msra.mxu1 %v7342_v47  ;;  %v7354_v47 = vld [vmem:[%s7942_s24 + $0x230] sm:$0xff] }
 0x6ca   :  { %2663 = vmatpush.bf16.msrb.mxu2 %v7318_v50  ;;  %2699 = vmatpush.bf16.msrb.mxu3 %v7334_v29  ;;  %v7375_v29 = vld [vmem:[%s7942_s24 + $0x2d8] sm:$0xff] }
 0x6cd   :  { %2681 = vmatpush.bf16.msra.mxu0 %v7326_v46  ;;  %2718 = vmatpush.bf16.msra.mxu1 %v7341_v54  ;;  %v7353_v54 = vld [vmem:[%s7942_s24 + $0x228] sm:$0xff] }
 0x6ce   :  { %2664 = vmatpush.bf16.msrb.mxu2 %v7317_v45  ;;  %2700 = vmatpush.bf16.msrb.mxu3 %v7333_v13  ;;  %v8656_v45 = vperm.slane %v8590_v41, 7  ;;  %v7351_v13 = vld [vmem:[%s7942_s24 + $0x218] sm:$0xff] }
 0x6d0   :  { %v1474_v42 = vpop.f32.mrf.mxu0 }
 0x6d1   :  { %v1510_v43 = vpop.f32.mrf.mxu1  ;;  %v1475_v20 = vadd.f32 %v1474_v42, %v8595_v30  ;;  %2682 = vmatpush.bf16.msra.mxu0 %v7325_v53  ;;  %2719 = vmatpush.bf16.msra.mxu1 %v7340_v8 }
 0x6d2   :  { %v1511_v55 = vadd.f32 %v1510_v43, %v8600_v36  ;;  %2665 = vmatpush.bf16.msrb.mxu2 %v7316_v9  ;;  %2701 = vmatpush.bf16.msrb.mxu3 %v7332_v18  ;;  %v7361_v43 = vld [vmem:[%s7942_s24 + $0x268] sm:$0xff]  ;;  %v7366_v9 = vld [vmem:[%s7942_s24 + $0x290] sm:$0xff]  ;;  %v8671_v18 = vperm.slane %v8590_v41, 6 }
 0x6d3   :  { %v1736_v4 = vmax.f32 %v1475_v20, 0.0  ;;  %v7376_v20 = vld [vmem:[%s7942_s24 + $0x2e0] sm:$0xff] }
 0x6d4   :  { %v1738_v7 = vmax.f32 %v1511_v55, 0.0  ;;  %v7369_v55 = vld [vmem:[%s7942_s24 + $0x2a8] sm:$0xff] }
 0x6d5   :  { %2683 = vmatpush.bf16.msra.mxu0 %v7324_v6  ;;  %v7368_v6 = vld [vmem:[%s7942_s24 + $0x2a0] sm:$0xff] }
 0x6d6   :  { %v1456_v51 = vpop.f32.mrf.mxu2 }
 0x6d7   :  { %v1492_v52 = vpop.f32.mrf.mxu3  ;;  %v1457_v12 = vadd.f32 %v1456_v51, %v8609_v60  ;;  %v7360_v51 = vld [vmem:[%s7942_s24 + $0x260] sm:$0xff] }
 0x6d8   :  { %v1476_v56 = vpop.f32.mrf.mxu0  ;;  %v1493_v15 = vadd.f32 %v1492_v52, %v8615_v61 }
 0x6d9   :  { %v1477_v63 = vadd.f32 %v1476_v56, %v8595_v30  ;;  %v1512_v0 = vpop.f32.mrf.mxu1  ;;  %v1735_v17 = vmax.f32 %v1457_v12, 0.0  ;;  %v7374_v12 = vld [vmem:[%s7942_s24 + $0x2d0] sm:$0xff] }
 0x6da   :  { %v1513_v3 = vadd.f32 %v1512_v0, %v8600_v36  ;;  %v1737_v31 = vmax.f32 %v1493_v15, 0.0  ;;  %v7367_v15 = vld [vmem:[%s7942_s24 + $0x298] sm:$0xff] }
 0x6db   :  { %v1752_v5 = vmax.f32 %v1477_v63, 0.0 }
 0x6dc   :  { %v1754_v10 = vmax.f32 %v1513_v3, 0.0 }
 0x6dd   :  { %v1784_v24 = vpack.c.bf16 %v1752_v5, %v1736_v4  ;;  %v7352_v5 = vld [vmem:[%s7942_s24 + $0x220] sm:$0xff] }
 0x6de   :  { %v1786_v11 = vpack.c.bf16 %v1754_v10, %v1738_v7  ;;  %v1458_v16 = vpop.f32.mrf.mxu2  ;;  %v8651_v7 = vperm.slane %v8590_v41, 5  ;;  %v7358_v10 = vld [vmem:[%s7942_s24 + $0x250] sm:$0xff] }
 0x6df   :  { %v1459_v28 = vadd.f32 %v1458_v16, %v8609_v60  ;;  %v1494_v57 = vpop.f32.mrf.mxu3  ;;  %2612 = vmatmul.bf16.vlgmr.msrb.gmra.mxu0 %v1784_v24 }
 0x6e0   :  { %v1495_v23 = vadd.f32 %v1494_v57, %v8615_v61  ;;  %2648 = vmatmul.bf16.vlgmr.msrb.gmra.mxu1 %v1786_v11  ;;  %v1479_v62 = vpop.f32.mrf.mxu0  ;;  %2748 = vmatpush.bf16.msrb.mxu0 %v7363_v19  ;;  %v7357_v57 = vld [vmem:[%s7942_s24 + $0x248] sm:$0xff] }
 0x6e1   :  { %v1751_v26 = vmax.f32 %v1459_v28, 0.0  ;;  %v1515_v27 = vpop.f32.mrf.mxu1  ;;  %2784 = vmatpush.bf16.msrb.mxu1 %v7379_v21  ;;  %v1480_v38 = vadd.f32 %v1479_v62, %v8595_v30  ;;  %v7373_v19 = vld [vmem:[%s7942_s24 + $0x2c8] sm:$0xff]  ;;  %v8665_v62 = vperm.slane %v8590_v41, 4 }
 0x6e2   :  { %v1753_v32 = vmax.f32 %v1495_v23, 0.0  ;;  %v1516_v39 = vadd.f32 %v1515_v27, %v8600_v36  ;;  %v7350_v27 = vld [vmem:[%s7942_s24 + $0x210] sm:$0xff]  ;;  %v7365_v41 = vld [vmem:[%s7942_s24 + $0x288] sm:$0xff] }
 0x6e3   :  { %v1783_v34 = vpack.c.bf16 %v1751_v26, %v1735_v17  ;;  %v1768_v30 = vmax.f32 %v1480_v38, 0.0 }
 0x6e4   :  { %v1785_v2 = vpack.c.bf16 %v1753_v32, %v1737_v31  ;;  %2749 = vmatpush.bf16.msrb.mxu0 %v7362_v35  ;;  %v1770_v49 = vmax.f32 %v1516_v39, 0.0  ;;  %v7356_v35 = vld [vmem:[%s7942_s24 + $0x240] sm:$0xff]  ;;  %v7349_v39 = vld [vmem:[%s7942_s24 + $0x208] sm:$0xff] }
 0x6e5   :  { %2594 = vmatmul.bf16.vlgmr.msra.gmra.mxu2 %v1783_v34  ;;  %2785 = vmatpush.bf16.msrb.mxu1 %v7378_v37  ;;  %v1800_v53 = vpack.c.bf16 %v1768_v30, %v1768_v30  ;;  %v7372_v37 = vld [vmem:[%s7942_s24 + $0x2c0] sm:$0xff]  ;;  %v7395_v30 = vld [vmem:[%s7942_s24 + $0x378] sm:$0xff] }
 0x6e6   :  { %2630 = vmatmul.bf16.vlgmr.msra.gmra.mxu3 %v1785_v2  ;;  %v1461_v40 = vpop.f32.mrf.mxu2  ;;  %2730 = vmatpush.bf16.msra.mxu2 %v7355_v22  ;;  %v1802_v56 = vpack.c.bf16 %v1770_v49, %v1770_v49 }
 0x6e7   :  { %v1497_v42 = vpop.f32.mrf.mxu3  ;;  %2766 = vmatpush.bf16.msra.mxu3 %v7371_v33  ;;  %v1462_v36 = vadd.f32 %v1461_v40, %v8609_v60  ;;  %v7359_v60 = vld [vmem:[%s7942_s24 + $0x258] sm:$0xff] }
 0x6e8   :  { %v1481_v44 = vpop.f32.mrf.mxu0  ;;  %2750 = vmatpush.bf16.msrb.mxu0 %v7361_v43  ;;  %v1498_v52 = vadd.f32 %v1497_v42, %v8615_v61 }
 0x6e9   :  { %v1517_v46 = vpop.f32.mrf.mxu1  ;;  %2786 = vmatpush.bf16.msrb.mxu1 %v7377_v25  ;;  %v1767_v0 = vmax.f32 %v1462_v36, 0.0 }
 0x6ea   :  { %2731 = vmatpush.bf16.msra.mxu2 %v7354_v47  ;;  %v1769_v3 = vmax.f32 %v1498_v52, 0.0  ;;  %v7411_v46 = vld [vmem:[%s7942_s24 + $0x3f8] sm:$0xff]  ;;  %v7364_v52 = vld [vmem:[%s7942_s24 + $0x280] sm:$0xff] }
 0x6eb   :  { %2767 = vmatpush.bf16.msra.mxu3 %v7370_v48  ;;  %v1799_v8 = vpack.c.bf16 %v1767_v0, %v1767_v0 }
 0x6ec   :  { %2751 = vmatpush.bf16.msrb.mxu0 %v7360_v51  ;;  %v1801_v24 = vpack.c.bf16 %v1769_v3, %v1769_v3 }
 0x6ed   :  { %2787 = vmatpush.bf16.msrb.mxu1 %v7376_v20  ;;  %v7348_v20 = vld [vmem:[%s7942_s24 + $0x200] sm:$0xff] }
 0x6ee   :  { %v1463_v63 = vpop.f32.mrf.mxu2  ;;  %2732 = vmatpush.bf16.msra.mxu2 %v7353_v54 }
 0x6ef   :  { %v1499_v50 = vpop.f32.mrf.mxu3  ;;  %2617 = vmatmul.bf16.gmra.mxu0 %v1800_v53  ;;  %2768 = vmatpush.bf16.msra.mxu3 %v7369_v55  ;;  %v7410_v63 = vld [vmem:[%s7942_s24 + $0x3f0] sm:$0xff] }
 0x6f0   :  { %2653 = vmatmul.bf16.gmra.mxu1 %v1802_v56  ;;  %v1546_v61 = vpop.f32.mrf.mxu0  ;;  %2752 = vmatpush.bf16.msrb.mxu0 %v7359_v60  ;;  %v7394_v56 = vld [vmem:[%s7942_s24 + $0x370] sm:$0xff]  ;;  %v7387_v60 = vld [vmem:[%s7942_s24 + $0x338] sm:$0xff] }
 0x6f1   :  { %v1582_v4 = vpop.f32.mrf.mxu1  ;;  %2788 = vmatpush.bf16.msrb.mxu1 %v7375_v29  ;;  %v1547_v16 = vadd.f32 %v1546_v61, %v8651_v7  ;;  %v7403_v29 = vld [vmem:[%s7942_s24 + $0x3b8] sm:$0xff] }
 0x6f2   :  { %2733 = vmatpush.bf16.msra.mxu2 %v7352_v5  ;;  %v1583_v21 = vadd.f32 %v1582_v4, %v8656_v45  ;;  %v7393_v5 = vld [vmem:[%s7942_s24 + $0x368] sm:$0xff] }
 0x6f3   :  { %2769 = vmatpush.bf16.msra.mxu3 %v7368_v6  ;;  %v1740_v32 = vmax.f32 %v1547_v16, 0.0  ;;  %v7409_v6 = vld [vmem:[%s7942_s24 + $0x3e8] sm:$0xff] }
 0x6f4   :  { %2753 = vmatpush.bf16.msrb.mxu0 %v7358_v10  ;;  %v1742_v2 = vmax.f32 %v1583_v21, 0.0 }
 0x6f5   :  { %2599 = vmatmul.bf16.gmra.mxu2 %v1799_v8  ;;  %2789 = vmatpush.bf16.msrb.mxu1 %v7374_v12  ;;  %v7386_v12 = vld [vmem:[%s7942_s24 + $0x330] sm:$0xff] }
 0x6f6   :  { %2635 = vmatmul.bf16.gmra.mxu3 %v1801_v24  ;;  %v1528_v11 = vpop.f32.mrf.mxu2  ;;  %2734 = vmatpush.bf16.msra.mxu2 %v7351_v13  ;;  %v7402_v24 = vld [vmem:[%s7942_s24 + $0x3b0] sm:$0xff] }
 0x6f7   :  { %v1564_v28 = vpop.f32.mrf.mxu3  ;;  %2770 = vmatpush.bf16.msra.mxu3 %v7367_v15  ;;  %v1529_v22 = vadd.f32 %v1528_v11, %v8665_v62  ;;  %v7392_v15 = vld [vmem:[%s7942_s24 + $0x360] sm:$0xff] }
 0x6f8   :  { %v1548_v23 = vpop.f32.mrf.mxu0  ;;  %2754 = vmatpush.bf16.msrb.mxu0 %v7357_v57  ;;  %v1565_v40 = vadd.f32 %v1564_v28, %v8671_v18  ;;  %v7408_v11 = vld [vmem:[%s7942_s24 + $0x3e0] sm:$0xff]  ;;  %v7385_v57 = vld [vmem:[%s7942_s24 + $0x328] sm:$0xff] }
 0x6f9   :  { %v1549_v17 = vadd.f32 %v1548_v23, %v8651_v7  ;;  %v1584_v26 = vpop.f32.mrf.mxu1  ;;  %2790 = vmatpush.bf16.msrb.mxu1 %v7373_v19  ;;  %v1739_v49 = vmax.f32 %v1529_v22, 0.0  ;;  %v7401_v19 = vld [vmem:[%s7942_s24 + $0x3a8] sm:$0xff]  ;;  %v7406_v22 = vld [vmem:[%s7942_s24 + $0x3d0] sm:$0xff] }
 0x6fa   :  { %v1585_v31 = vadd.f32 %v1584_v26, %v8656_v45  ;;  %2735 = vmatpush.bf16.msra.mxu2 %v7350_v27  ;;  %v1741_v53 = vmax.f32 %v1565_v40, 0.0  ;;  %v7391_v26 = vld [vmem:[%s7942_s24 + $0x358] sm:$0xff] }
 0x6fb   :  { %v1756_v34 = vmax.f32 %v1549_v17, 0.0  ;;  %2771 = vmatpush.bf16.msra.mxu3 %v7366_v9  ;;  %v7407_v27 = vld [vmem:[%s7942_s24 + $0x3d8] sm:$0xff] }
 0x6fc   :  { %v1758_v38 = vmax.f32 %v1585_v31, 0.0  ;;  %2755 = vmatpush.bf16.msrb.mxu0 %v7356_v35  ;;  %v7400_v35 = vld [vmem:[%s7942_s24 + $0x3a0] sm:$0xff]  ;;  %v7399_v40 = vld [vmem:[%s7942_s24 + $0x398] sm:$0xff] }
 0x6fd   :  { %v1788_v33 = vpack.c.bf16 %v1756_v34, %v1740_v32  ;;  %2791 = vmatpush.bf16.msrb.mxu1 %v7372_v37  ;;  %v7384_v34 = vld [vmem:[%s7942_s24 + $0x320] sm:$0xff] }
 0x6fe   :  { %v1790_v42 = vpack.c.bf16 %v1758_v38, %v1742_v2  ;;  %v1530_v43 = vpop.f32.mrf.mxu2  ;;  %2736 = vmatpush.bf16.msra.mxu2 %v7349_v39  ;;  %v7390_v38 = vld [vmem:[%s7942_s24 + $0x350] sm:$0xff] }
 0x6ff   :  { %v1531_v25 = vadd.f32 %v1530_v43, %v8665_v62  ;;  %v1566_v44 = vpop.f32.mrf.mxu3  ;;  %2684 = vmatmul.bf16.vlgmr.msra.gmra.mxu0 %v1788_v33  ;;  %2772 = vmatpush.bf16.msra.mxu3 %v7365_v41  ;;  %v7383_v41 = vld [vmem:[%s7942_s24 + $0x318] sm:$0xff] }
 0x700   :  { %v1567_v47 = vadd.f32 %v1566_v44, %v8671_v18  ;;  %2720 = vmatmul.bf16.vlgmr.msra.gmra.mxu1 %v1790_v42  ;;  %v1551_v48 = vpop.f32.mrf.mxu0  ;;  %2820 = vmatpush.bf16.msra.mxu0 %v7395_v30  ;;  %v7389_v44 = vld [vmem:[%s7942_s24 + $0x348] sm:$0xff] }
 0x701   :  { %v1755_v36 = vmax.f32 %v1531_v25, 0.0  ;;  %v1587_v51 = vpop.f32.mrf.mxu1  ;;  %2856 = vmatpush.bf16.msra.mxu1 %v7411_v46  ;;  %v1552_v50 = vadd.f32 %v1551_v48, %v8651_v7  ;;  %v7405_v30 = vld [vmem:[%s7942_s24 + $0x3c8] sm:$0xff] }
 0x702   :  { %v1757_v54 = vmax.f32 %v1567_v47, 0.0  ;;  %2737 = vmatpush.bf16.msra.mxu2 %v7348_v20  ;;  %v1588_v3 = vadd.f32 %v1587_v51, %v8656_v45  ;;  %v7382_v51 = vld [vmem:[%s7942_s24 + $0x310] sm:$0xff] }
 0x703   :  { %v1787_v55 = vpack.c.bf16 %v1755_v36, %v1739_v49  ;;  %2773 = vmatpush.bf16.msra.mxu3 %v7364_v52  ;;  %v1772_v7 = vmax.f32 %v1552_v50, 0.0  ;;  %v7398_v20 = vld [vmem:[%s7942_s24 + $0x390] sm:$0xff] }
 0x704   :  { %v1789_v0 = vpack.c.bf16 %v1757_v54, %v1741_v53  ;;  %2821 = vmatpush.bf16.msra.mxu0 %v7394_v56  ;;  %v1774_v13 = vmax.f32 %v1588_v3, 0.0  ;;  %v7388_v56 = vld [vmem:[%s7942_s24 + $0x340] sm:$0xff]  ;;  %v7381_v3 = vld [vmem:[%s7942_s24 + $0x308] sm:$0xff] }
 0x705   :  { %2666 = vmatmul.bf16.vlgmr.msrb.gmra.mxu2 %v1787_v55  ;;  %2857 = vmatpush.bf16.msra.mxu1 %v7410_v63  ;;  %v1804_v28 = vpack.c.bf16 %v1772_v7, %v1772_v7  ;;  %v7404_v63 = vld [vmem:[%s7942_s24 + $0x3c0] sm:$0xff] }
 0x706   :  { %2702 = vmatmul.bf16.vlgmr.msrb.gmra.mxu3 %v1789_v0  ;;  %v1533_v61 = vpop.f32.mrf.mxu2  ;;  %2802 = vmatpush.bf16.msrb.mxu2 %v7387_v60  ;;  %v1806_v21 = vpack.c.bf16 %v1774_v13, %v1774_v13 }
 0x707   :  { %v1569_v4 = vpop.f32.mrf.mxu3  ;;  %2838 = vmatpush.bf16.msrb.mxu3 %v7403_v29  ;;  %v1534_v45 = vadd.f32 %v1533_v61, %v8665_v62  ;;  %v7397_v61 = vld [vmem:[%s7942_s24 + $0x388] sm:$0xff] }
 0x708   :  { %v1553_v8 = vpop.f32.mrf.mxu0  ;;  %2822 = vmatpush.bf16.msra.mxu0 %v7393_v5  ;;  %v1570_v16 = vadd.f32 %v1569_v4, %v8671_v18  ;;  %v8705_v18 = vld [vmem:[%s7937_s19 + $0x8] sm:$0xff]  ;;  %s9431_s19 = sld [smem:[#allocation9_spill]] }
 0x709   :  { %v1589_v10 = vpop.f32.mrf.mxu1  ;;  %2858 = vmatpush.bf16.msra.mxu1 %v7409_v6  ;;  %v1771_v17 = vmax.f32 %v1534_v45, 0.0  ;;  %v8710_v2 = vperm.slane %v8705_v18, 1  ;;  %v8715_v39 = vperm.slane %v8705_v18, 3  ;;  %v1257_v48 = vperm.slane %v8705_v18, 0 }
 0x70a   :  { %2803 = vmatpush.bf16.msrb.mxu2 %v7386_v12  ;;  %v1773_v9 = vmax.f32 %v1570_v16, 0.0  ;;  %v1259_v52 = vperm.slane %v8705_v18, 2 }
 0x70b   :  { %2839 = vmatpush.bf16.msrb.mxu3 %v7402_v24  ;;  %v1803_v37 = vpack.c.bf16 %v1771_v17, %v1771_v17 }
 0x70c   :  { %2823 = vmatpush.bf16.msra.mxu0 %v7392_v15  ;;  %v1805_v33 = vpack.c.bf16 %v1773_v9, %v1773_v9  ;;  %v7380_v15 = vld [vmem:[%s7942_s24 + $0x300] sm:$0xff] }
 0x70d   :  { %2859 = vmatpush.bf16.msra.mxu1 %v7408_v11  ;;  %v7396_v11 = vld [vmem:[%s7942_s24 + $0x380] sm:$0xff]  ;;  %s9433_s24 = sld [smem:[#allocation11_spill]] }
 0x70e   :  { %v1535_v23 = vpop.f32.mrf.mxu2  ;;  %2804 = vmatpush.bf16.msrb.mxu2 %v7385_v57 }
 0x70f   :  { %v1571_v62 = vpop.f32.mrf.mxu3  ;;  %2689 = vmatmul.bf16.gmra.mxu0 %v1804_v28  ;;  %2840 = vmatpush.bf16.msrb.mxu3 %v7401_v19 }
 0x710   :  { %2725 = vmatmul.bf16.gmra.mxu1 %v1806_v21  ;;  %v1618_v31 = vpop.f32.mrf.mxu0  ;;  %2824 = vmatpush.bf16.msra.mxu0 %v7391_v26 }
 0x711   :  { %v1654_v32 = vpop.f32.mrf.mxu1  ;;  %2860 = vmatpush.bf16.msra.mxu1 %v7407_v27  ;;  %v1619_v43 = vadd.f32 %v1618_v31, %v8710_v2 }
 0x712   :  { %2805 = vmatpush.bf16.msrb.mxu2 %v7384_v34  ;;  %v1655_v46 = vadd.f32 %v1654_v32, %v8715_v39 }
 0x713   :  { %2841 = vmatpush.bf16.msrb.mxu3 %v7400_v35  ;;  %v1744_v54 = vmax.f32 %v1619_v43, 0.0 }
 0x714   :  { %2825 = vmatpush.bf16.msra.mxu0 %v7390_v38  ;;  %v1746_v0 = vmax.f32 %v1655_v46, 0.0 }
 0x715   :  { %2671 = vmatmul.bf16.gmra.mxu2 %v1803_v37  ;;  %2861 = vmatpush.bf16.msra.mxu1 %v7406_v22 }
 0x716   :  { %2707 = vmatmul.bf16.gmra.mxu3 %v1805_v33  ;;  %v1600_v42 = vpop.f32.mrf.mxu2  ;;  %2806 = vmatpush.bf16.msrb.mxu2 %v7383_v41 }
 0x717   :  { %v1636_v25 = vpop.f32.mrf.mxu3  ;;  %2842 = vmatpush.bf16.msrb.mxu3 %v7399_v40  ;;  %v1601_v60 = vadd.f32 %v1600_v42, %v1257_v48  ;;  %v1262_v42 = vperm.slane %v8705_v18, 5 }
 0x718   :  { %v1620_v47 = vpop.f32.mrf.mxu0  ;;  %2826 = vmatpush.bf16.msra.mxu0 %v7389_v44  ;;  %v1637_v4 = vadd.f32 %v1636_v25, %v1259_v52  ;;  %v1264_v25 = vperm.slane %v8705_v18, 7 }
 0x719   :  { %v1621_v49 = vadd.f32 %v1620_v47, %v8710_v2  ;;  %v1656_v36 = vpop.f32.mrf.mxu1  ;;  %2862 = vmatpush.bf16.msra.mxu1 %v7405_v30  ;;  %v1743_v24 = vmax.f32 %v1601_v60, 0.0 }
 0x71a   :  { %v1657_v53 = vadd.f32 %v1656_v36, %v8715_v39  ;;  %2807 = vmatpush.bf16.msrb.mxu2 %v7382_v51  ;;  %v1745_v16 = vmax.f32 %v1637_v4, 0.0 }
 0x71b   :  { %v1760_v55 = vmax.f32 %v1621_v49, 0.0  ;;  %2843 = vmatpush.bf16.msrb.mxu3 %v7398_v20  ;;  %v1261_v49 = vperm.slane %v8705_v18, 4  ;;  %v1263_v20 = vperm.slane %v8705_v18, 6 }
 0x71c   :  { %v1762_v50 = vmax.f32 %v1657_v53, 0.0  ;;  %2827 = vmatpush.bf16.msra.mxu0 %v7388_v56 }
 0x71d   :  { %v1792_v29 = vpack.c.bf16 %v1760_v55, %v1744_v54  ;;  %2863 = vmatpush.bf16.msra.mxu1 %v7404_v63 }
 0x71e   :  { %v1794_v5 = vpack.c.bf16 %v1762_v50, %v1746_v0  ;;  %v1602_v6 = vpop.f32.mrf.mxu2  ;;  %2808 = vmatpush.bf16.msrb.mxu2 %v7381_v3 }
 0x71f   :  { %v1603_v8 = vadd.f32 %v1602_v6, %v1257_v48  ;;  %v1638_v7 = vpop.f32.mrf.mxu3  ;;  %2756 = vmatmul.bf16.vlgmr.msrb.gmra.mxu0 %v1792_v29  ;;  %2844 = vmatpush.bf16.msrb.mxu3 %v7397_v61 }
 0x720   :  { %v1639_v10 = vadd.f32 %v1638_v7, %v1259_v52  ;;  %2792 = vmatmul.bf16.vlgmr.msrb.gmra.mxu1 %v1794_v5  ;;  %v1623_v12 = vpop.f32.mrf.mxu0 }
 0x721   :  { %v1759_v13 = vmax.f32 %v1603_v8, 0.0  ;;  %v1659_v45 = vpop.f32.mrf.mxu1  ;;  %v1624_v21 = vadd.f32 %v1623_v12, %v8710_v2 }
 0x722   :  { %v1761_v28 = vmax.f32 %v1639_v10, 0.0  ;;  %2809 = vmatpush.bf16.msrb.mxu2 %v7380_v15  ;;  %v1660_v23 = vadd.f32 %v1659_v45, %v8715_v39 }
 0x723   :  { %v1791_v57 = vpack.c.bf16 %v1759_v13, %v1743_v24  ;;  %2845 = vmatpush.bf16.msrb.mxu3 %v7396_v11  ;;  %v1776_v27 = vmax.f32 %v1624_v21, 0.0 }
 0x724   :  { %v1793_v19 = vpack.c.bf16 %v1761_v28, %v1745_v16  ;;  %v1778_v31 = vmax.f32 %v1660_v23, 0.0 }
 0x725   :  { %2738 = vmatmul.bf16.vlgmr.msra.gmra.mxu2 %v1791_v57  ;;  %v1808_v35 = vpack.c.bf16 %v1776_v27, %v1776_v27 }
 0x726   :  { %2774 = vmatmul.bf16.vlgmr.msra.gmra.mxu3 %v1793_v19  ;;  %v1605_v17 = vpop.f32.mrf.mxu2  ;;  %v1810_v37 = vpack.c.bf16 %v1778_v31, %v1778_v31 }
 0x727   :  { %v1641_v62 = vpop.f32.mrf.mxu3  ;;  %v1606_v32 = vadd.f32 %v1605_v17, %v1257_v48 }
 0x728   :  { %v1625_v26 = vpop.f32.mrf.mxu0  ;;  %v1642_v34 = vadd.f32 %v1641_v62, %v1259_v52 }
 0x729   :  { %v1661_v9 = vpop.f32.mrf.mxu1  ;;  %v1775_v22 = vmax.f32 %v1606_v32, 0.0 }
 0x72a   :  { %v1777_v41 = vmax.f32 %v1642_v34, 0.0 }
 0x72b   :  { %v1807_v39 = vpack.c.bf16 %v1775_v22, %v1775_v22 }
 0x72c   :  { %v1809_v43 = vpack.c.bf16 %v1777_v41, %v1777_v41 }
 0x72e   :  { %v1607_v38 = vpop.f32.mrf.mxu2 }
 0x72f   :  { %v1643_v33 = vpop.f32.mrf.mxu3  ;;  %2761 = vmatmul.bf16.gmra.mxu0 %v1808_v35 }
 0x730   :  { %2797 = vmatmul.bf16.gmra.mxu1 %v1810_v37  ;;  %v1690_v2 = vpop.f32.mrf.mxu0  ;;  %v7668_v33 = vld [vmem:[%s7947_s30] ss:$0 sm:$0xff]  ;;  %s9434_s30 = sld [smem:[#allocation12_spill]] }
 0x731   :  { %v1726_v40 = vpop.f32.mrf.mxu1  ;;  %v1691_v30 = vadd.f32 %v1690_v2, %v1262_v42 }
 0x732   :  { %v1727_v47 = vadd.f32 %v1726_v40, %v1264_v25 }
 0x733   :  { %v1748_v53 = vmax.f32 %v1691_v30, 0.0 }
 0x734   :  { %v1750_v55 = vmax.f32 %v1727_v47, 0.0 }
 0x735   :  { %2743 = vmatmul.bf16.gmra.mxu2 %v1807_v39 }
 0x736   :  { %2779 = vmatmul.bf16.gmra.mxu3 %v1809_v43  ;;  %v1672_v44 = vpop.f32.mrf.mxu2 }
 0x737   :  { %v1708_v46 = vpop.f32.mrf.mxu3  ;;  %v1673_v63 = vadd.f32 %v1672_v44, %v1261_v49 }
 0x738   :  { %v1692_v48 = vpop.f32.mrf.mxu0  ;;  %v1709_v50 = vadd.f32 %v1708_v46, %v1263_v20 }
 0x739   :  { %v1693_v36 = vadd.f32 %v1692_v48, %v1262_v42  ;;  %v1728_v51 = vpop.f32.mrf.mxu1  ;;  %v1747_v6 = vmax.f32 %v1673_v63, 0.0 }
 0x73a   :  { %v1729_v52 = vadd.f32 %v1728_v51, %v1264_v25  ;;  %v1749_v18 = vmax.f32 %v1709_v50, 0.0 }
 0x73b   :  { %v1764_v54 = vmax.f32 %v1693_v36, 0.0 }
 0x73c   :  { %v1766_v56 = vmax.f32 %v1729_v52, 0.0 }
 0x73d   :  { %v1796_v0 = vpack.c.bf16 %v1764_v54, %v1748_v53 }
 0x73e   :  { %v1798_v60 = vpack.c.bf16 %v1766_v56, %v1750_v55  ;;  %v1674_v29 = vpop.f32.mrf.mxu2 }
 0x73f   :  { %v1675_v3 = vadd.f32 %v1674_v29, %v1261_v49  ;;  %v1710_v61 = vpop.f32.mrf.mxu3  ;;  %2828 = vmatmul.bf16.vlgmr.msra.gmra.mxu0 %v1796_v0 }
 0x740   :  { %v1711_v4 = vadd.f32 %v1710_v61, %v1263_v20  ;;  %2864 = vmatmul.bf16.vlgmr.msra.gmra.mxu1 %v1798_v60  ;;  %v1695_v5 = vpop.f32.mrf.mxu0 }
 0x741   :  { %v1763_v8 = vmax.f32 %v1675_v3, 0.0  ;;  %v1731_v7 = vpop.f32.mrf.mxu1  ;;  %v1696_v13 = vadd.f32 %v1695_v5, %v1262_v42 }
 0x742   :  { %v1765_v10 = vmax.f32 %v1711_v4, 0.0  ;;  %v1732_v45 = vadd.f32 %v1731_v7, %v1264_v25 }
 0x743   :  { %v1795_v12 = vpack.c.bf16 %v1763_v8, %v1747_v6  ;;  %v1780_v28 = vmax.f32 %v1696_v13, 0.0 }
 0x744   :  { %v1797_v24 = vpack.c.bf16 %v1765_v10, %v1749_v18  ;;  %v1782_v19 = vmax.f32 %v1732_v45, 0.0 }
 0x745   :  { %2810 = vmatmul.bf16.vlgmr.msrb.gmra.mxu2 %v1795_v12  ;;  %v1812_v17 = vpack.c.bf16 %v1780_v28, %v1780_v28 }
 0x746   :  { %2846 = vmatmul.bf16.vlgmr.msrb.gmra.mxu3 %v1797_v24  ;;  %v1677_v15 = vpop.f32.mrf.mxu2  ;;  %v1814_v62 = vpack.c.bf16 %v1782_v19, %v1782_v19 }
 0x747   :  { %v1713_v11 = vpop.f32.mrf.mxu3  ;;  %v1678_v21 = vadd.f32 %v1677_v15, %v1261_v49 }
 0x748   :  { %v1697_v16 = vpop.f32.mrf.mxu0  ;;  %v1714_v23 = vadd.f32 %v1713_v11, %v1263_v20 }
 0x749   :  { %v1733_v57 = vpop.f32.mrf.mxu1  ;;  %v1779_v27 = vmax.f32 %v1678_v21, 0.0 }
 0x74a   :  { %v1781_v31 = vmax.f32 %v1714_v23, 0.0 }
 0x74b   :  { %v1811_v32 = vpack.c.bf16 %v1779_v27, %v1779_v27 }
 0x74c   :  { %v1813_v34 = vpack.c.bf16 %v1781_v31, %v1781_v31 }
 0x74e   :  { %v1679_v26 = vpop.f32.mrf.mxu2 }
 0x74f   :  { %v1715_v9 = vpop.f32.mrf.mxu3  ;;  %2833 = vmatmul.bf16.gmra.mxu0 %v1812_v17 }
 0x750   :  { %2869 = vmatmul.bf16.gmra.mxu1 %v1814_v62 }
 0x755   :  { %2815 = vmatmul.bf16.gmra.mxu2 %v1811_v32 }
 0x756   :  { %2851 = vmatmul.bf16.gmra.mxu3 %v1813_v34 }
 0x75c   :  { %v2613_v35 = vpop.f32.mrf.mxu0 }
 0x75d   :  { %v2649_v37 = vpop.f32.mrf.mxu1 }
 0x764   :  { %v2615_v38 = vpop.f32.mrf.mxu0 }
 0x765   :  { %v2651_v22 = vpop.f32.mrf.mxu1 }
 0x768   :  { %v2595_v41 = vpop.f32.mrf.mxu2 }
 0x769   :  { %v2596_v2 = vadd.f32 %v7668_v33, %v2595_v41  ;;  %v2631_v40 = vpop.f32.mrf.mxu3 }
 0x76b   :  { %v2614_v39 = vadd.f32 %v2613_v35, %v2596_v2 }
 0x76c   :  { %v2618_v42 = vpop.f32.mrf.mxu0 }
 0x76d   :  { %v2632_v43 = vadd.f32 %v2631_v40, %v2614_v39  ;;  %v2654_v25 = vpop.f32.mrf.mxu1 }
 0x76f   :  { %v2650_v44 = vadd.f32 %v2649_v37, %v2632_v43 }
 0x770   :  { %v2597_v30 = vpop.f32.mrf.mxu2 }
 0x771   :  { %v2598_v46 = vadd.f32 %v7668_v33, %v2597_v30  ;;  %v2633_v47 = vpop.f32.mrf.mxu3 }
 0x773   :  { %v2616_v48 = vadd.f32 %v2615_v38, %v2598_v46 }
 0x774   :  { %v2620_v49 = vpop.f32.mrf.mxu0 }
 0x775   :  { %v2656_v36 = vpop.f32.mrf.mxu1  ;;  %v2634_v34 = vadd.f32 %v2633_v47, %v2616_v48 }
 0x777   :  { %v2652_v38 = vadd.f32 %v2651_v22, %v2634_v34 }
 0x778   :  { %v2600_v51 = vpop.f32.mrf.mxu2 }
 0x779   :  { %v2601_v20 = vadd.f32 %v7668_v33, %v2600_v51  ;;  %v2636_v52 = vpop.f32.mrf.mxu3 }
 0x77b   :  { %v2619_v53 = vadd.f32 %v2618_v42, %v2601_v20 }
 0x77c   :  { %v2685_v54 = vpop.f32.mrf.mxu0 }
 0x77d   :  { %v2637_v55 = vadd.f32 %v2636_v52, %v2619_v53  ;;  %v2721_v56 = vpop.f32.mrf.mxu1 }
 0x77f   :  { %v2655_v63 = vadd.f32 %v2654_v25, %v2637_v55 }
 0x780   :  { %v2602_v0 = vpop.f32.mrf.mxu2 }
 0x781   :  { %v2638_v50 = vpop.f32.mrf.mxu3 }
 0x784   :  { %v2687_v60 = vpop.f32.mrf.mxu0 }
 0x785   :  { %v2723_v29 = vpop.f32.mrf.mxu1 }
 0x788   :  { %v2667_v3 = vpop.f32.mrf.mxu2 }
 0x789   :  { %v2668_v61 = vadd.f32 %v2667_v3, %v2650_v44  ;;  %v2703_v4 = vpop.f32.mrf.mxu3 }
 0x78b   :  { %v2686_v5 = vadd.f32 %v2685_v54, %v2668_v61 }
 0x78c   :  { %v2690_v6 = vpop.f32.mrf.mxu0 }
 0x78d   :  { %v2704_v8 = vadd.f32 %v2703_v4, %v2686_v5  ;;  %v2726_v7 = vpop.f32.mrf.mxu1 }
 0x78f   :  { %v2722_v18 = vadd.f32 %v2721_v56, %v2704_v8 }
 0x790   :  { %v2669_v10 = vpop.f32.mrf.mxu2 }
 0x791   :  { %v2705_v12 = vpop.f32.mrf.mxu3  ;;  %v2670_v41 = vadd.f32 %v2669_v10, %v2652_v38 }
 0x793   :  { %v2688_v39 = vadd.f32 %v2687_v60, %v2670_v41 }
 0x794   :  { %v2692_v24 = vpop.f32.mrf.mxu0 }
 0x795   :  { %v2728_v13 = vpop.f32.mrf.mxu1  ;;  %v2706_v44 = vadd.f32 %v2705_v12, %v2688_v39 }
 0x797   :  { %v2724_v36 = vadd.f32 %v2723_v29, %v2706_v44  ;;  %v2958_v44 = vld [vmem:[%s9428_s3 + $0x18] sm:$0xff] }
 0x798   :  { %v2672_v45 = vpop.f32.mrf.mxu2  ;;  %3284 = vmatpush.msra.mxu2 %v2958_v44 }
 0x799   :  { %v2673_v15 = vadd.f32 %v2672_v45, %v2655_v63  ;;  %v2708_v11 = vpop.f32.mrf.mxu3 }
 0x79b   :  { %v2691_v16 = vadd.f32 %v2690_v6, %v2673_v15 }
 0x79c   :  { %v2757_v28 = vpop.f32.mrf.mxu0 }
 0x79d   :  { %v2709_v57 = vadd.f32 %v2708_v11, %v2691_v16  ;;  %v2793_v19 = vpop.f32.mrf.mxu1 }
 0x79f   :  { %v2727_v21 = vadd.f32 %v2726_v7, %v2709_v57 }
 0x7a0   :  { %v2674_v23 = vpop.f32.mrf.mxu2 }
 0x7a1   :  { %v2710_v17 = vpop.f32.mrf.mxu3 }
 0x7a4   :  { %v2759_v62 = vpop.f32.mrf.mxu0 }
 0x7a5   :  { %v2795_v26 = vpop.f32.mrf.mxu1 }
 0x7a8   :  { %v2739_v27 = vpop.f32.mrf.mxu2 }
 0x7a9   :  { %v2775_v9 = vpop.f32.mrf.mxu3  ;;  %v2740_v43 = vadd.f32 %v2739_v27, %v2722_v18 }
 0x7ab   :  { %v2758_v46 = vadd.f32 %v2757_v28, %v2740_v43 }
 0x7ac   :  { %v2762_v31 = vpop.f32.mrf.mxu0 }
 0x7ad   :  { %v2798_v32 = vpop.f32.mrf.mxu1  ;;  %v2776_v20 = vadd.f32 %v2775_v9, %v2758_v46  ;;  %v2956_v46 = vld [vmem:[%s9428_s3 + $0x8] sm:$0xff] }
 0x7af   :  { %v2794_v53 = vadd.f32 %v2793_v19, %v2776_v20 }
 0x7b0   :  { %v2741_v35 = vpop.f32.mrf.mxu2 }
 0x7b1   :  { %v2777_v37 = vpop.f32.mrf.mxu3  ;;  %v2742_v52 = vadd.f32 %v2741_v35, %v2724_v36 }
 0x7b3   :  { %v2760_v22 = vadd.f32 %v2759_v62, %v2742_v52 }
 0x7b4   :  { %v2764_v33 = vpop.f32.mrf.mxu0 }
 0x7b5   :  { %v2800_v2 = vpop.f32.mrf.mxu1  ;;  %v2778_v63 = vadd.f32 %v2777_v37, %v2760_v22 }
 0x7b7   :  { %v2796_v6 = vadd.f32 %v2795_v26, %v2778_v63 }
 0x7b8   :  { %v2744_v40 = vpop.f32.mrf.mxu2 }
 0x7b9   :  { %v2780_v42 = vpop.f32.mrf.mxu3  ;;  %v2745_v0 = vadd.f32 %v2744_v40, %v2727_v21 }
 0x7bb   :  { %v2763_v4 = vadd.f32 %v2762_v31, %v2745_v0 }
 0x7bc   :  { %v2829_v25 = vpop.f32.mrf.mxu0 }
 0x7bd   :  { %v2865_v30 = vpop.f32.mrf.mxu1  ;;  %v2781_v10 = vadd.f32 %v2780_v42, %v2763_v4  ;;  %v7669_v4 = vld [vmem:[%s9429_s8] ss:$0 sm:$0xff] }
 0x7bf   :  { %v2799_v11 = vadd.f32 %v2798_v32, %v2781_v10 }
 0x7c0   :  { %v2746_v49 = vpop.f32.mrf.mxu2 }
 0x7c1   :  { %v2782_v51 = vpop.f32.mrf.mxu3  ;;  %v2955_v49 = vld [vmem:[%s9428_s3] sm:$0xff] }
 0x7c4   :  { %v2831_v47 = vpop.f32.mrf.mxu0 }
 0x7c5   :  { %v2867_v48 = vpop.f32.mrf.mxu1 }
 0x7c8   :  { %v2811_v54 = vpop.f32.mrf.mxu2 }
 0x7c9   :  { %v2812_v55 = vadd.f32 %v2811_v54, %v2794_v53  ;;  %v2847_v56 = vpop.f32.mrf.mxu3 }
 0x7cb   :  { %v2830_v50 = vadd.f32 %v2829_v25, %v2812_v55 }
 0x7cc   :  { %v2834_v60 = vpop.f32.mrf.mxu0 }
 0x7cd   :  { %v2848_v3 = vadd.f32 %v2847_v56, %v2830_v50  ;;  %v2870_v61 = vpop.f32.mrf.mxu1 }
 0x7cf   :  { %v2866_v5 = vadd.f32 %v2865_v30, %v2848_v3  ;;  %v2957_v30 = vld [vmem:[%s9428_s3 + $0x10] sm:$0xff] }
 0x7d0   :  { %v2813_v29 = vpop.f32.mrf.mxu2  ;;  %3285 = vmatpush.msra.mxu2 %v2957_v30 }
 0x7d1   :  { %v2814_v8 = vadd.f32 %v2813_v29, %v2796_v6  ;;  %v2849_v7 = vpop.f32.mrf.mxu3  ;;  %v2874_v18 = vadd.f32 %v2866_v5, %v8429_v58  ;;  %v7670_v29 = vld [vmem:[%s9430_s14] ss:$0 sm:$0xff] }
 0x7d2   :  { %3286 = vmatpush.msra.mxu2 %v2956_v46 }
 0x7d3   :  { %v2832_v12 = vadd.f32 %v2831_v47, %v2814_v8  ;;  %v2877_v24 = vsel %vm499_vm1, %v2874_v18, 0.0 }
 0x7d4   :  { %v2836_v13 = vpop.f32.mrf.mxu0  ;;  %2878 = vadd.xlane.f32.xlu2 %v2877_v24  ;;  %3287 = vmatpush.msra.mxu2 %v2955_v49 }
 0x7d5   :  { %v2850_v45 = vadd.f32 %v2849_v7, %v2832_v12  ;;  %v2872_v15 = vpop.f32.mrf.mxu1 }
 0x7d7   :  { %v2868_v16 = vadd.f32 %v2867_v48, %v2850_v45 }
 0x7d8   :  { %v2816_v28 = vpop.f32.mrf.mxu2 }
 0x7d9   :  { %v2817_v57 = vadd.f32 %v2816_v28, %v2799_v11  ;;  %v2852_v19 = vpop.f32.mrf.mxu3  ;;  %v2875_v21 = vadd.f32 %v2868_v16, %v8431_v59 }
 0x7db   :  { %v2835_v23 = vadd.f32 %v2834_v60, %v2817_v57  ;;  %v2880_v17 = vsel %vm499_vm1, %v2875_v21, 0.0 }
 0x7dc   :  { %2881 = vadd.xlane.f32.xlu1 %v2880_v17 }
 0x7dd   :  { %v2853_v58 = vadd.f32 %v2852_v19, %v2835_v23 }
 0x7df   :  { %v2871_v62 = vadd.f32 %v2870_v61, %v2853_v58 }
 0x7e0   :  { %v2818_v26 = vpop.f32.mrf.mxu2 }
 0x7e1   :  { %v2854_v27 = vpop.f32.mrf.mxu3  ;;  %v2876_v9 = vadd.f32 %v2871_v62, %v8447_v1 }
 0x7e3   :  { %v2883_v31 = vsel %vm1165_vm7, %v2876_v9, 0.0 }
 0x7e4   :  { %2884 = vadd.xlane.f32.xlu0 %v2883_v31 }
 0x847   :  { %v2879_v32 = vpop.xlane.xlu2 %2878 }
 0x848   :  { %v2886_v34 = vmul.f32 %v2879_v32, %v8359_v14 }
 0x84a   :  { %v2889_v35 = vsub.f32 %v2874_v18, %v2886_v34 }
 0x84c   :  { %v2892_v37 = vmul.f32 %v2889_v35, %v2889_v35 }
 0x84e   :  { %v2895_v59 = vsel %vm499_vm1, %v2892_v37, 0.0 }
 0x84f   :  { %v2882_v38 = vpop.xlane.xlu1 %2881  ;;  %2896 = vadd.xlane.f32.xlu2 %v2895_v59 }
 0x850   :  { %v2887_v33 = vmul.f32 %v2882_v38, %v8359_v14 }
 0x852   :  { %v2890_v41 = vsub.f32 %v2875_v21, %v2887_v33 }
 0x854   :  { %v2893_v1 = vmul.f32 %v2890_v41, %v2890_v41 }
 0x856   :  { %v2898_v2 = vsel %vm499_vm1, %v2893_v1, 0.0 }
 0x857   :  { %v2885_v40 = vpop.xlane.xlu0 %2884  ;;  %2899 = vadd.xlane.f32.xlu1 %v2898_v2 }
 0x858   :  { %v2888_v39 = vmul.f32 %v2885_v40, %v8359_v14 }
 0x85a   :  { %v8753_v42 = vsub.f32 %v2876_v9, %v2888_v39  ;;  %v7671_v9 = vld [vmem:[%s9431_s19] ss:$0 sm:$0xff] }
 0x85c   :  { %v2894_v43 = vmul.f32 %v8753_v42, %v8753_v42 }
 0x85e   :  { %v2901_v25 = vsel %vm1165_vm7, %v2894_v43, 0.0 }
 0x85f   :  { %2902 = vadd.xlane.f32.xlu0 %v2901_v25 }
 0x8c2   :  { %v2897_v36 = vpop.xlane.xlu2 %2896 }
 0x8c3   :  { %v2904_v51 = vmul.f32 %v2897_v36, %v8359_v14 }
 0x8c5   :  { %v2907_v20 = vadd.f32 1e-05, %v2904_v51 }
 0x8c7   :  { %7736 = vrsqrt.f32 %v2907_v20  ;;  %vm2916_vm11 = vweird.f32 %v2907_v20 }
 0x8ca   :  { %v2900_v52 = vpop.xlane.xlu1 %2899 }
 0x8cb   :  { %v2905_v47 = vmul.f32 %v2900_v52, %v8359_v14 }
 0x8cd   :  { %v7737_v48 = vpop.eup %7736  ;;  %v2908_v53 = vadd.f32 1e-05, %v2905_v47 }
 0x8ce   :  { %v2911_v22 = vmul.f32 %v7737_v48, %v2907_v20  ;;  %vm2917_vm10 = vweird.f32 %v7737_v48 }
 0x8cf   :  { %7738 = vrsqrt.f32 %v2908_v53  ;;  %vm2918_vm12 = vmor %vm2916_vm11, %vm2917_vm10  ;;  %vm2926_vm14 = vweird.f32 %v2908_v53 }
 0x8d0   :  { %v2912_v54 = vmul.f32 %v7737_v48, %v2911_v22 }
 0x8d2   :  { %v2913_v55 = vmul.f32 0.5, %v2912_v54  ;;  %v2903_v56 = vpop.xlane.xlu0 %2902 }
 0x8d3   :  { %v2906_v63 = vmul.f32 %v2903_v56, %v8359_v14 }
 0x8d4   :  { %v2914_v0 = vsub.f32 1.5, %v2913_v55 }
 0x8d5   :  { %v7739_v50 = vpop.eup %7738  ;;  %v2909_v60 = vadd.f32 1e-05, %v2906_v63 }
 0x8d6   :  { %v2915_v3 = vmul.f32 %v7737_v48, %v2914_v0  ;;  %v2921_v61 = vmul.f32 %v7739_v50, %v2908_v53  ;;  %vm2927_vm13 = vweird.f32 %v7739_v50 }
 0x8d7   :  { %7740 = vrsqrt.f32 %v2909_v60  ;;  %vm2928_vm15 = vmor %vm2926_vm14, %vm2927_vm13  ;;  %vm2936_vm9 = vweird.f32 %v2909_v60  ;;  %vm5680_vm14 = vcmask 1043456  }
 0x8d8   :  { %v2919_v5 = vsel %vm2918_vm12, %v7737_v48, %v2915_v3  ;;  %v2922_v6 = vmul.f32 %v7739_v50, %v2921_v61 }
 0x8d9   :  { %v2940_v8 = vmul.f32 %v2919_v5, %v2889_v35 }
 0x8da   :  { %v2923_v7 = vmul.f32 0.5, %v2922_v6 }
 0x8db   :  { %v2946_v18 = vmul.f32 %v7669_v4, %v2940_v8 }
 0x8dc   :  { %v2924_v10 = vsub.f32 1.5, %v2923_v7 }
 0x8dd   :  { %v7741_v12 = vpop.eup %7740  ;;  %v8767_v24 = vadd.f32 %v7670_v29, %v2946_v18 }
 0x8de   :  { %v2925_v13 = vmul.f32 %v7739_v50, %v2924_v10  ;;  %v2931_v45 = vmul.f32 %v7741_v12, %v2909_v60  ;;  %vm2937_vm8 = vweird.f32 %v7741_v12 }
 0x8df   :  { %6530 = vmatmul.msk.f32.vlgmr.msra.gmra.mxu2 %vm499_vm1, %v8767_v24  ;;  %vm2938_vm10 = vmor %vm2936_vm9, %vm2937_vm8 }
 0x8e0   :  { %v2929_v15 = vsel %vm2928_vm15, %v7739_v50, %v2925_v13  ;;  %v2932_v11 = vmul.f32 %v7741_v12, %v2931_v45  ;;  %vm5676_vm15 = vcmask 31744  }
 0x8e1   :  { %v2941_v16 = vmul.f32 %v2929_v15, %v2890_v41 }
 0x8e2   :  { %v2933_v28 = vmul.f32 0.5, %v2932_v11 }
 0x8e3   :  { %v2947_v57 = vmul.f32 %v7669_v4, %v2941_v16 }
 0x8e4   :  { %v2934_v19 = vsub.f32 1.5, %v2933_v28 }
 0x8e5   :  { %v8771_v21 = vadd.f32 %v7670_v29, %v2947_v57 }
 0x8e6   :  { %v2935_v23 = vmul.f32 %v7741_v12, %v2934_v19 }
 0x8e7   :  { %6531 = vmatmul.msk.f32.gmra.mxu2 %vm499_vm1, %v8771_v21 }
 0x8e8   :  { %v2939_v17 = vsel %vm2938_vm10, %v7741_v12, %v2935_v23  ;;  %v7801_v12 = vld [vmem:[%s7897_s13 + $0x8] sm:$0xff]  ;;  %v7802_v23 = vld [vmem:[%s7897_s13 + $0x10] sm:$0x3] }
 0x8e9   :  { %v2942_v58 = vmul.f32 %v2939_v17, %v8753_v42 }
 0x8eb   :  { %v2948_v62 = vmul.f32 %v7669_v4, %v2942_v58  ;;  %v7800_v4 = vld [vmem:[%s7897_s13] sm:$0xff]  ;;  %s9432_s13 = sld [smem:[#allocation10_spill]] }
 0x8ed   :  { %v8776_v26 = vadd.f32 %v7670_v29, %v2948_v62 }
 0x8ef   :  { %6532 = vmatmul.msk.f32.gmra.mxu2 %vm499_vm1, %v8776_v26 }
 0x962   :  { %v3289_v27 = vpop.f32.mrf.mxu2 }
 0x963   :  { %v3290_v37 = vadd.f32 %v7671_v9, %v3289_v27 }
 0x96a   :  { %v3292_v31 = vpop.f32.mrf.mxu2 }
 0x96b   :  { %v3293_v32 = vadd.f32 %v7671_v9, %v3292_v31 }
 0x96d   :  { %3303 = vrot.lane.b32.xlu0 %v3293_v32, %s7863_s0  ;;  %v8808_v59 = vpack.i.bf16 %v3290_v37, %v3293_v32 }
 0x972   :  { %v3295_v34 = vpop.f32.mrf.mxu2 }
 0x973   :  { %v8782_v35 = vadd.f32 %v7671_v9, %v3295_v34 }
 0x975   :  { %3439 = vrot.lane.b32.xlu1 %v8782_v35, %s7864_s5  ;;  %3305 = vrot.lane.b32.xlu2 %v8782_v35, %s7863_s0 }
 0x976   :  { %3301 = vrot.lane.b32.xlu0 %v3290_v37, %s7863_s0  ;;  %s9445_s0 = sld [smem:[#allocation20_spill]] }
 0x97d   :  { %3437 = vrot.lane.b32.xlu2 %v3293_v32, %s7864_s5  ;;  %3435 = vrot.lane.b32.xlu1 %v3290_v37, %s7864_s5  ;;  %s9446_s5 = sld [smem:[#allocation5_spill]] }
 0x97e   :  { %3431 = vrot.lane.b32.xlu0 %v3293_v32, %s7866_s21 }
 0x985   :  { %3429 = vrot.lane.b32.xlu2 %v3290_v37, %s7866_s21  ;;  %3573 = vrot.lane.b32.xlu1 %v8782_v35, %s7865_s9 }
 0x986   :  { %3569 = vrot.lane.b32.xlu0 %v3290_v37, %s7865_s9 }
 0x98d   :  { %3707 = vrot.lane.b32.xlu2 %v8782_v35, %s7867_s25  ;;  %3571 = vrot.lane.b32.xlu1 %v3293_v32, %s7865_s9  ;;  %s9447_s9 = sld [smem:[#allocation18_spill]] }
 0x98e   :  { %3433 = vrot.lane.b32.xlu0 %v8782_v35, %s7866_s21  ;;  %s9448_s21 = sld [smem:[#allocation19_spill]] }
 0x995   :  { %3705 = vrot.lane.b32.xlu2 %v3293_v32, %s7867_s25  ;;  %3703 = vrot.lane.b32.xlu1 %v3290_v37, %s7867_s25  ;;  %s7878_s25 = smov [#allocation2]  }
 0x996   :  { %3697 = vrot.lane.b32.xlu0 %v3290_v37, %s7869_s15 }
 0x99d   :  { %3563 = vrot.lane.b32.xlu2 %v3290_v37, %s7868_s29  ;;  %3565 = vrot.lane.b32.xlu1 %v3293_v32, %s7868_s29 }
 0x99e   :  { %3567 = vrot.lane.b32.xlu0 %v8782_v35, %s7868_s29  ;;  %s5764_s29 = sshll.u32 %s7878_s25, 4  ;;  %s5765_s29 = int_to_ptr.vmem [resolvable:$true] %s5764_s29 }
 0x9a5   :  { %3699 = vrot.lane.b32.xlu2 %v3293_v32, %s7869_s15  ;;  %3701 = vrot.lane.b32.xlu1 %v8782_v35, %s7869_s15  ;;  %s5766_s15 = sshll.u32 %s8057_s17, 4  ;;  %s5767_s15 = int_to_ptr.hbm [resolvable:$true] %s5766_s15 }
 0x9a6   :  { %7645 = vrot.lane.b32.xlu0 %v8808_v59, %s7870_s16 }
 0x9ad   :  { %3388 = vrot.lane.b32.xlu2 %v8782_v35, %s7870_s16  ;;  %3522 = vrot.lane.b32.xlu1 %v8782_v35, %s7871_s18  ;;  %s7819_s16 = scalar_lea.hbm %s8057_s17, 2 }
 0x9ae   :  { %7650 = vrot.lane.b32.xlu0 %v8808_v59, %s7871_s18 }
 0x9cf   :  { %v3306_v38 = vpop.permute.xlu2 %3305 }
 0x9d0   :  { %6533 = vmatpush.xpose.msk.msrb.mxu0 %vm544_vm2, %v3306_v38 }
 0x9d7   :  { %v3438_v33 = vpop.permute.xlu2 %3437 }
 0x9df   :  { %v3304_v41 = vpop.permute.xlu0 %3303  ;;  %v3430_v1 = vpop.permute.xlu2 %3429 }
 0x9e0   :  { %6534 = vmatpush.xpose.msk.msrb.mxu0 %vm544_vm2, %v3304_v41 }
 0x9e7   :  { %v3440_v2 = vpop.permute.xlu1 %3439  ;;  %v3708_v40 = vpop.permute.xlu2 %3707 }
 0x9e8   :  { %v3302_v39 = vpop.permute.xlu0 %3301  ;;  %6543 = vmatpush.xpose.msk.msrb.mxu1 %vm544_vm2, %v3440_v2 }
 0x9e9   :  { %6535 = vmatpush.xpose.msk.msrb.mxu0 %vm544_vm2, %v3302_v39 }
 0x9ec   :  { %6536 = vmatmul.msk.f32.vlgmr.msrb.gmra.mxu0 %vm544_vm2, %v3290_v37  ;;  %6544 = vmatpush.xpose.msk.msrb.mxu1 %vm544_vm2, %v3438_v33 }
 0x9ef   :  { %v3706_v42 = vpop.permute.xlu2 %3705  ;;  %v3436_v43 = vpop.permute.xlu1 %3435 }
 0x9f0   :  { %v3432_v25 = vpop.permute.xlu0 %3431  ;;  %6545 = vmatpush.xpose.msk.msrb.mxu1 %vm544_vm2, %v3436_v43 }
 0x9f3   :  { %6546 = vmatmul.msk.f32.vlgmr.msrb.gmra.mxu1 %vm544_vm2, %v3430_v1 }
 0x9f4   :  { %6563 = vmatpush.xpose.msk.msra.mxu1 %vm544_vm2, %v3708_v40  ;;  %6537 = vmatmul.msk.f32.gmra.mxu0 %vm544_vm2, %v3293_v32 }
 0x9f7   :  { %v3564_v44 = vpop.permute.xlu2 %3563  ;;  %v3574_v30 = vpop.permute.xlu1 %3573 }
 0x9f8   :  { %6564 = vmatpush.xpose.msk.msra.mxu1 %vm544_vm2, %v3706_v42  ;;  %v3570_v46 = vpop.permute.xlu0 %3569  ;;  %6553 = vmatpush.xpose.msk.msra.mxu0 %vm544_vm2, %v3574_v30 }
 0x9fb   :  { %6547 = vmatmul.msk.f32.gmra.mxu1 %vm544_vm2, %v3432_v25 }
 0x9fc   :  { %6538 = vmatmul.msk.f32.gmra.mxu0 %vm544_vm2, %v8782_v35 }
 0x9ff   :  { %v3700_v49 = vpop.permute.xlu2 %3699  ;;  %v3572_v36 = vpop.permute.xlu1 %3571 }
 0xa00   :  { %v3434_v51 = vpop.permute.xlu0 %3433  ;;  %6554 = vmatpush.xpose.msk.msra.mxu0 %vm544_vm2, %v3572_v36 }
 0xa03   :  { %6548 = vmatmul.msk.f32.gmra.mxu1 %vm544_vm2, %v3434_v51 }
 0xa04   :  { %6555 = vmatpush.xpose.msk.msra.mxu0 %vm544_vm2, %v3570_v46 }
 0xa07   :  { %v3389_v20 = vpop.permute.xlu2 %3388  ;;  %v3704_v52 = vpop.permute.xlu1 %3703  ;;  %6556 = vmatmul.msk.f32.vlgmr.msra.gmra.mxu0 %vm544_vm2, %v3564_v44 }
 0xa08   :  { %v3698_v47 = vpop.permute.xlu0 %3697  ;;  %6539 = vmatpush.msk.msra.mxu3 %vm641_vm3, %v3389_v20  ;;  %6565 = vmatpush.xpose.msk.msra.mxu1 %vm544_vm2, %v3704_v52 }
 0xa0b   :  { %6566 = vmatmul.msk.f32.vlgmr.msra.gmra.mxu1 %vm544_vm2, %v3698_v47 }
 0xa0f   :  { %v3566_v48 = vpop.permute.xlu1 %3565 }
 0xa10   :  { %v3568_v53 = vpop.permute.xlu0 %3567  ;;  %6557 = vmatmul.msk.f32.gmra.mxu0 %vm544_vm2, %v3566_v48 }
 0xa13   :  { %6567 = vmatmul.msk.f32.gmra.mxu1 %vm544_vm2, %v3700_v49 }
 0xa17   :  { %v3702_v22 = vpop.permute.xlu1 %3701 }
 0xa18   :  { %v7646_v54 = vpop.permute.xlu0 %7645  ;;  %6558 = vmatmul.msk.f32.gmra.mxu0 %vm544_vm2, %v3568_v53 }
 0xa19   :  { %v7647_v55 = vunpack.i.l.bf16 %v7646_v54  ;;  %v7648_v56 = vunpack.i.h.bf16 %v7646_v54 }
 0xa1b   :  { %3417 = vmatpush.msra.mxu3 %v7647_v55  ;;  %6568 = vmatmul.msk.f32.gmra.mxu1 %vm544_vm2, %v3702_v22 }
 0xa1d   :  { %3418 = vmatpush.msra.mxu3 %v7648_v56 }
 0xa1f   :  { %v3523_v63 = vpop.permute.xlu1 %3522 }
 0xa20   :  { %v7651_v0 = vpop.permute.xlu0 %7650  ;;  %6549 = vmatpush.msk.msrb.mxu2 %vm641_vm3, %v3523_v63 }
 0xa21   :  { %v7652_v50 = vunpack.i.l.bf16 %v7651_v0  ;;  %v7653_v60 = vunpack.i.h.bf16 %v7651_v0 }
 0xa23   :  { %3551 = vmatpush.msrb.mxu2 %v7652_v50 }
 0xa25   :  { %3552 = vmatpush.msrb.mxu2 %v7653_v60 }
 0xa69   :  { %v3336_v3 = vpop.f32.mrf.mxu0 }
 0xa6a   :  { %v3345_v61 = vmul.f32 0.35355338, %v3336_v3 }
 0xa6c   :  { %v3348_v5 = vadd.f32 %v7800_v4, %v3345_v61 }
 0xa6e   :  { %v3351_v6 = vsel %vm589_vm4, %v3348_v5, -inf }
 0xa6f   :  { %3352 = vmax.xlane.f32.xlu2 %v3351_v6 }
 0xa70   :  { %v3470_v29 = vpop.f32.mrf.mxu1 }
 0xa71   :  { %v3339_v8 = vpop.f32.mrf.mxu0  ;;  %v3479_v7 = vmul.f32 0.35355338, %v3470_v29 }
 0xa72   :  { %v3346_v18 = vmul.f32 0.35355338, %v3339_v8 }
 0xa73   :  { %v3482_v10 = vadd.f32 %v7800_v4, %v3479_v7 }
 0xa74   :  { %v3349_v13 = vadd.f32 %v7801_v12, %v3346_v18 }
 0xa75   :  { %v3485_v45 = vsel %vm589_vm4, %v3482_v10, -inf }
 0xa76   :  { %3486 = vmax.xlane.f32.xlu0 %v3485_v45  ;;  %v3354_v15 = vsel %vm589_vm4, %v3349_v13, -inf }
 0xa77   :  { %3355 = vmax.xlane.f32.xlu1 %v3354_v15 }
 0xa78   :  { %v3473_v11 = vpop.f32.mrf.mxu1 }
 0xa79   :  { %v3342_v16 = vpop.f32.mrf.mxu0  ;;  %v3480_v28 = vmul.f32 0.35355338, %v3473_v11 }
 0xa7a   :  { %v3347_v57 = vmul.f32 0.35355338, %v3342_v16 }
 0xa7b   :  { %v3483_v19 = vadd.f32 %v7801_v12, %v3480_v28 }
 0xa7c   :  { %v3350_v17 = vadd.f32 %v7802_v23, %v3347_v57 }
 0xa7d   :  { %v3488_v58 = vsel %vm589_vm4, %v3483_v19, -inf }
 0xa7e   :  { %v3357_v62 = vsel %vm596_vm5, %v3350_v17, -inf  ;;  %3489 = vmax.xlane.f32.xlu2 %v3488_v58 }
 0xa7f   :  { %3358 = vmax.xlane.f32.xlu0 %v3357_v62 }
 0xa80   :  { %v3476_v27 = vpop.f32.mrf.mxu1 }
 0xa81   :  { %v3481_v9 = vmul.f32 0.35355338, %v3476_v27 }
 0xa83   :  { %v8856_v31 = vadd.f32 %v7802_v23, %v3481_v9 }
 0xa84   :  { %v3604_v32 = vpop.f32.mrf.mxu0 }
 0xa85   :  { %v3613_v34 = vmul.f32 0.35355338, %v3604_v32  ;;  %v3491_v37 = vsel %vm596_vm5, %v8856_v31, -inf }
 0xa86   :  { %3492 = vmax.xlane.f32.xlu2 %v3491_v37 }
 0xa87   :  { %v8860_v38 = vadd.f32 %v7800_v4, %v3613_v34 }
 0xa88   :  { %v3738_v33 = vpop.f32.mrf.mxu1 }
 0xa89   :  { %v3747_v41 = vmul.f32 0.35355338, %v3738_v33  ;;  %v3619_v1 = vsel %vm589_vm4, %v8860_v38, -inf }
 0xa8a   :  { %3620 = vmax.xlane.f32.xlu1 %v3619_v1 }
 0xa8b   :  { %v8864_v2 = vadd.f32 %v7800_v4, %v3747_v41 }
 0xa8d   :  { %v3607_v40 = vpop.f32.mrf.mxu0  ;;  %v3753_v39 = vsel %vm589_vm4, %v8864_v2, -inf }
 0xa8e   :  { %v3614_v42 = vmul.f32 0.35355338, %v3607_v40  ;;  %3754 = vmax.xlane.f32.xlu0 %v3753_v39 }
 0xa90   :  { %v3741_v43 = vpop.f32.mrf.mxu1  ;;  %v8868_v25 = vadd.f32 %v7801_v12, %v3614_v42 }
 0xa91   :  { %v3748_v44 = vmul.f32 0.35355338, %v3741_v43 }
 0xa92   :  { %v3622_v30 = vsel %vm589_vm4, %v8868_v25, -inf }
 0xa93   :  { %3623 = vmax.xlane.f32.xlu2 %v3622_v30  ;;  %v8872_v46 = vadd.f32 %v7801_v12, %v3748_v44 }
 0xa95   :  { %v3610_v49 = vpop.f32.mrf.mxu0  ;;  %v3756_v36 = vsel %vm589_vm4, %v8872_v46, -inf }
 0xa96   :  { %v3615_v51 = vmul.f32 0.35355338, %v3610_v49  ;;  %3757 = vmax.xlane.f32.xlu1 %v3756_v36 }
 0xa98   :  { %v3744_v20 = vpop.f32.mrf.mxu1  ;;  %v8876_v52 = vadd.f32 %v7802_v23, %v3615_v51 }
 0xa99   :  { %v3749_v47 = vmul.f32 0.35355338, %v3744_v20 }
 0xa9a   :  { %v3625_v48 = vsel %vm596_vm5, %v8876_v52, -inf }
 0xa9b   :  { %3626 = vmax.xlane.f32.xlu0 %v3625_v48  ;;  %v3752_v53 = vadd.f32 %v7802_v23, %v3749_v47 }
 0xa9d   :  { %v3759_v22 = vsel %vm596_vm5, %v3752_v53, -inf }
 0xa9e   :  { %3760 = vmax.xlane.f32.xlu2 %v3759_v22 }
 0xae2   :  { %v3353_v54 = vpop.xlane.xlu2 %3352 }
 0xae3   :  { %v3360_v55 = vsub.f32 %v3348_v5, %v3353_v54 }
 0xae5   :  { %v3363_v56 = vmul.f32 1.442695, %v3360_v55 }
 0xae7   :  { %7742 = vpow2.f32 %v3363_v56 }
 0xae9   :  { %v3487_v63 = vpop.xlane.xlu0 %3486 }
 0xaea   :  { %v3356_v0 = vpop.xlane.xlu1 %3355  ;;  %v3494_v50 = vsub.f32 %v3482_v10, %v3487_v63 }
 0xaeb   :  { %v3361_v60 = vsub.f32 %v3349_v13, %v3356_v0 }
 0xaec   :  { %v3497_v3 = vmul.f32 1.442695, %v3494_v50 }
 0xaed   :  { %v8881_v61 = vpop.eup %7742  ;;  %v3365_v4 = vmul.f32 1.442695, %v3361_v60 }
 0xaee   :  { %7744 = vpow2.f32 %v3497_v3  ;;  %v3369_v6 = vsel %vm589_vm4, %v8881_v61, 0.0 }
 0xaef   :  { %7746 = vpow2.f32 %v3365_v4  ;;  %3370 = vadd.xlane.f32.xlu1 %v3369_v6 }
 0xaf1   :  { %v3490_v29 = vpop.xlane.xlu2 %3489 }
 0xaf2   :  { %v3495_v8 = vsub.f32 %v3483_v19, %v3490_v29  ;;  %v3359_v7 = vpop.xlane.xlu0 %3358 }
 0xaf3   :  { %v3362_v5 = vsub.f32 %v3350_v17, %v3359_v7 }
 0xaf4   :  { %v8885_v18 = vpop.eup %7744  ;;  %v3499_v12 = vmul.f32 1.442695, %v3495_v8 }
 0xaf5   :  { %v8887_v45 = vpop.eup %7746  ;;  %v3367_v10 = vmul.f32 1.442695, %v3362_v5  ;;  %v3503_v13 = vsel %vm589_vm4, %v8885_v18, 0.0 }
 0xaf6   :  { %7748 = vpow2.f32 %v3499_v12  ;;  %v3372_v15 = vsel %vm589_vm4, %v8887_v45, 0.0  ;;  %3504 = vadd.xlane.f32.xlu0 %v3503_v13 }
 0xaf7   :  { %7750 = vpow2.f32 %v3367_v10  ;;  %3373 = vadd.xlane.f32.xlu2 %v3372_v15 }
 0xaf9   :  { %v3493_v19 = vpop.xlane.xlu2 %3492 }
 0xafa   :  { %v3496_v23 = vsub.f32 %v8856_v31, %v3493_v19 }
 0xafc   :  { %v8893_v11 = vpop.eup %7748  ;;  %v3501_v58 = vmul.f32 1.442695, %v3496_v23 }
 0xafd   :  { %v8895_v16 = vpop.eup %7750  ;;  %v3506_v28 = vsel %vm589_vm4, %v8893_v11, 0.0  ;;  %v3621_v62 = vpop.xlane.xlu1 %3620 }
 0xafe   :  { %3507 = vadd.xlane.f32.xlu1 %v3506_v28  ;;  %v3375_v57 = vsel %vm596_vm5, %v8895_v16, 0.0  ;;  %7752 = vpow2.f32 %v3501_v58  ;;  %v3628_v34 = vsub.f32 %v8860_v38, %v3621_v62 }
 0xaff   :  { %3376 = vadd.xlane.f32.xlu0 %v3375_v57 }
 0xb00   :  { %v3631_v1 = vmul.f32 1.442695, %v3628_v34 }
 0xb01   :  { %v3755_v27 = vpop.xlane.xlu0 %3754 }
 0xb02   :  { %v3762_v32 = vsub.f32 %v8864_v2, %v3755_v27 }
 0xb04   :  { %v3765_v41 = vmul.f32 1.442695, %v3762_v32  ;;  %v8911_v39 = vpop.eup %7752 }
 0xb05   :  { %v3509_v43 = vsel %vm596_vm5, %v8911_v39, 0.0 }
 0xb06   :  { %v3624_v17 = vpop.xlane.xlu2 %3623 }
 0xb07   :  { %v3629_v9 = vsub.f32 %v8868_v25, %v3624_v17 }
 0xb09   :  { %v3633_v37 = vmul.f32 1.442695, %v3629_v9 }
 0xb0b   :  { %7754 = vpow2.f32 %v3633_v37 }
 0xb0c   :  { %7756 = vpow2.f32 %v3765_v41 }
 0xb0d   :  { %7758 = vpow2.f32 %v3631_v1 }
 0xb0e   :  { %v3627_v48 = vpop.xlane.xlu0 %3626 }
 0xb0f   :  { %7655 = vrot.lane.b32.xlu2 %v8808_v59, %s7873_s23  ;;  %v3630_v3 = vsub.f32 %v8876_v52, %v3627_v48 }
 0xb11   :  { %v3761_v33 = vpop.xlane.xlu2 %3760  ;;  %v8916_v2 = vpop.eup %7754 }
 0xb12   :  { %v3764_v40 = vsub.f32 %v3752_v53, %v3761_v33  ;;  %v8918_v25 = vpop.eup %7756  ;;  %v3640_v44 = vsel %vm589_vm4, %v8916_v2, 0.0 }
 0xb13   :  { %3656 = vrot.lane.b32.xlu0 %v8782_v35, %s7873_s23  ;;  %v8922_v30 = vpop.eup %7758 }
 0xb14   :  { %v3769_v42 = vmul.f32 1.442695, %v3764_v40  ;;  %v3637_v49 = vsel %vm589_vm4, %v8922_v30, 0.0 }
 0xb16   :  { %7760 = vpow2.f32 %v3769_v42 }
 0xb17   :  { %3790 = vrot.lane.b32.xlu1 %v8782_v35, %s7872_s22  ;;  %v3758_v35 = vpop.xlane.xlu1 %3757 }
 0xb18   :  { %v3763_v31 = vsub.f32 %v8872_v46, %v3758_v35  ;;  %v3771_v46 = vsel %vm589_vm4, %v8918_v25, 0.0 }
 0xb1a   :  { %v3767_v38 = vmul.f32 1.442695, %v3763_v31 }
 0xb1c   :  { %7762 = vpow2.f32 %v3767_v38  ;;  %v8928_v36 = vpop.eup %7760 }
 0xb1d   :  { %v3777_v20 = vsel %vm596_vm5, %v8928_v36, 0.0 }
 0xb22   :  { %v8930_v51 = vpop.eup %7762 }
 0xb23   :  { %v3774_v47 = vsel %vm589_vm4, %v8930_v51, 0.0 }
 0xb38   :  { %3510 = vadd.xlane.f32.xlu2 %v3509_v43 }
 0xb3d   :  { %3641 = vadd.xlane.f32.xlu0 %v3640_v44 }
 0xb40   :  { %3772 = vadd.xlane.f32.xlu2 %v3771_v46 }
 0xb41   :  { %3638 = vadd.xlane.f32.xlu1 %v3637_v49 }
 0xb45   :  { %3778 = vadd.xlane.f32.xlu0 %v3777_v20 }
 0xb48   :  { %3775 = vadd.xlane.f32.xlu2 %v3774_v47 }
 0xb5a   :  { %7660 = vrot.lane.b32.xlu1 %v8808_v59, %s7872_s22 }
 0xb62   :  { %v3371_v53 = vpop.xlane.xlu1 %3370 }
 0xb63   :  { %7764 = vrcp.f32 %v3371_v53  ;;  %v2963_v53 = vld [vmem:[%s9432_s13 + $0x18] sm:$0xff] }
 0xb64   :  { %3900 = vmatpush.msrb.mxu0 %v2963_v53 }
 0xb69   :  { %v7765_v22 = vpop.eup %7764  ;;  %v3505_v54 = vpop.xlane.xlu0 %3504 }
 0xb6a   :  { %v3381_v55 = vmul.f32 %v7765_v22, %v8881_v61  ;;  %v3374_v56 = vpop.xlane.xlu2 %3373  ;;  %7766 = vrcp.f32 %v3505_v54  ;;  %v3635_v61 = vmul.f32 1.442695, %v3630_v3  ;;  %v2962_v22 = vld [vmem:[%s9432_s13 + $0x10] sm:$0xff]  ;;  %v2961_v54 = vld [vmem:[%s9432_s13 + $0x8] sm:$0xff] }
 0xb6b   :  { %7768 = vrcp.f32 %v3374_v56  ;;  %3901 = vmatpush.msrb.mxu0 %v2962_v22  ;;  %v6578_v22 = vld [vmem:[%s9434_s30] sm:$0xf] }
 0xb6c   :  { %6540 = vmatmul.msk.f32.vlgmr.msra.gmra.mxu3 %vm589_vm4, %v3381_v55  ;;  %v2960_v55 = vld [vmem:[%s9432_s13] sm:$0xff] }
 0xb6d   :  { %3902 = vmatpush.msrb.mxu0 %v2961_v54  ;;  %v7420_v54 = vld [vmem:[%s9434_s30 + $0x3c] sm:$0xf0] }
 0xb6f   :  { %3903 = vmatpush.msrb.mxu0 %v2960_v55  ;;  %v7412_v55 = vld [vmem:[%s9434_s30 + $0x4] sm:$0xf] }
 0xb70   :  { %v7767_v63 = vpop.eup %7766 }
 0xb71   :  { %v7769_v0 = vpop.eup %7768  ;;  %v3515_v50 = vmul.f32 %v7767_v63, %v8885_v18  ;;  %v3508_v60 = vpop.xlane.xlu1 %3507 }
 0xb72   :  { %7770 = vrcp.f32 %v3508_v60  ;;  %v3377_v59 = vpop.xlane.xlu0 %3376  ;;  %v3382_v4 = vmul.f32 %v7769_v0, %v8887_v45  ;;  %v7656_v5 = vpop.permute.xlu2 %7655 }
 0xb73   :  { %7772 = vrcp.f32 %v3377_v59  ;;  %6550 = vmatmul.msk.f32.vlgmr.msrb.gmra.mxu2 %vm589_vm4, %v3515_v50  ;;  %v7657_v45 = vunpack.i.l.bf16 %v7656_v5  ;;  %v7658_v10 = vunpack.i.h.bf16 %v7656_v5 }
 0xb74   :  { %6541 = vmatmul.msk.f32.gmra.mxu3 %vm589_vm4, %v3382_v4  ;;  %7774 = vpow2.f32 %v3635_v61 }
 0xb78   :  { %v7771_v6 = vpop.eup %7770 }
 0xb79   :  { %v7773_v29 = vpop.eup %7772  ;;  %v3516_v8 = vmul.f32 %v7771_v6, %v8893_v11 }
 0xb7a   :  { %v3383_v7 = vmul.f32 %v7773_v29, %v8895_v16  ;;  %v7775_v52 = vpop.eup %7774 }
 0xb7b   :  { %6551 = vmatmul.msk.f32.gmra.mxu2 %vm589_vm4, %v3516_v8  ;;  %v3643_v18 = vsel %vm596_vm5, %v7775_v52, 0.0 }
 0xb7c   :  { %6542 = vmatmul.msk.f32.gmra.mxu3 %vm589_vm4, %v3383_v7 }
 0xb84   :  { %3644 = vadd.xlane.f32.xlu1 %v3643_v18 }
 0xb85   :  { %v3657_v12 = vpop.permute.xlu0 %3656 }
 0xb86   :  { %6559 = vmatpush.msk.msrb.mxu3 %vm641_vm3, %v3657_v12 }
 0xb88   :  { %3685 = vmatpush.msrb.mxu3 %v7657_v45 }
 0xb89   :  { %v3791_v13 = vpop.permute.xlu1 %3790 }
 0xb8a   :  { %3686 = vmatpush.msrb.mxu3 %v7658_v10  ;;  %6569 = vmatpush.msk.msra.mxu2 %vm641_vm3, %v3791_v13  ;;  %v7672_v10 = vld [vmem:[%s9433_s24] ss:$0 sm:$0xff] }
 0xbab   :  { %v3511_v15 = vpop.xlane.xlu2 %3510 }
 0xbac   :  { %7776 = vrcp.f32 %v3511_v15 }
 0xbb0   :  { %v3642_v57 = vpop.xlane.xlu0 %3641 }
 0xbb2   :  { %v7777_v11 = vpop.eup %7776 }
 0xbb3   :  { %v3517_v16 = vmul.f32 %v7777_v11, %v8911_v39  ;;  %v3773_v58 = vpop.xlane.xlu2 %3772 }
 0xbb4   :  { %v3639_v28 = vpop.xlane.xlu1 %3638 }
 0xbb5   :  { %7778 = vrcp.f32 %v3639_v28  ;;  %6552 = vmatmul.msk.f32.gmra.mxu2 %vm589_vm4, %v3517_v16 }
 0xbb6   :  { %7780 = vrcp.f32 %v3642_v57 }
 0xbb7   :  { %7782 = vrcp.f32 %v3773_v58 }
 0xbb8   :  { %v3779_v41 = vpop.xlane.xlu0 %3778 }
 0xbbb   :  { %v7779_v19 = vpop.eup %7778  ;;  %v3776_v27 = vpop.xlane.xlu2 %3775 }
 0xbbc   :  { %v3649_v23 = vmul.f32 %v7779_v19, %v8922_v30  ;;  %v7781_v17 = vpop.eup %7780  ;;  %7784 = vrcp.f32 %v3776_v27 }
 0xbbd   :  { %v3650_v62 = vmul.f32 %v7781_v17, %v8916_v2  ;;  %v7783_v32 = vpop.eup %7782  ;;  %7786 = vrcp.f32 %v3779_v41 }
 0xbbe   :  { %6560 = vmatmul.msk.f32.vlgmr.msrb.gmra.mxu3 %vm589_vm4, %v3649_v23  ;;  %v3783_v33 = vmul.f32 %v7783_v32, %v8918_v25 }
 0xbc2   :  { %v7785_v1 = vpop.eup %7784 }
 0xbc3   :  { %v3784_v35 = vmul.f32 %v7785_v1, %v8930_v51  ;;  %v7787_v40 = vpop.eup %7786 }
 0xbc4   :  { %v3785_v39 = vmul.f32 %v7787_v40, %v8928_v36 }
 0xbc6   :  { %6561 = vmatmul.msk.f32.gmra.mxu3 %vm589_vm4, %v3650_v62 }
 0xbcc   :  { %v7661_v9 = vpop.permute.xlu1 %7660 }
 0xbcd   :  { %v7662_v34 = vunpack.i.l.bf16 %v7661_v9  ;;  %v7663_v37 = vunpack.i.h.bf16 %v7661_v9 }
 0xbcf   :  { %3819 = vmatpush.msra.mxu2 %v7662_v34 }
 0xbd1   :  { %3820 = vmatpush.msra.mxu2 %v7663_v37 }
 0xbd2   :  { %6570 = vmatmul.msk.f32.vlgmr.msra.gmra.mxu2 %vm589_vm4, %v3783_v33 }
 0xbda   :  { %6571 = vmatmul.msk.f32.gmra.mxu2 %vm589_vm4, %v3784_v35 }
 0xbe2   :  { %6572 = vmatmul.msk.f32.gmra.mxu2 %vm589_vm4, %v3785_v39 }
 0xbef   :  { %v3420_v25 = vpop.f32.mrf.mxu3 }
 0xbf6   :  { %v3554_v31 = vpop.f32.mrf.mxu2 }
 0xbf7   :  { %v3645_v42 = vpop.xlane.xlu1 %3644  ;;  %3834 = vrot.lane.b32.xlu0 %v3554_v31, %s7874_s26  ;;  %v3423_v44 = vpop.f32.mrf.mxu3 }
 0xbf8   :  { %7788 = vrcp.f32 %v3645_v42 }
 0xbfe   :  { %v7789_v43 = vpop.eup %7788  ;;  %v3557_v2 = vpop.f32.mrf.mxu2 }
 0xbff   :  { %3836 = vrot.lane.b32.xlu0 %v3557_v2, %s7874_s26  ;;  %v3651_v38 = vmul.f32 %v7789_v43, %v7775_v52  ;;  %v3426_v30 = vpop.f32.mrf.mxu3  ;;  %v6642_v43 = vld [vmem:[%s9434_s30 + $0x80] sm:$0xf] }
 0xc00   :  { %v7436_v2 = vld [vmem:[%s9434_s30 + $0xbc] sm:$0xf0] }
 0xc01   :  { %6562 = vmatmul.msk.f32.gmra.mxu3 %vm589_vm4, %v3651_v38  ;;  %v7428_v38 = vld [vmem:[%s9434_s30 + $0x84] sm:$0xf] }
 0xc38   :  { %v3560_v36 = vpop.f32.mrf.mxu2 }
 0xc41   :  { %v3688_v46 = vpop.f32.mrf.mxu3 }
 0xc42   :  { %3846 = vrot.lane.b32.xlu2 %v3688_v46, %s7875_s28  ;;  %v7437_v46 = vld [vmem:[%s9434_s30 + $0xc4] sm:$0xf0] }
 0xc49   :  { %v3691_v49 = vpop.f32.mrf.mxu3 }
 0xc4a   :  { %3848 = vrot.lane.b32.xlu2 %v3691_v49, %s7875_s28 }
 0xc55   :  { %v3822_v51 = vpop.f32.mrf.mxu2 }
 0xc56   :  { %3858 = vrot.lane.b32.xlu1 %v3822_v51, %s7876_s1 }
 0xc5d   :  { %v3825_v20 = vpop.f32.mrf.mxu2 }
 0xc5e   :  { %3838 = vrot.lane.b32.xlu1 %v3560_v36, %s7874_s26  ;;  %3860 = vrot.lane.b32.xlu0 %v3825_v20, %s7876_s1  ;;  %v7429_v20 = vld [vmem:[%s9434_s30 + $0x8c] sm:$0xf] }
 0xc65   :  { %v3828_v47 = vpop.f32.mrf.mxu2 }
 0xc66   :  { %3862 = vrot.lane.b32.xlu0 %v3828_v47, %s7876_s1  ;;  %v6652_v47 = vld [vmem:[%s9434_s30 + $0xc8] sm:$0xf0] }
 0xc67   :  { %v6655_v53 = vor.u32 %v7429_v20, %v6652_v47 }
 0xc69   :  { %v3835_v56 = vpop.permute.xlu0 %3834  ;;  %4257 = vmatpush.bf16.msra.mxu0 %v6655_v53  ;;  %v7674_v53 = vld [vmem:[%s9440_s12] ss:$0 sm:$0xff] }
 0xc6a   :  { %v3867_v0 = vsel %vm544_vm2, %v3420_v25, %v3835_v56  ;;  %v6643_v25 = vor.u32 %v7436_v2, %v6642_v43  ;;  %v6594_v43 = vld [vmem:[%s9434_s30 + $0x10] sm:$0xf] }
 0xc6c   :  { %4203 = vmatpush.bf16.msra.mxu3 %v6643_v25  ;;  %v7422_v25 = vld [vmem:[%s9434_s30 + $0x4c] sm:$0xf0] }
 0xc71   :  { %v3837_v50 = vpop.permute.xlu0 %3836 }
 0xc72   :  { %v3868_v61 = vsel %vm544_vm2, %v3423_v44, %v3837_v50  ;;  %v6644_v44 = vld [vmem:[%s9434_s30 + $0xc0] sm:$0xf0]  ;;  %v6586_v50 = vld [vmem:[%s9434_s30 + $0x8] sm:$0xf] }
 0xc73   :  { %v6647_v36 = vor.u32 %v7428_v38, %v6644_v44  ;;  %v6596_v44 = vld [vmem:[%s9434_s30 + $0x50] sm:$0xf0] }
 0xc75   :  { %4221 = vmatpush.bf16.msrb.mxu1 %v6647_v36  ;;  %v7423_v36 = vld [vmem:[%s9434_s30 + $0x54] sm:$0xf0] }
 0xc84   :  { %v3694_v48 = vpop.f32.mrf.mxu3 }
 0xc85   :  { %3850 = vrot.lane.b32.xlu2 %v3694_v48, %s7875_s28 }
 0xc9c   :  { %v3847_v63 = vpop.permute.xlu2 %3846 }
 0xc9d   :  { %v3870_v60 = vsel %vm152_vm0, %v3867_v0, %v3847_v63  ;;  %v6579_v63 = vor.u32 %v7420_v54, %v6578_v22  ;;  %v6580_v0 = vld [vmem:[%s9434_s30 + $0x40] sm:$0xf0] }
 0xc9f   :  { %4204 = vmatpush.bf16.msra.mxu3 %v6579_v63 }
 0xca4   :  { %v3849_v4 = vpop.permute.xlu2 %3848 }
 0xca5   :  { %v3871_v6 = vsel %vm152_vm0, %v3868_v61, %v3849_v4  ;;  %v6588_v4 = vld [vmem:[%s9434_s30 + $0x48] sm:$0xf0] }
 0xcc8   :  { %v3859_v3 = vpop.permute.xlu1 %3858 }
 0xcc9   :  { %v3873_v59 = vsel %vm1114_vm6, %v3870_v60, %v3859_v3  ;;  %v6583_v60 = vor.u32 %v7412_v55, %v6580_v0  ;;  %v7421_v3 = vld [vmem:[%s9434_s30 + $0x44] sm:$0xf0] }
 0xcca   :  { %6573 = vmatmul.msk.f32.vlgmr.msrb.gmra.mxu0 %vm499_vm1, %v3873_v59  ;;  %v7413_v59 = vld [vmem:[%s9434_s30 + $0xc] sm:$0xf]  ;;  %v6587_v61 = vor.u32 %v7421_v3, %v6586_v50 }
 0xccb   :  { %4222 = vmatpush.bf16.msrb.mxu1 %v6583_v60 }
 0xcd0   :  { %v3861_v29 = vpop.permute.xlu0 %3860  ;;  %v3839_v7 = vpop.permute.xlu1 %3838 }
 0xcd1   :  { %v3874_v8 = vsel %vm1114_vm6, %v3871_v6, %v3861_v29  ;;  %v3869_v52 = vsel %vm544_vm2, %v3426_v30, %v3839_v7  ;;  %v6650_v30 = vld [vmem:[%s9434_s30 + $0x88] sm:$0xf]  ;;  %v6591_v6 = vor.u32 %v7413_v59, %v6588_v4 }
 0xcd2   :  { %6574 = vmatmul.msk.f32.gmra.mxu0 %vm499_vm1, %v3874_v8  ;;  %v6651_v51 = vor.u32 %v7437_v46, %v6650_v30  ;;  %v6595_v30 = vor.u32 %v7422_v25, %v6594_v43  ;;  %v7443_v43 = vld [vmem:[%s9434_s30 + $0xf4] sm:$0xf0]  ;;  %v7435_v25 = vld [vmem:[%s9434_s30 + $0xbc] sm:$0xf] }
 0xcd3   :  { %4258 = vmatpush.bf16.msra.mxu0 %v6591_v6 }
 0xcd4   :  { %4239 = vmatpush.bf16.msrb.mxu2 %v6651_v51  ;;  %v7415_v51 = vld [vmem:[%s9434_s30 + $0x1c] sm:$0xf] }
 0xcd8   :  { %v3863_v18 = vpop.permute.xlu0 %3862  ;;  %4240 = vmatpush.bf16.msrb.mxu2 %v6587_v61 }
 0xcdf   :  { %v3851_v5 = vpop.permute.xlu2 %3850 }
 0xce0   :  { %v3872_v12 = vsel %vm152_vm0, %v3869_v52, %v3851_v5 }
 0xce1   :  { %v3875_v45 = vsel %vm1114_vm6, %v3872_v12, %v3863_v18 }
 0xce2   :  { %6575 = vmatmul.msk.f32.gmra.mxu0 %vm499_vm1, %v3875_v45 }
 0xd47   :  { %v3905_v13 = vpop.f32.mrf.mxu0 }
 0xd48   :  { %v3906_v15 = vadd.f32 %v7672_v10, %v3905_v13 }
 0xd4a   :  { %v3914_v11 = vadd.f32 %v3906_v15, %v8767_v24 }
 0xd4c   :  { %v3917_v16 = vsel %vm499_vm1, %v3914_v11, 0.0 }
 0xd4d   :  { %3918 = vadd.xlane.f32.xlu1 %v3917_v16  ;;  %v7433_v16 = vld [vmem:[%s9434_s30 + $0xac] sm:$0xf] }
 0xd4f   :  { %v3908_v28 = vpop.f32.mrf.mxu0 }
 0xd50   :  { %v3909_v57 = vadd.f32 %v7672_v10, %v3908_v28 }
 0xd52   :  { %v3915_v19 = vadd.f32 %v3909_v57, %v8771_v21 }
 0xd54   :  { %v3920_v23 = vsel %vm499_vm1, %v3915_v19, 0.0 }
 0xd55   :  { %3921 = vadd.xlane.f32.xlu2 %v3920_v23  ;;  %v6658_v23 = vld [vmem:[%s9434_s30 + $0x90] sm:$0xf] }
 0xd5f   :  { %v3911_v17 = vpop.f32.mrf.mxu0 }
 0xd60   :  { %v3912_v58 = vadd.f32 %v7672_v10, %v3911_v17  ;;  %v7438_v17 = vld [vmem:[%s9434_s30 + $0xcc] sm:$0xf0] }
 0xd62   :  { %v3916_v62 = vadd.f32 %v3912_v58, %v8776_v26  ;;  %v7673_v58 = vld [vmem:[%s9435_s6] ss:$0 sm:$0xff] }
 0xd64   :  { %v3923_v27 = vsel %vm1165_vm7, %v3916_v62, 0.0 }
 0xd65   :  { %3924 = vadd.xlane.f32.xlu0 %v3923_v27  ;;  %v6659_v27 = vor.u32 %v7438_v17, %v6658_v23  ;;  %v7424_v23 = vld [vmem:[%s9434_s30 + $0x5c] sm:$0xf0]  ;;  %v7416_v17 = vld [vmem:[%s9434_s30 + $0x24] sm:$0xf] }
 0xd67   :  { %4275 = vmatpush.bf16.msrb.mxu3 %v6659_v27 }
 0xd6b   :  { %4276 = vmatpush.bf16.msrb.mxu3 %v6595_v30 }
 0xdc0   :  { %v3919_v9 = vpop.xlane.xlu1 %3918 }
 0xdc1   :  { %v3926_v24 = vmul.f32 %v3919_v9, %v8359_v14  ;;  %v7430_v9 = vld [vmem:[%s9434_s30 + $0x94] sm:$0xf] }
 0xdc3   :  { %v8998_v32 = vsub.f32 %v3914_v11, %v3926_v24  ;;  %v6660_v24 = vld [vmem:[%s9434_s30 + $0xd0] sm:$0xf0] }
 0xdc5   :  { %v3932_v34 = vmul.f32 %v8998_v32, %v8998_v32 }
 0xdc7   :  { %v3935_v21 = vsel %vm499_vm1, %v3932_v34, 0.0  ;;  %v6666_v34 = vld [vmem:[%s9434_s30 + $0x98] sm:$0xf] }
 0xdc8   :  { %3936 = vadd.xlane.f32.xlu1 %v3935_v21  ;;  %v3922_v37 = vpop.xlane.xlu2 %3921 }
 0xdc9   :  { %v3927_v26 = vmul.f32 %v3922_v37, %v8359_v14  ;;  %v6663_v37 = vor.u32 %v7430_v9, %v6660_v24  ;;  %v6618_v9 = vld [vmem:[%s9434_s30 + $0x28] sm:$0xf] }
 0xdca   :  { %v7425_v24 = vld [vmem:[%s9434_s30 + $0x64] sm:$0xf0] }
 0xdcb   :  { %v9004_v33 = vsub.f32 %v3915_v19, %v3927_v26  ;;  %v7439_v26 = vld [vmem:[%s9434_s30 + $0xd4] sm:$0xf0]  ;;  %4293 = vmatpush.bf16.msra.mxu1 %v6663_v37  ;;  %v6620_v37 = vld [vmem:[%s9434_s30 + $0x68] sm:$0xf0] }
 0xdcd   :  { %v3933_v41 = vmul.f32 %v9004_v33, %v9004_v33 }
 0xdcf   :  { %v3938_v1 = vsel %vm499_vm1, %v3933_v41, 0.0  ;;  %v7431_v41 = vld [vmem:[%s9434_s30 + $0x9c] sm:$0xf] }
 0xdd0   :  { %3939 = vadd.xlane.f32.xlu2 %v3938_v1 }
 0xdd8   :  { %v3925_v35 = vpop.xlane.xlu0 %3924 }
 0xdd9   :  { %v3928_v40 = vmul.f32 %v3925_v35, %v8359_v14  ;;  %v7434_v35 = vld [vmem:[%s9434_s30 + $0xb4] sm:$0xf] }
 0xddb   :  { %v9010_v39 = vsub.f32 %v3916_v62, %v3928_v40 }
 0xddd   :  { %v3934_v31 = vmul.f32 %v9010_v39, %v9010_v39 }
 0xddf   :  { %v3941_v42 = vsel %vm1165_vm7, %v3934_v31, 0.0  ;;  %v6667_v31 = vor.u32 %v7439_v26, %v6666_v34  ;;  %v7417_v34 = vld [vmem:[%s9434_s30 + $0x2c] sm:$0xf] }
 0xde0   :  { %3942 = vadd.xlane.f32.xlu0 %v3941_v42  ;;  %v6668_v42 = vld [vmem:[%s9434_s30 + $0xd8] sm:$0xf0]  ;;  %v6623_v26 = vor.u32 %v7417_v34, %v6620_v37  ;;  %v7444_v34 = vld [vmem:[%s9441_s2] sm:$0xff]  ;;  %v7490_v37 = vld [vmem:[%s9441_s2 + $0x170] sm:$0xff] }
 0xde1   :  { %v6671_v38 = vor.u32 %v7431_v41, %v6668_v42  ;;  %4311 = vmatpush.bf16.msra.mxu2 %v6667_v31  ;;  %v6690_v41 = vld [vmem:[%s9434_s30 + $0xb0] sm:$0xf]  ;;  %v6692_v31 = vld [vmem:[%s9434_s30 + $0xf0] sm:$0xf0]  ;;  %v6698_v42 = vld [vmem:[%s9434_s30 + $0xb8] sm:$0xf] }
 0xde3   :  { %4329 = vmatpush.bf16.msrb.mxu0 %v6671_v38  ;;  %v6699_v38 = vor.u32 %v7443_v43, %v6698_v42  ;;  %v7498_v42 = vld [vmem:[%s9441_s2 + $0x1b0] sm:$0xff]  ;;  %v7504_v43 = vld [vmem:[%s9441_s2 + $0x1e0] sm:$0xff] }
 0xe3b   :  { %v3937_v49 = vpop.xlane.xlu1 %3936 }
 0xe3c   :  { %v3944_v48 = vmul.f32 %v3937_v49, %v8359_v14  ;;  %v6602_v49 = vld [vmem:[%s9434_s30 + $0x18] sm:$0xf] }
 0xe3d   :  { %v6603_v47 = vor.u32 %v7423_v36, %v6602_v49  ;;  %v7418_v49 = vld [vmem:[%s9434_s30 + $0x34] sm:$0xf] }
 0xe3e   :  { %v3947_v56 = vadd.f32 1e-05, %v3944_v48  ;;  %v6604_v48 = vld [vmem:[%s9434_s30 + $0x58] sm:$0xf0]  ;;  %v6628_v36 = vld [vmem:[%s9434_s30 + $0x70] sm:$0xf0] }
 0xe3f   :  { %v6607_v55 = vor.u32 %v7415_v51, %v6604_v48  ;;  %4312 = vmatpush.bf16.msra.mxu2 %v6603_v47  ;;  %v6634_v47 = vld [vmem:[%s9434_s30 + $0x38] sm:$0xf] }
 0xe40   :  { %7790 = vrsqrt.f32 %v3947_v56  ;;  %vm3956_vm3 = vweird.f32 %v3947_v56  ;;  %v7427_v48 = vld [vmem:[%s9434_s30 + $0x74] sm:$0xf0] }
 0xe41   :  { %4330 = vmatpush.bf16.msrb.mxu0 %v6607_v55 }
 0xe43   :  { %v3940_v29 = vpop.xlane.xlu2 %3939 }
 0xe44   :  { %v3945_v8 = vmul.f32 %v3940_v29, %v8359_v14 }
 0xe46   :  { %v7791_v7 = vpop.eup %7790  ;;  %v3948_v52 = vadd.f32 1e-05, %v3945_v8 }
 0xe47   :  { %v3951_v5 = vmul.f32 %v7791_v7, %v3947_v56  ;;  %vm3957_vm2 = vweird.f32 %v7791_v7 }
 0xe48   :  { %7792 = vrsqrt.f32 %v3948_v52  ;;  %vm9033_vm4 = vmor %vm3956_vm3, %vm3957_vm2  ;;  %vm3966_vm6 = vweird.f32 %v3948_v52 }
 0xe49   :  { %v3952_v18 = vmul.f32 %v7791_v7, %v3951_v5  ;;  %v7440_v5 = vld [vmem:[%s9434_s30 + $0xdc] sm:$0xf0] }
 0xe4b   :  { %v3953_v12 = vmul.f32 0.5, %v3952_v18  ;;  %v7432_v18 = vld [vmem:[%s9434_s30 + $0xa4] sm:$0xf] }
 0xe4d   :  { %v3954_v45 = vsub.f32 1.5, %v3953_v12 }
 0xe4e   :  { %v7793_v10 = vpop.eup %7792 }
 0xe4f   :  { %v3955_v13 = vmul.f32 %v7791_v7, %v3954_v45  ;;  %v3961_v15 = vmul.f32 %v7793_v10, %v3948_v52  ;;  %vm3967_vm5 = vweird.f32 %v7793_v10  ;;  %v6676_v45 = vld [vmem:[%s9434_s30 + $0xe0] sm:$0xf0] }
 0xe50   :  { %vm9050_vm7 = vmor %vm3966_vm6, %vm3967_vm5  ;;  %vm5673_vm5 = vcmask 1040384  }
 0xe51   :  { %v3962_v11 = vmul.f32 %v7793_v10, %v3961_v15  ;;  %v3959_v28 = vsel %vm9033_vm4, %v7791_v7, %v3955_v13  ;;  %v7441_v13 = vld [vmem:[%s9434_s30 + $0xe4] sm:$0xf0]  ;;  %v6679_v15 = vor.u32 %v7432_v18, %v6676_v45  ;;  %v7471_v45 = vld [vmem:[%s9441_s2 + $0xd8] sm:$0xff] }
 0xe52   :  { %v3980_v1 = vmul.f32 %v3959_v28, %v8998_v32  ;;  %v7414_v32 = vld [vmem:[%s9434_s30 + $0x14] sm:$0xf]  ;;  %v6684_v28 = vld [vmem:[%s9434_s30 + $0xe8] sm:$0xf0] }
 0xe53   :  { %v3963_v57 = vmul.f32 0.5, %v3962_v11  ;;  %v3943_v19 = vpop.xlane.xlu0 %3942  ;;  %v6599_v46 = vor.u32 %v7414_v32, %v6596_v44  ;;  %v6700_v32 = vld [vmem:[%s9434_s30 + $0xf8] sm:$0xf0]  ;;  %v6626_v44 = vld [vmem:[%s9434_s30 + $0x30] sm:$0xf]  ;;  %v7465_v18 = vld [vmem:[%s9441_s2 + $0xa8] sm:$0xff] }
 0xe54   :  { %v3946_v62 = vmul.f32 %v3943_v19, %v8359_v14  ;;  %v3986_v22 = vmul.f32 %v7673_v58, %v3980_v1  ;;  %v6687_v19 = vor.u32 %v7433_v16, %v6684_v28  ;;  %v7442_v1 = vld [vmem:[%s9434_s30 + $0xec] sm:$0xf0]  ;;  %v6703_v30 = vor.u32 %v7435_v25, %v6700_v32  ;;  %v7447_v16 = vld [vmem:[%s9441_s2 + $0x18] sm:$0xff] }
 0xe55   :  { %v3964_v21 = vsub.f32 1.5, %v3963_v57  ;;  %4294 = vmatpush.bf16.msra.mxu1 %v6599_v46  ;;  %v6610_v57 = vld [vmem:[%s9434_s30 + $0x20] sm:$0xf]  ;;  %v7426_v46 = vld [vmem:[%s9434_s30 + $0x6c] sm:$0xf0]  ;;  %v7463_v28 = vld [vmem:[%s9441_s2 + $0x98] sm:$0xff] }
 0xe56   :  { %v3949_v40 = vadd.f32 1e-05, %v3946_v62  ;;  %v9067_v0 = vadd.f32 %v7674_v53, %v3986_v22  ;;  %v6611_v62 = vor.u32 %v7424_v23, %v6610_v57  ;;  %v6627_v51 = vor.u32 %v7426_v46, %v6626_v44  ;;  %v7453_v57 = vld [vmem:[%s9441_s2 + $0x48] sm:$0xff]  ;;  %v7446_v23 = vld [vmem:[%s9441_s2 + $0x10] sm:$0xff]  ;;  %v7487_v25 = vld [vmem:[%s9441_s2 + $0x158] sm:$0xff] }
 0xe57   :  { %v3965_v2 = vmul.f32 %v7793_v10, %v3964_v21  ;;  %v6619_v21 = vor.u32 %v7425_v24, %v6618_v9  ;;  %v6635_v22 = vor.u32 %v7427_v48, %v6634_v47  ;;  %v7491_v9 = vld [vmem:[%s9441_s2 + $0x178] sm:$0xff]  ;;  %v9223_v44 = vld [vmem:[%s9442_s7] sm:$0xff]  ;;  %v7502_v47 = vld [vmem:[%s9441_s2 + $0x1d0] sm:$0xff] }
 0xe58   :  { %7794 = vrsqrt.f32 %v3949_v40  ;;  %vm3976_vm12 = vweird.f32 %v3949_v40  ;;  %v7507_v24 = vld [vmem:[%s9441_s2 + $0x1f8] sm:$0xff]  ;;  %v9233_v48 = vperm.slane %v9223_v44, 3 }
 0xe59   :  { %v3969_v20 = vsel %vm9050_vm7, %v7793_v10, %v3965_v2  ;;  %v6682_v10 = vld [vmem:[%s9434_s30 + $0xa8] sm:$0xf]  ;;  %v6695_v2 = vor.u32 %v7434_v35, %v6692_v31  ;;  %v7482_v31 = vld [vmem:[%s9441_s2 + $0x130] sm:$0xff]  ;;  %v7503_v32 = vld [vmem:[%s9441_s2 + $0x1d8] sm:$0xff] }
 0xe5a   :  { %v3981_v54 = vmul.f32 %v3969_v20, %v9004_v33  ;;  %v6683_v11 = vor.u32 %v7441_v13, %v6682_v10  ;;  %v6631_v20 = vor.u32 %v7418_v49, %v6628_v36  ;;  %v7448_v10 = vld [vmem:[%s9441_s2 + $0x20] sm:$0xff]  ;;  %v7489_v35 = vld [vmem:[%s9441_s2 + $0x168] sm:$0xff] }
 0xe5b   :  { %v7464_v13 = vld [vmem:[%s9441_s2 + $0xa0] sm:$0xff] }
 0xe5c   :  { %v3987_v56 = vmul.f32 %v7673_v58, %v3981_v54  ;;  %v6636_v54 = vld [vmem:[%s9434_s30 + $0x78] sm:$0xf0]  ;;  %v7480_v49 = vld [vmem:[%s9441_s2 + $0x120] sm:$0xff] }
 0xe5d   :  { %v7496_v36 = vld [vmem:[%s9441_s2 + $0x1a0] sm:$0xff] }
 0xe5e   :  { %v7795_v63 = vpop.eup %7794  ;;  %v9069_v50 = vadd.f32 %v7674_v53, %v3987_v56  ;;  %v7459_v56 = vld [vmem:[%s9441_s2 + $0x78] sm:$0xff] }
 0xe5f   :  { %v3971_v60 = vmul.f32 %v7795_v63, %v3949_v40  ;;  %vm3977_vm11 = vweird.f32 %v7795_v63  ;;  %v6691_v40 = vor.u32 %v7442_v1, %v6690_v41  ;;  %v7483_v41 = vld [vmem:[%s9441_s2 + $0x138] sm:$0xff] }
 0xe60   :  { %v9073_v3 = vpack.c.bf16 %v9069_v50, %v9067_v0  ;;  %vm3978_vm13 = vmor %vm3976_vm12, %vm3977_vm11  ;;  %v7499_v1 = vld [vmem:[%s9441_s2 + $0x1b8] sm:$0xff] }
 0xe61   :  { %v3972_v59 = vmul.f32 %v7795_v63, %v3971_v60  ;;  %v7458_v60 = vld [vmem:[%s9441_s2 + $0x70] sm:$0xff] }
 0xe62   :  { %6704 = vmatmul.msk.bf16.vlgmr.msra.gmra.mxu3 %vm499_vm1, %v9073_v3  ;;  %6706 = vmatmul.msk.bf16.vlgmr.msrb.gmra.mxu1 %vm499_vm1, %v9073_v3 }
 0xe63   :  { %v3973_v33 = vmul.f32 0.5, %v3972_v59  ;;  %6708 = vmatmul.msk.bf16.vlgmr.msrb.gmra.mxu2 %vm499_vm1, %v9073_v3  ;;  %6710 = vmatmul.msk.bf16.vlgmr.msra.gmra.mxu0 %vm499_vm1, %v9073_v3  ;;  %v7474_v59 = vld [vmem:[%s9441_s2 + $0xf0] sm:$0xff] }
 0xe64   :  { %4365 = vmatpush.bf16.msrb.mxu1 %v6679_v15  ;;  %4383 = vmatpush.bf16.msrb.mxu2 %v6683_v11  ;;  %v7454_v15 = vld [vmem:[%s9441_s2 + $0x50] sm:$0xff] }
 0xe65   :  { %v3974_v4 = vsub.f32 1.5, %v3973_v33  ;;  %4401 = vmatpush.bf16.msra.mxu0 %v6687_v19  ;;  %v7451_v33 = vld [vmem:[%s9441_s2 + $0x38] sm:$0xff]  ;;  %v7470_v11 = vld [vmem:[%s9441_s2 + $0xd0] sm:$0xff]  ;;  %v7469_v19 = vld [vmem:[%s9441_s2 + $0xc8] sm:$0xff] }
 0xe67   :  { %v3975_v61 = vmul.f32 %v7795_v63, %v3974_v4  ;;  %v7467_v4 = vld [vmem:[%s9441_s2 + $0xb8] sm:$0xff] }
 0xe68   :  { %4384 = vmatpush.bf16.msrb.mxu2 %v6619_v21  ;;  %v7460_v21 = vld [vmem:[%s9441_s2 + $0x80] sm:$0xff] }
 0xe69   :  { %v3979_v6 = vsel %vm3978_vm13, %v7795_v63, %v3975_v61  ;;  %4402 = vmatpush.bf16.msra.mxu0 %v6623_v26  ;;  %v7475_v63 = vld [vmem:[%s9441_s2 + $0xf8] sm:$0xff]  ;;  %v7457_v61 = vld [vmem:[%s9441_s2 + $0x68] sm:$0xff]  ;;  %v7506_v26 = vld [vmem:[%s9441_s2 + $0x1f0] sm:$0xff] }
 0xe6a   :  { %v3982_v29 = vmul.f32 %v3979_v6, %v9010_v39  ;;  %v6674_v39 = vld [vmem:[%s9434_s30 + $0xa0] sm:$0xf]  ;;  %v7473_v6 = vld [vmem:[%s9441_s2 + $0xe8] sm:$0xff] }
 0xe6b   :  { %v6675_v12 = vor.u32 %v7440_v5, %v6674_v39  ;;  %v7472_v39 = vld [vmem:[%s9441_s2 + $0xe0] sm:$0xff]  ;;  %v7449_v5 = vld [vmem:[%s9441_s2 + $0x28] sm:$0xff] }
 0xe6c   :  { %v3988_v8 = vmul.f32 %v7673_v58, %v3982_v29  ;;  %v6612_v58 = vld [vmem:[%s9434_s30 + $0x60] sm:$0xf0]  ;;  %v7450_v29 = vld [vmem:[%s9441_s2 + $0x30] sm:$0xff] }
 0xe6d   :  { %4347 = vmatpush.bf16.msra.mxu3 %v6675_v12  ;;  %v6615_v27 = vor.u32 %v7416_v17, %v6612_v58  ;;  %v7455_v12 = vld [vmem:[%s9441_s2 + $0x58] sm:$0xff]  ;;  %v7462_v17 = vld [vmem:[%s9441_s2 + $0x90] sm:$0xff]  ;;  %v7468_v58 = vld [vmem:[%s9441_s2 + $0xc0] sm:$0xff] }
 0xe6e   :  { %v3994_v7 = vadd.f32 %v7674_v53, %v3988_v8  ;;  %v7419_v53 = vld [vmem:[%s9434_s30 + $0x3c] sm:$0xf]  ;;  %v7466_v8 = vld [vmem:[%s9441_s2 + $0xb0] sm:$0xff] }
 0xe6f   :  { %4366 = vmatpush.bf16.msrb.mxu1 %v6615_v27  ;;  %v6639_v55 = vor.u32 %v7419_v53, %v6636_v54  ;;  %v7461_v27 = vld [vmem:[%s9441_s2 + $0x88] sm:$0xff]  ;;  %v7479_v53 = vld [vmem:[%s9441_s2 + $0x118] sm:$0xff] }
 0xe70   :  { %v9084_v52 = vpack.c.bf16 %v3994_v7, %v3994_v7  ;;  %v7456_v7 = vld [vmem:[%s9441_s2 + $0x60] sm:$0xff] }
 0xe71   :  { %4348 = vmatpush.bf16.msra.mxu3 %v6611_v62  ;;  %v7445_v62 = vld [vmem:[%s9441_s2 + $0x8] sm:$0xff] }
 0xe72   :  { %6705 = vmatmul.msk.bf16.gmra.mxu3 %vm499_vm1, %v9084_v52  ;;  %6707 = vmatmul.msk.bf16.gmra.mxu1 %vm499_vm1, %v9084_v52 }
 0xe73   :  { %6709 = vmatmul.msk.bf16.gmra.mxu2 %vm499_vm1, %v9084_v52  ;;  %6711 = vmatmul.msk.bf16.gmra.mxu0 %vm499_vm1, %v9084_v52 }
 0xe82   :  { %6712 = vmatmul.msk.bf16.vlgmr.msrb.gmra.mxu3 %vm499_vm1, %v9073_v3  ;;  %6714 = vmatmul.msk.bf16.vlgmr.msra.gmra.mxu1 %vm499_vm1, %v9073_v3 }
 0xe83   :  { %6716 = vmatmul.msk.bf16.vlgmr.msra.gmra.mxu2 %vm499_vm1, %v9073_v3  ;;  %6718 = vmatmul.msk.bf16.vlgmr.msrb.gmra.mxu0 %vm499_vm1, %v9073_v3 }
 0xe84   :  { %4419 = vmatpush.bf16.msrb.mxu3 %v6691_v40  ;;  %4437 = vmatpush.bf16.msra.mxu1 %v6695_v2  ;;  %v7505_v40 = vld [vmem:[%s9441_s2 + $0x1e8] sm:$0xff] }
 0xe85   :  { %4455 = vmatpush.bf16.msra.mxu2 %v6699_v38  ;;  %4473 = vmatpush.bf16.msrb.mxu0 %v6703_v30  ;;  %v7481_v2 = vld [vmem:[%s9441_s2 + $0x128] sm:$0xff] }
 0xe86   :  { %v7497_v38 = vld [vmem:[%s9441_s2 + $0x1a8] sm:$0xff] }
 0xe88   :  { %4420 = vmatpush.bf16.msrb.mxu3 %v6627_v51  ;;  %4438 = vmatpush.bf16.msra.mxu1 %v6631_v20  ;;  %v9228_v51 = vperm.slane %v9223_v44, 1  ;;  %v7486_v20 = vld [vmem:[%s9441_s2 + $0x150] sm:$0xff] }
 0xe89   :  { %4456 = vmatpush.bf16.msra.mxu2 %v6635_v22  ;;  %4474 = vmatpush.bf16.msrb.mxu0 %v6639_v55  ;;  %v7495_v22 = vld [vmem:[%s9441_s2 + $0x198] sm:$0xff] }
 0xe92   :  { %6713 = vmatmul.msk.bf16.gmra.mxu3 %vm499_vm1, %v9084_v52  ;;  %6715 = vmatmul.msk.bf16.gmra.mxu1 %vm499_vm1, %v9084_v52 }
 0xe93   :  { %6717 = vmatmul.msk.bf16.gmra.mxu2 %vm499_vm1, %v9084_v52  ;;  %6719 = vmatmul.msk.bf16.gmra.mxu0 %vm499_vm1, %v9084_v52 }
 0xea2   :  { %6720 = vmatmul.msk.bf16.vlgmr.msra.gmra.mxu3 %vm499_vm1, %v9073_v3  ;;  %6722 = vmatmul.msk.bf16.vlgmr.msrb.gmra.mxu1 %vm499_vm1, %v9073_v3 }
 0xea3   :  { %6724 = vmatmul.msk.bf16.vlgmr.msrb.gmra.mxu2 %vm499_vm1, %v9073_v3  ;;  %6726 = vmatmul.msk.bf16.vlgmr.msra.gmra.mxu0 %vm499_vm1, %v9073_v3 }
 0xea4   :  { %5353 = vmatpush.bf16.msrb.mxu1 %v7459_v56  ;;  %5387 = vmatpush.bf16.msra.mxu0 %v7475_v63  ;;  %v7485_v63 = vld [vmem:[%s9441_s2 + $0x148] sm:$0xff] }
 0xea5   :  { %5336 = vmatpush.bf16.msra.mxu3 %v7451_v33  ;;  %5370 = vmatpush.bf16.msrb.mxu2 %v7467_v4  ;;  %v9242_v4 = vperm.slane %v9223_v44, 0 }
 0xea8   :  { %5354 = vmatpush.bf16.msrb.mxu1 %v7458_v60  ;;  %5388 = vmatpush.bf16.msra.mxu0 %v7474_v59  ;;  %v7501_v60 = vld [vmem:[%s9441_s2 + $0x1c8] sm:$0xff] }
 0xea9   :  { %5337 = vmatpush.bf16.msra.mxu3 %v7450_v29  ;;  %5371 = vmatpush.bf16.msrb.mxu2 %v7466_v8  ;;  %v7478_v29 = vld [vmem:[%s9441_s2 + $0x110] sm:$0xff] }
 0xeaa   :  { %v7494_v8 = vld [vmem:[%s9441_s2 + $0x190] sm:$0xff] }
 0xeac   :  { %5355 = vmatpush.bf16.msrb.mxu1 %v7457_v61  ;;  %5389 = vmatpush.bf16.msra.mxu0 %v7473_v6 }
 0xead   :  { %5338 = vmatpush.bf16.msra.mxu3 %v7449_v5  ;;  %5372 = vmatpush.bf16.msrb.mxu2 %v7465_v18 }
 0xeb0   :  { %5356 = vmatpush.bf16.msrb.mxu1 %v7456_v7  ;;  %5390 = vmatpush.bf16.msra.mxu0 %v7472_v39  ;;  %v9248_v7 = vperm.slane %v9223_v44, 2 }
 0xeb1   :  { %5339 = vmatpush.bf16.msra.mxu3 %v7448_v10  ;;  %5373 = vmatpush.bf16.msrb.mxu2 %v7464_v13 }
 0xeb2   :  { %6721 = vmatmul.msk.bf16.gmra.mxu3 %vm499_vm1, %v9084_v52  ;;  %6723 = vmatmul.msk.bf16.gmra.mxu1 %vm499_vm1, %v9084_v52 }
 0xeb3   :  { %6725 = vmatmul.msk.bf16.gmra.mxu2 %vm499_vm1, %v9084_v52  ;;  %6727 = vmatmul.msk.bf16.gmra.mxu0 %vm499_vm1, %v9084_v52 }
 0xeb4   :  { %5357 = vmatpush.bf16.msrb.mxu1 %v7455_v12  ;;  %5391 = vmatpush.bf16.msra.mxu0 %v7471_v45  ;;  %v7484_v12 = vld [vmem:[%s9441_s2 + $0x140] sm:$0xff] }
 0xeb5   :  { %5340 = vmatpush.bf16.msra.mxu3 %v7447_v16  ;;  %5374 = vmatpush.bf16.msrb.mxu2 %v7463_v28  ;;  %v7500_v45 = vld [vmem:[%s9441_s2 + $0x1c0] sm:$0xff]  ;;  %v7477_v16 = vld [vmem:[%s9441_s2 + $0x108] sm:$0xff] }
 0xeb6   :  { %v7493_v28 = vld [vmem:[%s9441_s2 + $0x188] sm:$0xff] }
 0xeb8   :  { %5358 = vmatpush.bf16.msrb.mxu1 %v7454_v15  ;;  %5392 = vmatpush.bf16.msra.mxu0 %v7470_v11 }
 0xeb9   :  { %5341 = vmatpush.bf16.msra.mxu3 %v7446_v23  ;;  %5375 = vmatpush.bf16.msrb.mxu2 %v7462_v17 }
 0xebc   :  { %5359 = vmatpush.bf16.msrb.mxu1 %v7453_v57  ;;  %5393 = vmatpush.bf16.msra.mxu0 %v7469_v19 }
 0xebd   :  { %5342 = vmatpush.bf16.msra.mxu3 %v7445_v62  ;;  %5376 = vmatpush.bf16.msrb.mxu2 %v7461_v27  ;;  %v7539_v62 = vld [vmem:[%s9441_s2 + $0x2f8] sm:$0xff] }
 0xec0   :  { %5394 = vmatpush.bf16.msra.mxu0 %v7468_v58  ;;  %v7523_v58 = vld [vmem:[%s9441_s2 + $0x278] sm:$0xff] }
 0xec1   :  { %5343 = vmatpush.bf16.msra.mxu3 %v7444_v34  ;;  %5377 = vmatpush.bf16.msrb.mxu2 %v7460_v21 }
 0xec2   :  { %6728 = vmatmul.msk.bf16.vlgmr.msrb.gmra.mxu3 %vm499_vm1, %v9073_v3  ;;  %6730 = vmatmul.msk.bf16.vlgmr.msra.gmra.mxu1 %vm499_vm1, %v9073_v3 }
 0xec3   :  { %6732 = vmatmul.msk.bf16.vlgmr.msra.gmra.mxu2 %vm499_vm1, %v9073_v3  ;;  %6734 = vmatmul.msk.bf16.vlgmr.msrb.gmra.mxu0 %vm499_vm1, %v9073_v3  ;;  %v7452_v3 = vld [vmem:[%s9441_s2 + $0x40] sm:$0xff] }
 0xec4   :  { %5360 = vmatpush.bf16.msrb.mxu1 %v7452_v3  ;;  %5455 = vmatpush.bf16.msrb.mxu0 %v7507_v24 }
 0xec5   :  { %5404 = vmatpush.bf16.msrb.mxu3 %v7483_v41  ;;  %5438 = vmatpush.bf16.msra.mxu2 %v7499_v1 }
 0xec8   :  { %5421 = vmatpush.bf16.msra.mxu1 %v7491_v9  ;;  %5456 = vmatpush.bf16.msrb.mxu0 %v7506_v26  ;;  %v7492_v26 = vld [vmem:[%s9441_s2 + $0x180] sm:$0xff] }
 0xec9   :  { %5405 = vmatpush.bf16.msrb.mxu3 %v7482_v31  ;;  %5439 = vmatpush.bf16.msra.mxu2 %v7498_v42  ;;  %v7538_v31 = vld [vmem:[%s9441_s2 + $0x2f0] sm:$0xff] }
 0xecc   :  { %5422 = vmatpush.bf16.msra.mxu1 %v7490_v37  ;;  %5457 = vmatpush.bf16.msrb.mxu0 %v7505_v40  ;;  %v7476_v37 = vld [vmem:[%s9441_s2 + $0x100] sm:$0xff]  ;;  %v7522_v40 = vld [vmem:[%s9441_s2 + $0x270] sm:$0xff] }
 0xecd   :  { %5406 = vmatpush.bf16.msrb.mxu3 %v7481_v2  ;;  %5440 = vmatpush.bf16.msra.mxu2 %v7497_v38  ;;  %v7531_v2 = vld [vmem:[%s9441_s2 + $0x2b8] sm:$0xff] }
 0xed0   :  { %5423 = vmatpush.bf16.msra.mxu1 %v7489_v35  ;;  %5458 = vmatpush.bf16.msrb.mxu0 %v7504_v43  ;;  %v7515_v43 = vld [vmem:[%s9441_s2 + $0x238] sm:$0xff] }
 0xed1   :  { %5407 = vmatpush.bf16.msrb.mxu3 %v7480_v49  ;;  %5441 = vmatpush.bf16.msra.mxu2 %v7496_v36 }
 0xed2   :  { %6729 = vmatmul.msk.bf16.gmra.mxu3 %vm499_vm1, %v9084_v52  ;;  %6731 = vmatmul.msk.bf16.gmra.mxu1 %vm499_vm1, %v9084_v52 }
 0xed3   :  { %6733 = vmatmul.msk.bf16.gmra.mxu2 %vm499_vm1, %v9084_v52  ;;  %6735 = vmatmul.msk.bf16.gmra.mxu0 %vm499_vm1, %v9084_v52  ;;  %v7488_v52 = vld [vmem:[%s9441_s2 + $0x160] sm:$0xff] }
 0xed4   :  { %5424 = vmatpush.bf16.msra.mxu1 %v7488_v52  ;;  %5459 = vmatpush.bf16.msrb.mxu0 %v7503_v32 }
 0xed5   :  { %5408 = vmatpush.bf16.msrb.mxu3 %v7479_v53  ;;  %5442 = vmatpush.bf16.msra.mxu2 %v7495_v22  ;;  %v7520_v22 = vld [vmem:[%s9441_s2 + $0x260] sm:$0xff] }
 0xed8   :  { %5425 = vmatpush.bf16.msra.mxu1 %v7487_v25  ;;  %5460 = vmatpush.bf16.msrb.mxu0 %v7502_v47  ;;  %v7530_v47 = vld [vmem:[%s9441_s2 + $0x2b0] sm:$0xff] }
 0xed9   :  { %5409 = vmatpush.bf16.msrb.mxu3 %v7478_v29  ;;  %5443 = vmatpush.bf16.msra.mxu2 %v7494_v8  ;;  %v7535_v29 = vld [vmem:[%s9441_s2 + $0x2d8] sm:$0xff] }
 0xedc   :  { %5426 = vmatpush.bf16.msra.mxu1 %v7486_v20  ;;  %5461 = vmatpush.bf16.msrb.mxu0 %v7501_v60  ;;  %v7514_v20 = vld [vmem:[%s9441_s2 + $0x230] sm:$0xff]  ;;  %v7529_v60 = vld [vmem:[%s9441_s2 + $0x2a8] sm:$0xff] }
 0xedd   :  { %5410 = vmatpush.bf16.msrb.mxu3 %v7477_v16  ;;  %5444 = vmatpush.bf16.msra.mxu2 %v7493_v28  ;;  %v7511_v16 = vld [vmem:[%s9441_s2 + $0x218] sm:$0xff] }
 0xede   :  { %v7527_v28 = vld [vmem:[%s9441_s2 + $0x298] sm:$0xff] }
 0xedf   :  { %v4224_v30 = vpop.f32.mrf.mxu1 }
 0xee0   :  { %v4260_v46 = vpop.f32.mrf.mxu0  ;;  %v4225_v55 = vadd.f32 %v4224_v30, %v9228_v51  ;;  %5427 = vmatpush.bf16.msra.mxu1 %v7485_v63  ;;  %5462 = vmatpush.bf16.msrb.mxu0 %v7500_v45  ;;  %v7521_v30 = vld [vmem:[%s9441_s2 + $0x268] sm:$0xff]  ;;  %v9284_v45 = vperm.slane %v9223_v44, 5 }
 0xee1   :  { %v4261_v59 = vadd.f32 %v4260_v46, %v9233_v48  ;;  %5411 = vmatpush.bf16.msrb.mxu3 %v7476_v37  ;;  %5445 = vmatpush.bf16.msra.mxu2 %v7492_v26  ;;  %v7537_v46 = vld [vmem:[%s9441_s2 + $0x2e8] sm:$0xff]  ;;  %v9304_v37 = vperm.slane %v9223_v44, 6 }
 0xee2   :  { %v4486_v5 = vmax.f32 %v4225_v55, 0.0  ;;  %v7513_v63 = vld [vmem:[%s9441_s2 + $0x228] sm:$0xff] }
 0xee3   :  { %v4488_v10 = vmax.f32 %v4261_v59, 0.0 }
 0xee4   :  { %5428 = vmatpush.bf16.msra.mxu1 %v7484_v12 }
 0xee5   :  { %v4206_v54 = vpop.f32.mrf.mxu3 }
 0xee6   :  { %v4242_v56 = vpop.f32.mrf.mxu2  ;;  %v4207_v15 = vadd.f32 %v4206_v54, %v9242_v4  ;;  %v7536_v54 = vld [vmem:[%s9441_s2 + $0x2e0] sm:$0xff] }
 0xee7   :  { %v4226_v33 = vpop.f32.mrf.mxu1  ;;  %v4243_v57 = vadd.f32 %v4242_v56, %v9248_v7 }
 0xee8   :  { %v4227_v61 = vadd.f32 %v4226_v33, %v9228_v51  ;;  %v4262_v6 = vpop.f32.mrf.mxu0  ;;  %v4485_v24 = vmax.f32 %v4207_v15, 0.0 }
 0xee9   :  { %v4263_v39 = vadd.f32 %v4262_v6, %v9233_v48  ;;  %v4487_v41 = vmax.f32 %v4243_v57, 0.0 }
 0xeea   :  { %v4502_v18 = vmax.f32 %v4227_v61, 0.0 }
 0xeeb   :  { %v4504_v13 = vmax.f32 %v4263_v39, 0.0 }
 0xeec   :  { %v4534_v11 = vpack.c.bf16 %v4502_v18, %v4486_v5  ;;  %v7512_v5 = vld [vmem:[%s9441_s2 + $0x220] sm:$0xff] }
 0xeed   :  { %v4536_v19 = vpack.c.bf16 %v4504_v13, %v4488_v10  ;;  %v4208_v23 = vpop.f32.mrf.mxu3  ;;  %v7528_v18 = vld [vmem:[%s9441_s2 + $0x2a0] sm:$0xff]  ;;  %v7518_v10 = vld [vmem:[%s9441_s2 + $0x250] sm:$0xff] }
 0xeee   :  { %v4209_v17 = vadd.f32 %v4208_v23, %v9242_v4  ;;  %v4244_v3 = vpop.f32.mrf.mxu2  ;;  %5361 = vmatmul.bf16.vlgmr.msrb.gmra.mxu1 %v4534_v11  ;;  %v7534_v13 = vld [vmem:[%s9441_s2 + $0x2d0] sm:$0xff]  ;;  %v9289_v11 = vperm.slane %v9223_v44, 7 }
 0xeef   :  { %v4245_v27 = vadd.f32 %v4244_v3, %v9248_v7  ;;  %5395 = vmatmul.bf16.vlgmr.msra.gmra.mxu0 %v4536_v19  ;;  %v4229_v9 = vpop.f32.mrf.mxu1  ;;  %5489 = vmatpush.bf16.msrb.mxu1 %v7523_v58  ;;  %v7533_v3 = vld [vmem:[%s9441_s2 + $0x2c8] sm:$0xff] }
 0xef0   :  { %v4501_v34 = vmax.f32 %v4209_v17, 0.0  ;;  %v4265_v21 = vpop.f32.mrf.mxu0  ;;  %5523 = vmatpush.bf16.msra.mxu0 %v7539_v62  ;;  %v4230_v52 = vadd.f32 %v4229_v9, %v9228_v51  ;;  %v7517_v17 = vld [vmem:[%s9441_s2 + $0x248] sm:$0xff] }
 0xef1   :  { %v4503_v1 = vmax.f32 %v4245_v27, 0.0  ;;  %v4266_v38 = vadd.f32 %v4265_v21, %v9233_v48  ;;  %v9298_v27 = vperm.slane %v9223_v44, 4  ;;  %v7526_v21 = vld [vmem:[%s9441_s2 + $0x290] sm:$0xff]  ;;  %v7525_v44 = vld [vmem:[%s9441_s2 + $0x288] sm:$0xff] }
 0xef2   :  { %v4533_v35 = vpack.c.bf16 %v4501_v34, %v4485_v24  ;;  %v4518_v36 = vmax.f32 %v4230_v52, 0.0  ;;  %v7510_v34 = vld [vmem:[%s9441_s2 + $0x210] sm:$0xff] }
 0xef3   :  { %v4535_v42 = vpack.c.bf16 %v4503_v1, %v4487_v41  ;;  %5490 = vmatpush.bf16.msrb.mxu1 %v7522_v40  ;;  %v4520_v53 = vmax.f32 %v4266_v38, 0.0  ;;  %v7532_v40 = vld [vmem:[%s9441_s2 + $0x2c0] sm:$0xff] }
 0xef4   :  { %5344 = vmatmul.bf16.vlgmr.msra.gmra.mxu3 %v4533_v35  ;;  %5524 = vmatpush.bf16.msra.mxu0 %v7538_v31  ;;  %v4550_v56 = vpack.c.bf16 %v4518_v36, %v4518_v36  ;;  %v7516_v35 = vld [vmem:[%s9441_s2 + $0x240] sm:$0xff]  ;;  %v7571_v36 = vld [vmem:[%s9441_s2 + $0x3f8] sm:$0xff] }
 0xef5   :  { %5378 = vmatmul.bf16.vlgmr.msrb.gmra.mxu2 %v4535_v42  ;;  %v4211_v25 = vpop.f32.mrf.mxu3  ;;  %5472 = vmatpush.bf16.msra.mxu3 %v7515_v43  ;;  %v4552_v59 = vpack.c.bf16 %v4520_v53, %v4520_v53 }
 0xef6   :  { %v4247_v32 = vpop.f32.mrf.mxu2  ;;  %5506 = vmatpush.bf16.msrb.mxu2 %v7531_v2  ;;  %v4212_v48 = vadd.f32 %v4211_v25, %v9242_v4  ;;  %v7519_v4 = vld [vmem:[%s9441_s2 + $0x258] sm:$0xff]  ;;  %v7509_v2 = vld [vmem:[%s9441_s2 + $0x208] sm:$0xff] }
 0xef7   :  { %v4231_v49 = vpop.f32.mrf.mxu1  ;;  %5491 = vmatpush.bf16.msrb.mxu1 %v7521_v30  ;;  %v4248_v55 = vadd.f32 %v4247_v32, %v9248_v7 }
 0xef8   :  { %v4267_v51 = vpop.f32.mrf.mxu0  ;;  %5525 = vmatpush.bf16.msra.mxu0 %v7537_v46  ;;  %v4517_v61 = vmax.f32 %v4212_v48, 0.0  ;;  %v7555_v49 = vld [vmem:[%s9441_s2 + $0x378] sm:$0xff] }
 0xef9   :  { %5473 = vmatpush.bf16.msra.mxu3 %v7514_v20  ;;  %v4519_v8 = vmax.f32 %v4248_v55, 0.0 }
 0xefa   :  { %5507 = vmatpush.bf16.msrb.mxu2 %v7530_v47  ;;  %v4549_v12 = vpack.c.bf16 %v4517_v61, %v4517_v61 }
 0xefb   :  { %5492 = vmatpush.bf16.msrb.mxu1 %v7520_v22  ;;  %v4551_v15 = vpack.c.bf16 %v4519_v8, %v4519_v8  ;;  %v7508_v22 = vld [vmem:[%s9441_s2 + $0x200] sm:$0xff] }
 0xefc   :  { %5526 = vmatpush.bf16.msra.mxu0 %v7536_v54  ;;  %v7524_v54 = vld [vmem:[%s9441_s2 + $0x280] sm:$0xff] }
 0xefd   :  { %v4213_v33 = vpop.f32.mrf.mxu3  ;;  %5474 = vmatpush.bf16.msra.mxu3 %v7513_v63 }
 0xefe   :  { %v4249_v6 = vpop.f32.mrf.mxu2  ;;  %5366 = vmatmul.bf16.gmra.mxu1 %v4550_v56  ;;  %5508 = vmatpush.bf16.msrb.mxu2 %v7529_v60  ;;  %v7554_v60 = vld [vmem:[%s9441_s2 + $0x370] sm:$0xff] }
 0xeff   :  { %5400 = vmatmul.bf16.gmra.mxu0 %v4552_v59  ;;  %v4296_v7 = vpop.f32.mrf.mxu1  ;;  %5493 = vmatpush.bf16.msrb.mxu1 %v7519_v4  ;;  %v7570_v59 = vld [vmem:[%s9441_s2 + $0x3f0] sm:$0xff]  ;;  %v7547_v6 = vld [vmem:[%s9441_s2 + $0x338] sm:$0xff] }
 0xf00   :  { %v4332_v39 = vpop.f32.mrf.mxu0  ;;  %5527 = vmatpush.bf16.msra.mxu0 %v7535_v29  ;;  %v4297_v19 = vadd.f32 %v4296_v7, %v9284_v45  ;;  %v7563_v4 = vld [vmem:[%s9441_s2 + $0x3b8] sm:$0xff] }
 0xf01   :  { %5475 = vmatpush.bf16.msra.mxu3 %v7512_v5  ;;  %v4333_v58 = vadd.f32 %v4332_v39, %v9289_v11  ;;  %v7553_v39 = vld [vmem:[%s9441_s2 + $0x368] sm:$0xff] }
 0xf02   :  { %5509 = vmatpush.bf16.msrb.mxu2 %v7528_v18  ;;  %v4490_v41 = vmax.f32 %v4297_v19, 0.0  ;;  %v7569_v5 = vld [vmem:[%s9441_s2 + $0x3e8] sm:$0xff] }
 0xf03   :  { %5494 = vmatpush.bf16.msrb.mxu1 %v7518_v10  ;;  %v4492_v31 = vmax.f32 %v4333_v58, 0.0  ;;  %v7546_v10 = vld [vmem:[%s9441_s2 + $0x330] sm:$0xff] }
 0xf04   :  { %5349 = vmatmul.bf16.gmra.mxu3 %v4549_v12  ;;  %5528 = vmatpush.bf16.msra.mxu0 %v7534_v13  ;;  %v7562_v13 = vld [vmem:[%s9441_s2 + $0x3b0] sm:$0xff] }
 0xf05   :  { %5383 = vmatmul.bf16.gmra.mxu2 %v4551_v15  ;;  %v4278_v57 = vpop.f32.mrf.mxu3  ;;  %5476 = vmatpush.bf16.msra.mxu3 %v7511_v16  ;;  %v7552_v16 = vld [vmem:[%s9441_s2 + $0x360] sm:$0xff] }
 0xf06   :  { %v4314_v23 = vpop.f32.mrf.mxu2  ;;  %5510 = vmatpush.bf16.msrb.mxu2 %v7527_v28  ;;  %v4279_v52 = vadd.f32 %v4278_v57, %v9298_v27  ;;  %v7568_v28 = vld [vmem:[%s9441_s2 + $0x3e0] sm:$0xff] }
 0xf07   :  { %v4298_v62 = vpop.f32.mrf.mxu1  ;;  %5495 = vmatpush.bf16.msrb.mxu1 %v7517_v17  ;;  %v4315_v38 = vadd.f32 %v4314_v23, %v9304_v37  ;;  %v7545_v23 = vld [vmem:[%s9441_s2 + $0x328] sm:$0xff] }
 0xf08   :  { %v4299_v9 = vadd.f32 %v4298_v62, %v9284_v45  ;;  %v4334_v24 = vpop.f32.mrf.mxu0  ;;  %5529 = vmatpush.bf16.msra.mxu0 %v7533_v3  ;;  %v4489_v47 = vmax.f32 %v4279_v52, 0.0  ;;  %v7561_v17 = vld [vmem:[%s9441_s2 + $0x3a8] sm:$0xff] }
 0xf09   :  { %v4335_v26 = vadd.f32 %v4334_v24, %v9289_v11  ;;  %5477 = vmatpush.bf16.msra.mxu3 %v7510_v34  ;;  %v4491_v55 = vmax.f32 %v4315_v38, 0.0  ;;  %v7567_v24 = vld [vmem:[%s9441_s2 + $0x3d8] sm:$0xff] }
 0xf0a   :  { %v4506_v1 = vmax.f32 %v4299_v9, 0.0  ;;  %5511 = vmatpush.bf16.msrb.mxu2 %v7526_v21  ;;  %v7551_v9 = vld [vmem:[%s9441_s2 + $0x358] sm:$0xff]  ;;  %v9338_v21 = vld [vmem:[%s9442_s7 + $0x8] sm:$0xff] }
 0xf0b   :  { %v4508_v42 = vmax.f32 %v4335_v26, 0.0  ;;  %5496 = vmatpush.bf16.msrb.mxu1 %v7516_v35 }
 0xf0c   :  { %v4538_v43 = vpack.c.bf16 %v4506_v1, %v4490_v41  ;;  %5530 = vmatpush.bf16.msra.mxu0 %v7532_v40  ;;  %v7544_v41 = vld [vmem:[%s9441_s2 + $0x320] sm:$0xff]  ;;  %v9343_v40 = vperm.slane %v9338_v21, 1 }
 0xf0d   :  { %v4540_v25 = vpack.c.bf16 %v4508_v42, %v4492_v31  ;;  %v4280_v32 = vpop.f32.mrf.mxu3  ;;  %5478 = vmatpush.bf16.msra.mxu3 %v7509_v2  ;;  %v7560_v1 = vld [vmem:[%s9441_s2 + $0x3a0] sm:$0xff]  ;;  %v7550_v31 = vld [vmem:[%s9441_s2 + $0x350] sm:$0xff]  ;;  %v7543_v2 = vld [vmem:[%s9441_s2 + $0x318] sm:$0xff] }
 0xf0e   :  { %v4281_v30 = vadd.f32 %v4280_v32, %v9298_v27  ;;  %v4316_v46 = vpop.f32.mrf.mxu2  ;;  %5429 = vmatmul.bf16.vlgmr.msra.gmra.mxu1 %v4538_v43  ;;  %5512 = vmatpush.bf16.msrb.mxu2 %v7525_v44  ;;  %v7566_v42 = vld [vmem:[%s9441_s2 + $0x3d0] sm:$0xff]  ;;  %v9348_v43 = vperm.slane %v9338_v21, 3  ;;  %v7559_v44 = vld [vmem:[%s9441_s2 + $0x398] sm:$0xff] }
 0xf0f   :  { %v4317_v51 = vadd.f32 %v4316_v46, %v9304_v37  ;;  %5463 = vmatmul.bf16.vlgmr.msrb.gmra.mxu0 %v4540_v25  ;;  %v4301_v20 = vpop.f32.mrf.mxu1  ;;  %5557 = vmatpush.bf16.msra.mxu1 %v7555_v49  ;;  %v7565_v46 = vld [vmem:[%s9441_s2 + $0x3c8] sm:$0xff] }
 0xf10   :  { %v4505_v53 = vmax.f32 %v4281_v30, 0.0  ;;  %v4337_v48 = vpop.f32.mrf.mxu0  ;;  %5591 = vmatpush.bf16.msrb.mxu0 %v7571_v36  ;;  %v4302_v61 = vadd.f32 %v4301_v20, %v9284_v45  ;;  %v7549_v30 = vld [vmem:[%s9441_s2 + $0x348] sm:$0xff] }
 0xf11   :  { %v4507_v56 = vmax.f32 %v4317_v51, 0.0  ;;  %5479 = vmatpush.bf16.msra.mxu3 %v7508_v22  ;;  %v4338_v29 = vadd.f32 %v4337_v48, %v9289_v11  ;;  %v4007_v51 = vperm.slane %v9338_v21, 0  ;;  %v7558_v48 = vld [vmem:[%s9441_s2 + $0x390] sm:$0xff]  ;;  %v4009_v22 = vperm.slane %v9338_v21, 2 }
 0xf12   :  { %v4537_v63 = vpack.c.bf16 %v4505_v53, %v4489_v47  ;;  %5513 = vmatpush.bf16.msrb.mxu2 %v7524_v54  ;;  %v4522_v12 = vmax.f32 %v4302_v61, 0.0  ;;  %v7542_v53 = vld [vmem:[%s9441_s2 + $0x310] sm:$0xff] }
 0xf13   :  { %v4539_v33 = vpack.c.bf16 %v4507_v56, %v4491_v55  ;;  %5558 = vmatpush.bf16.msra.mxu1 %v7554_v60  ;;  %v4524_v15 = vmax.f32 %v4338_v29, 0.0  ;;  %v7564_v60 = vld [vmem:[%s9441_s2 + $0x3c0] sm:$0xff]  ;;  %v7557_v29 = vld [vmem:[%s9441_s2 + $0x388] sm:$0xff] }
 0xf14   :  { %5412 = vmatmul.bf16.vlgmr.msrb.gmra.mxu3 %v4537_v63  ;;  %5592 = vmatpush.bf16.msrb.mxu0 %v7570_v59  ;;  %v4554_v19 = vpack.c.bf16 %v4522_v12, %v4522_v12  ;;  %v7548_v63 = vld [vmem:[%s9441_s2 + $0x340] sm:$0xff] }
 0xf15   :  { %5446 = vmatmul.bf16.vlgmr.msra.gmra.mxu2 %v4539_v33  ;;  %v4283_v8 = vpop.f32.mrf.mxu3  ;;  %5540 = vmatpush.bf16.msrb.mxu3 %v7547_v6  ;;  %v4556_v3 = vpack.c.bf16 %v4524_v15, %v4524_v15 }
 0xf16   :  { %v4319_v7 = vpop.f32.mrf.mxu2  ;;  %5574 = vmatpush.bf16.msra.mxu2 %v7563_v4  ;;  %v4284_v11 = vadd.f32 %v4283_v8, %v9298_v27  ;;  %v7541_v4 = vld [vmem:[%s9441_s2 + $0x308] sm:$0xff] }
 0xf17   :  { %v4303_v18 = vpop.f32.mrf.mxu1  ;;  %5559 = vmatpush.bf16.msra.mxu1 %v7553_v39  ;;  %v4320_v57 = vadd.f32 %v4319_v7, %v9304_v37 }
 0xf18   :  { %v4339_v45 = vpop.f32.mrf.mxu0  ;;  %5593 = vmatpush.bf16.msrb.mxu0 %v7569_v5  ;;  %v4521_v62 = vmax.f32 %v4284_v11, 0.0  ;;  %v7540_v11 = vld [vmem:[%s9441_s2 + $0x300] sm:$0xff] }
 0xf19   :  { %5541 = vmatpush.bf16.msrb.mxu3 %v7546_v10  ;;  %v4523_v34 = vmax.f32 %v4320_v57, 0.0 }
 0xf1a   :  { %5575 = vmatpush.bf16.msra.mxu2 %v7562_v13  ;;  %v4553_v35 = vpack.c.bf16 %v4521_v62, %v4521_v62 }
 0xf1b   :  { %5560 = vmatpush.bf16.msra.mxu1 %v7552_v16  ;;  %v4555_v52 = vpack.c.bf16 %v4523_v34, %v4523_v34  ;;  %v7556_v16 = vld [vmem:[%s9441_s2 + $0x380] sm:$0xff] }
 0xf1c   :  { %5594 = vmatpush.bf16.msrb.mxu0 %v7568_v28 }
 0xf1d   :  { %v4285_v58 = vpop.f32.mrf.mxu3  ;;  %5542 = vmatpush.bf16.msrb.mxu3 %v7545_v23 }
 0xf1e   :  { %v4321_v27 = vpop.f32.mrf.mxu2  ;;  %5434 = vmatmul.bf16.gmra.mxu1 %v4554_v19  ;;  %5576 = vmatpush.bf16.msra.mxu2 %v7561_v17 }
 0xf1f   :  { %5468 = vmatmul.bf16.gmra.mxu0 %v4556_v3  ;;  %v4368_v37 = vpop.f32.mrf.mxu1  ;;  %5561 = vmatpush.bf16.msra.mxu1 %v7551_v9 }
 0xf20   :  { %v4404_v26 = vpop.f32.mrf.mxu0  ;;  %5595 = vmatpush.bf16.msrb.mxu0 %v7567_v24  ;;  %v4369_v25 = vadd.f32 %v4368_v37, %v9343_v40 }
 0xf21   :  { %5543 = vmatpush.bf16.msrb.mxu3 %v7544_v41  ;;  %v4405_v49 = vadd.f32 %v4404_v26, %v9348_v43 }
 0xf22   :  { %5577 = vmatpush.bf16.msra.mxu2 %v7560_v1  ;;  %v4494_v55 = vmax.f32 %v4369_v25, 0.0  ;;  %v4014_v25 = vperm.slane %v9338_v21, 7 }
 0xf23   :  { %5562 = vmatpush.bf16.msra.mxu1 %v7550_v31  ;;  %v4496_v59 = vmax.f32 %v4405_v49, 0.0 }
 0xf24   :  { %5417 = vmatmul.bf16.gmra.mxu3 %v4553_v35  ;;  %5596 = vmatpush.bf16.msrb.mxu0 %v7566_v42 }
 0xf25   :  { %5451 = vmatmul.bf16.gmra.mxu2 %v4555_v52  ;;  %v4350_v38 = vpop.f32.mrf.mxu3  ;;  %5544 = vmatpush.bf16.msrb.mxu3 %v7543_v2 }
 0xf26   :  { %v4386_v32 = vpop.f32.mrf.mxu2  ;;  %5578 = vmatpush.bf16.msra.mxu2 %v7559_v44  ;;  %v4351_v61 = vadd.f32 %v4350_v38, %v4007_v51  ;;  %v4012_v44 = vperm.slane %v9338_v21, 5 }
 0xf27   :  { %v4370_v36 = vpop.f32.mrf.mxu1  ;;  %5563 = vmatpush.bf16.msra.mxu1 %v7549_v30  ;;  %v4387_v8 = vadd.f32 %v4386_v32, %v4009_v22 }
 0xf28   :  { %v4371_v20 = vadd.f32 %v4370_v36, %v9343_v40  ;;  %v4406_v47 = vpop.f32.mrf.mxu0  ;;  %5597 = vmatpush.bf16.msrb.mxu0 %v7565_v46  ;;  %v4493_v10 = vmax.f32 %v4351_v61, 0.0 }
 0xf29   :  { %v4407_v54 = vadd.f32 %v4406_v47, %v9348_v43  ;;  %5545 = vmatpush.bf16.msrb.mxu3 %v7542_v53  ;;  %v4495_v28 = vmax.f32 %v4387_v8, 0.0  ;;  %v4013_v53 = vperm.slane %v9338_v21, 6 }
 0xf2a   :  { %v4510_v56 = vmax.f32 %v4371_v20, 0.0  ;;  %5579 = vmatpush.bf16.msra.mxu2 %v7558_v48 }
 0xf2b   :  { %v4512_v33 = vmax.f32 %v4407_v54, 0.0  ;;  %5564 = vmatpush.bf16.msra.mxu1 %v7548_v63 }
 0xf2c   :  { %v4542_v6 = vpack.c.bf16 %v4510_v56, %v4494_v55  ;;  %5598 = vmatpush.bf16.msrb.mxu0 %v7564_v60 }
 0xf2d   :  { %v4544_v7 = vpack.c.bf16 %v4512_v33, %v4496_v59  ;;  %v4352_v39 = vpop.f32.mrf.mxu3  ;;  %5546 = vmatpush.bf16.msrb.mxu3 %v7541_v4 }
 0xf2e   :  { %v4353_v5 = vadd.f32 %v4352_v39, %v4007_v51  ;;  %v4388_v18 = vpop.f32.mrf.mxu2  ;;  %5497 = vmatmul.bf16.vlgmr.msrb.gmra.mxu1 %v4542_v6  ;;  %5580 = vmatpush.bf16.msra.mxu2 %v7557_v29 }
 0xf2f   :  { %v4389_v12 = vadd.f32 %v4388_v18, %v4009_v22  ;;  %5531 = vmatmul.bf16.vlgmr.msra.gmra.mxu0 %v4544_v7  ;;  %v4373_v45 = vpop.f32.mrf.mxu1 }
 0xf30   :  { %v4509_v13 = vmax.f32 %v4353_v5, 0.0  ;;  %v4409_v15 = vpop.f32.mrf.mxu0  ;;  %v4374_v17 = vadd.f32 %v4373_v45, %v9343_v40 }
 0xf31   :  { %v4511_v57 = vmax.f32 %v4389_v12, 0.0  ;;  %5547 = vmatpush.bf16.msrb.mxu3 %v7540_v11  ;;  %v4410_v3 = vadd.f32 %v4409_v15, %v9348_v43 }
 0xf32   :  { %v4541_v19 = vpack.c.bf16 %v4509_v13, %v4493_v10  ;;  %5581 = vmatpush.bf16.msra.mxu2 %v7556_v16  ;;  %v4526_v9 = vmax.f32 %v4374_v17, 0.0 }
 0xf33   :  { %v4543_v23 = vpack.c.bf16 %v4511_v57, %v4495_v28  ;;  %v4528_v34 = vmax.f32 %v4410_v3, 0.0 }
 0xf34   :  { %5480 = vmatmul.bf16.vlgmr.msra.gmra.mxu3 %v4541_v19  ;;  %v4558_v41 = vpack.c.bf16 %v4526_v9, %v4526_v9 }
 0xf35   :  { %5514 = vmatmul.bf16.vlgmr.msrb.gmra.mxu2 %v4543_v23  ;;  %v4355_v58 = vpop.f32.mrf.mxu3  ;;  %v4560_v1 = vpack.c.bf16 %v4528_v34, %v4528_v34 }
 0xf36   :  { %v4391_v62 = vpop.f32.mrf.mxu2  ;;  %v4356_v37 = vadd.f32 %v4355_v58, %v4007_v51  ;;  %v4011_v51 = vperm.slane %v9338_v21, 4 }
 0xf37   :  { %v4375_v27 = vpop.f32.mrf.mxu1  ;;  %v4392_v26 = vadd.f32 %v4391_v62, %v4009_v22 }
 0xf38   :  { %v4411_v24 = vpop.f32.mrf.mxu0  ;;  %v4525_v31 = vmax.f32 %v4356_v37, 0.0 }
 0xf39   :  { %v4527_v52 = vmax.f32 %v4392_v26, 0.0 }
 0xf3a   :  { %v4557_v43 = vpack.c.bf16 %v4525_v31, %v4525_v31  ;;  %v7675_v31 = vld [vmem:[%s9443_s10] ss:$0 sm:$0xff] }
 0xf3b   :  { %v4559_v38 = vpack.c.bf16 %v4527_v52, %v4527_v52 }
 0xf3d   :  { %v4357_v35 = vpop.f32.mrf.mxu3 }
 0xf3e   :  { %v4393_v42 = vpop.f32.mrf.mxu2  ;;  %5502 = vmatmul.bf16.gmra.mxu1 %v4558_v41 }
 0xf3f   :  { %5536 = vmatmul.bf16.gmra.mxu0 %v4560_v1  ;;  %v4440_v40 = vpop.f32.mrf.mxu1 }
 0xf40   :  { %v4476_v2 = vpop.f32.mrf.mxu0  ;;  %v4441_v30 = vadd.f32 %v4440_v40, %v4012_v44 }
 0xf41   :  { %v4477_v49 = vadd.f32 %v4476_v2, %v4014_v25 }
 0xf42   :  { %v4498_v22 = vmax.f32 %v4441_v30, 0.0 }
 0xf43   :  { %v4500_v55 = vmax.f32 %v4477_v49, 0.0 }
 0xf44   :  { %5485 = vmatmul.bf16.gmra.mxu3 %v4557_v43 }
 0xf45   :  { %5519 = vmatmul.bf16.gmra.mxu2 %v4559_v38  ;;  %v4422_v32 = vpop.f32.mrf.mxu3 }
 0xf46   :  { %v4458_v46 = vpop.f32.mrf.mxu2  ;;  %v4423_v63 = vadd.f32 %v4422_v32, %v4011_v51 }
 0xf47   :  { %v4442_v36 = vpop.f32.mrf.mxu1  ;;  %v4459_v59 = vadd.f32 %v4458_v46, %v4013_v53 }
 0xf48   :  { %v4443_v20 = vadd.f32 %v4442_v36, %v4012_v44  ;;  %v4478_v47 = vpop.f32.mrf.mxu0  ;;  %v4497_v7 = vmax.f32 %v4423_v63, 0.0 }
 0xf49   :  { %v4479_v48 = vadd.f32 %v4478_v47, %v4014_v25  ;;  %v4499_v21 = vmax.f32 %v4459_v59, 0.0 }
 0xf4a   :  { %v4514_v54 = vmax.f32 %v4443_v20, 0.0 }
 0xf4b   :  { %v4516_v56 = vmax.f32 %v4479_v48, 0.0 }
 0xf4c   :  { %v4546_v60 = vpack.c.bf16 %v4514_v54, %v4498_v22 }
 0xf4d   :  { %v4548_v33 = vpack.c.bf16 %v4516_v56, %v4500_v55  ;;  %v4424_v61 = vpop.f32.mrf.mxu3 }
 0xf4e   :  { %v4425_v6 = vadd.f32 %v4424_v61, %v4011_v51  ;;  %v4460_v4 = vpop.f32.mrf.mxu2  ;;  %5565 = vmatmul.bf16.vlgmr.msra.gmra.mxu1 %v4546_v60 }
 0xf4f   :  { %v4461_v29 = vadd.f32 %v4460_v4, %v4013_v53  ;;  %5599 = vmatmul.bf16.vlgmr.msrb.gmra.mxu0 %v4548_v33  ;;  %v4445_v8 = vpop.f32.mrf.mxu1 }
 0xf50   :  { %v4513_v39 = vmax.f32 %v4425_v6, 0.0  ;;  %v4481_v5 = vpop.f32.mrf.mxu0  ;;  %v4446_v10 = vadd.f32 %v4445_v8, %v4012_v44 }
 0xf51   :  { %v4515_v18 = vmax.f32 %v4461_v29, 0.0  ;;  %v4482_v13 = vadd.f32 %v4481_v5, %v4014_v25 }
 0xf52   :  { %v4545_v12 = vpack.c.bf16 %v4513_v39, %v4497_v7  ;;  %v4530_v28 = vmax.f32 %v4446_v10, 0.0 }
 0xf53   :  { %v4547_v45 = vpack.c.bf16 %v4515_v18, %v4499_v21  ;;  %v4532_v19 = vmax.f32 %v4482_v13, 0.0 }
 0xf54   :  { %5548 = vmatmul.bf16.vlgmr.msrb.gmra.mxu3 %v4545_v12  ;;  %v4562_v3 = vpack.c.bf16 %v4530_v28, %v4530_v28 }
 0xf55   :  { %5582 = vmatmul.bf16.vlgmr.msra.gmra.mxu2 %v4547_v45  ;;  %v4427_v15 = vpop.f32.mrf.mxu3  ;;  %v4564_v58 = vpack.c.bf16 %v4532_v19, %v4532_v19 }
 0xf56   :  { %v4463_v11 = vpop.f32.mrf.mxu2  ;;  %v4428_v23 = vadd.f32 %v4427_v15, %v4011_v51 }
 0xf57   :  { %v4447_v16 = vpop.f32.mrf.mxu1  ;;  %v4464_v17 = vadd.f32 %v4463_v11, %v4013_v53 }
 0xf58   :  { %v4483_v57 = vpop.f32.mrf.mxu0  ;;  %v4529_v27 = vmax.f32 %v4428_v23, 0.0 }
 0xf59   :  { %v4531_v24 = vmax.f32 %v4464_v17, 0.0 }
 0xf5a   :  { %v4561_v34 = vpack.c.bf16 %v4529_v27, %v4529_v27 }
 0xf5b   :  { %v4563_v37 = vpack.c.bf16 %v4531_v24, %v4531_v24 }
 0xf5d   :  { %v4429_v62 = vpop.f32.mrf.mxu3 }
 0xf5e   :  { %v4465_v9 = vpop.f32.mrf.mxu2  ;;  %5570 = vmatmul.bf16.gmra.mxu1 %v4562_v3 }
 0xf5f   :  { %5604 = vmatmul.bf16.gmra.mxu0 %v4564_v58 }
 0xf64   :  { %5553 = vmatmul.bf16.gmra.mxu3 %v4561_v34 }
 0xf65   :  { %5587 = vmatmul.bf16.gmra.mxu2 %v4563_v37 }
 0xf6b   :  { %v5362_v26 = vpop.f32.mrf.mxu1 }
 0xf6c   :  { %v5396_v41 = vpop.f32.mrf.mxu0 }
 0xf73   :  { %v5364_v1 = vpop.f32.mrf.mxu1 }
 0xf74   :  { %v5398_v35 = vpop.f32.mrf.mxu0 }
 0xf77   :  { %v5345_v42 = vpop.f32.mrf.mxu3 }
 0xf78   :  { %v5346_v52 = vadd.f32 %v7675_v31, %v5345_v42  ;;  %v5379_v40 = vpop.f32.mrf.mxu2 }
 0xf7a   :  { %v5363_v2 = vadd.f32 %v5362_v26, %v5346_v52 }
 0xf7b   :  { %v5367_v43 = vpop.f32.mrf.mxu1 }
 0xf7c   :  { %v5380_v44 = vadd.f32 %v5379_v40, %v5363_v2  ;;  %v5401_v38 = vpop.f32.mrf.mxu0 }
 0xf7e   :  { %v5397_v25 = vadd.f32 %v5396_v41, %v5380_v44 }
 0xf7f   :  { %v5347_v32 = vpop.f32.mrf.mxu3 }
 0xf80   :  { %v5348_v30 = vadd.f32 %v7675_v31, %v5347_v32  ;;  %v5381_v46 = vpop.f32.mrf.mxu2 }
 0xf82   :  { %v5365_v49 = vadd.f32 %v5364_v1, %v5348_v30 }
 0xf83   :  { %v5368_v36 = vpop.f32.mrf.mxu1 }
 0xf84   :  { %v5382_v51 = vadd.f32 %v5381_v46, %v5365_v49  ;;  %v5402_v20 = vpop.f32.mrf.mxu0 }
 0xf86   :  { %v5399_v47 = vadd.f32 %v5398_v35, %v5382_v51 }
 0xf87   :  { %v5350_v53 = vpop.f32.mrf.mxu3 }
 0xf88   :  { %v5384_v48 = vpop.f32.mrf.mxu2 }
 0xf8b   :  { %v5430_v22 = vpop.f32.mrf.mxu1 }
 0xf8c   :  { %v5464_v54 = vpop.f32.mrf.mxu0 }
 0xf8f   :  { %v5351_v55 = vpop.f32.mrf.mxu3 }
 0xf90   :  { %v5385_v56 = vpop.f32.mrf.mxu2 }
 0xf93   :  { %v5432_v63 = vpop.f32.mrf.mxu1 }
 0xf94   :  { %v5466_v60 = vpop.f32.mrf.mxu0 }
 0xf97   :  { %v5413_v59 = vpop.f32.mrf.mxu3 }
 0xf98   :  { %v5414_v33 = vadd.f32 %v5413_v59, %v5397_v25  ;;  %v5447_v61 = vpop.f32.mrf.mxu2 }
 0xf9a   :  { %v5431_v6 = vadd.f32 %v5430_v22, %v5414_v33 }
 0xf9b   :  { %v5435_v4 = vpop.f32.mrf.mxu1 }
 0xf9c   :  { %v5448_v29 = vadd.f32 %v5447_v61, %v5431_v6  ;;  %v5469_v8 = vpop.f32.mrf.mxu0 }
 0xf9e   :  { %v5465_v7 = vadd.f32 %v5464_v54, %v5448_v29 }
 0xf9f   :  { %v5415_v39 = vpop.f32.mrf.mxu3 }
 0xfa0   :  { %v5416_v5 = vadd.f32 %v5415_v39, %v5399_v47  ;;  %v5449_v21 = vpop.f32.mrf.mxu2 }
 0xfa2   :  { %v5433_v18 = vadd.f32 %v5432_v63, %v5416_v5 }
 0xfa3   :  { %v5436_v12 = vpop.f32.mrf.mxu1 }
 0xfa4   :  { %v5450_v45 = vadd.f32 %v5449_v21, %v5433_v18  ;;  %v5470_v10 = vpop.f32.mrf.mxu0 }
 0xfa6   :  { %v5467_v13 = vadd.f32 %v5466_v60, %v5450_v45 }
 0xfa7   :  { %v5418_v15 = vpop.f32.mrf.mxu3 }
 0xfa8   :  { %v5452_v11 = vpop.f32.mrf.mxu2 }
 0xfab   :  { %v5498_v16 = vpop.f32.mrf.mxu1 }
 0xfac   :  { %v5532_v28 = vpop.f32.mrf.mxu0 }
 0xfaf   :  { %v5419_v57 = vpop.f32.mrf.mxu3 }
 0xfb0   :  { %v5453_v19 = vpop.f32.mrf.mxu2  ;;  %v5667_v57 = vld [vmem:[%s9445_s0 + $0x18] sm:$0xff] }
 0xfb1   :  { %5719 = vmatpush.msrb.mxu1 %v5667_v57 }
 0xfb3   :  { %v5500_v23 = vpop.f32.mrf.mxu1 }
 0xfb4   :  { %v5534_v17 = vpop.f32.mrf.mxu0 }
 0xfb7   :  { %v5481_v3 = vpop.f32.mrf.mxu3 }
 0xfb8   :  { %v5515_v58 = vpop.f32.mrf.mxu2  ;;  %v5482_v1 = vadd.f32 %v5481_v3, %v5465_v7  ;;  %v5666_v3 = vld [vmem:[%s9445_s0 + $0x10] sm:$0xff] }
 0xfb9   :  { %5720 = vmatpush.msrb.mxu1 %v5666_v3 }
 0xfba   :  { %v5499_v42 = vadd.f32 %v5498_v16, %v5482_v1 }
 0xfbb   :  { %v5503_v62 = vpop.f32.mrf.mxu1 }
 0xfbc   :  { %v5537_v27 = vpop.f32.mrf.mxu0  ;;  %v5516_v2 = vadd.f32 %v5515_v58, %v5499_v42  ;;  %v5665_v58 = vld [vmem:[%s9445_s0 + $0x8] sm:$0xff] }
 0xfbd   :  { %v5664_v27 = vld [vmem:[%s9445_s0] sm:$0xff]  ;;  %5721 = vmatpush.msrb.mxu1 %v5665_v58 }
 0xfbe   :  { %v5533_v32 = vadd.f32 %v5532_v28, %v5516_v2  ;;  %v5668_v28 = vld [vmem:[%s9444_s11] sm:$0xf] }
 0xfbf   :  { %v5483_v9 = vpop.f32.mrf.mxu3  ;;  %7248 = vmatpush.msk.msra.mxu3 %vm5680_vm14, %v5668_v28  ;;  %5722 = vmatpush.msrb.mxu1 %v5664_v27 }
 0xfc0   :  { %v5517_v24 = vpop.f32.mrf.mxu2  ;;  %v5484_v43 = vadd.f32 %v5483_v9, %v5467_v13  ;;  %v5671_v9 = vld [vmem:[%s8047_s27 + $0x8] sm:$0xff] }
 0xfc1   :  { %5752 = vmatpush.msrb.mxu2 %v5671_v9 }
 0xfc2   :  { %v5501_v25 = vadd.f32 %v5500_v23, %v5484_v43  ;;  %v5675_v23 = vld [vmem:[%s9446_s5] sm:$0x3] }
 0xfc3   :  { %v5504_v34 = vpop.f32.mrf.mxu1  ;;  %7249 = vmatmul.msk.f32.vlgmr.msra.gmra.mxu3 %vm5676_vm15, %v5675_v23 }
 0xfc4   :  { %v5538_v37 = vpop.f32.mrf.mxu0  ;;  %v5518_v36 = vadd.f32 %v5517_v24, %v5501_v25 }
 0xfc6   :  { %v5535_v22 = vadd.f32 %v5534_v17, %v5518_v36  ;;  %v7677_v36 = vld [vmem:[%s9448_s21] ss:$0 sm:$0xff] }
 0xfc7   :  { %v5486_v26 = vpop.f32.mrf.mxu3 }
 0xfc8   :  { %v5520_v41 = vpop.f32.mrf.mxu2 }
 0xfcb   :  { %v5566_v35 = vpop.f32.mrf.mxu1 }
 0xfcc   :  { %v5600_v31 = vpop.f32.mrf.mxu0 }
 0xfcf   :  { %v5487_v52 = vpop.f32.mrf.mxu3 }
 0xfd0   :  { %v5521_v40 = vpop.f32.mrf.mxu2 }
 0xfd3   :  { %v5568_v44 = vpop.f32.mrf.mxu1 }
 0xfd4   :  { %v5602_v38 = vpop.f32.mrf.mxu0 }
 0xfd7   :  { %v5549_v30 = vpop.f32.mrf.mxu3 }
 0xfd8   :  { %v5550_v46 = vadd.f32 %v5549_v30, %v5533_v32  ;;  %v5583_v49 = vpop.f32.mrf.mxu2 }
 0xfda   :  { %v5567_v51 = vadd.f32 %v5566_v35, %v5550_v46 }
 0xfdb   :  { %v5571_v20 = vpop.f32.mrf.mxu1 }
 0xfdc   :  { %v5584_v47 = vadd.f32 %v5583_v49, %v5567_v51  ;;  %v5605_v53 = vpop.f32.mrf.mxu0 }
 0xfde   :  { %v5601_v48 = vadd.f32 %v5600_v31, %v5584_v47 }
 0xfdf   :  { %v5551_v54 = vpop.f32.mrf.mxu3 }
 0xfe0   :  { %v5552_v55 = vadd.f32 %v5551_v54, %v5535_v22  ;;  %v5585_v56 = vpop.f32.mrf.mxu2  ;;  %v5608_v63 = vadd.f32 %v5601_v48, %v9067_v0  ;;  %v5670_v48 = vld [vmem:[%s8047_s27] sm:$0xff]  ;;  %s7815_s27 = sshra.s32 %s5767_s15, 4  ;;  %s7816_s27 = int_to_ptr.hbm [resolvable:$true] %s7815_s27 }
 0xfe1   :  { %5753 = vmatpush.msrb.mxu2 %v5670_v48  ;;  %v7678_v54 = vld [vmem:[%s8042_s20] ss:$0 sm:$0xff]  ;;  %s7817_s20 = scalar_lea.hbm %s7816_s27, 2  ;;  %p7820_p1 = scmp.lt.s32.totalorder %s7816_s27, %s8057_s17 }
 0xfe2   :  { %v5569_v60 = vadd.f32 %v5568_v44, %v5552_v55  ;;  %v5610_v59 = vsel %vm499_vm1, %v5608_v63, 0.0  ;;  %p7818_p0 = scmp.ne.s32.totalorder %s7816_s27, %s7817_s20  ;;  %p7821_p2 = scmp.lt.s32.totalorder %s7819_s16, %s7817_s20 }
 0xfe3   :  { %v5572_v33 = vpop.f32.mrf.mxu1  ;;  %5611 = vadd.xlane.f32.xlu1 %v5610_v59  ;;  %v7679_v59 = vld [vmem:[%s8052_s4] ss:$0 sm:$0xff] }
 0xfe4   :  { %v5586_v61 = vadd.f32 %v5585_v56, %v5569_v60  ;;  %v5606_v6 = vpop.f32.mrf.mxu0  ;;  %p7822_p3 = por %p7821_p2, %p7820_p1 }
 0xfe6   :  { %v5603_v4 = vadd.f32 %v5602_v38, %v5586_v61  ;;  %p7823_p4 = pnand %p7822_p3, %p7818_p0 }
 0xfe7   :  { %v5554_v29 = vpop.f32.mrf.mxu3 }
 0xfe8   :  { %v5588_v8 = vpop.f32.mrf.mxu2  ;;  %v5609_v7 = vadd.f32 %v5603_v4, %v9069_v50 }
 0xfea   :  { %v5613_v39 = vsel %vm499_vm1, %v5609_v7, 0.0 }
 0xfeb   :  { %5614 = vadd.xlane.f32.xlu2 %v5613_v39 }
 0xfef   :  { %v5555_v5 = vpop.f32.mrf.mxu3 }
 0xff0   :  { %v5589_v21 = vpop.f32.mrf.mxu2 }
0x1046   :  { %v5701_v22 = vpop.f32.mrf.mxu3 }
0x1056   :  { %v5612_v0 = vpop.xlane.xlu1 %5611 }
0x1057   :  { %v5616_v18 = vmul.f32 %v5612_v0, %v8359_v14 }
0x1059   :  { %v5618_v12 = vsub.f32 %v5608_v63, %v5616_v18 }
0x105b   :  { %v5620_v45 = vmul.f32 %v5618_v12, %v5618_v12 }
0x105d   :  { %v5622_v10 = vsel %vm499_vm1, %v5620_v45, 0.0 }
0x105e   :  { %v5615_v13 = vpop.xlane.xlu2 %5614  ;;  %5623 = vadd.xlane.f32.xlu0 %v5622_v10 }
0x105f   :  { %v5617_v50 = vmul.f32 %v5615_v13, %v8359_v14 }
0x1061   :  { %v5619_v15 = vsub.f32 %v5609_v7, %v5617_v50 }
0x1063   :  { %v5621_v11 = vmul.f32 %v5619_v15, %v5619_v15 }
0x1065   :  { %v5625_v16 = vsel %vm499_vm1, %v5621_v11, 0.0 }
0x1066   :  { %5626 = vadd.xlane.f32.xlu1 %v5625_v16 }
0x10d1   :  { %v5624_v19 = vpop.xlane.xlu0 %5623 }
0x10d2   :  { %v5628_v17 = vmul.f32 %v5624_v19, %v8359_v14 }
0x10d4   :  { %v5630_v62 = vadd.f32 1e-05, %v5628_v17 }
0x10d6   :  { %7796 = vrsqrt.f32 %v5630_v62  ;;  %vm5638_vm9 = vweird.f32 %v5630_v62 }
0x10d9   :  { %v5627_v24 = vpop.xlane.xlu1 %5626 }
0x10da   :  { %v5629_v34 = vmul.f32 %v5627_v24, %v8359_v14  ;;  %v7676_v14 = vld [vmem:[%s9447_s9] ss:$0 sm:$0xff] }
0x10dc   :  { %v7797_v37 = vpop.eup %7796  ;;  %v5631_v26 = vadd.f32 1e-05, %v5629_v34 }
0x10dd   :  { %v5633_v41 = vmul.f32 %v7797_v37, %v5630_v62  ;;  %vm5639_vm8 = vweird.f32 %v7797_v37 }
0x10de   :  { %7798 = vrsqrt.f32 %v5631_v26  ;;  %vm5640_vm10 = vmor %vm5638_vm9, %vm5639_vm8  ;;  %vm5648_vm3 = vweird.f32 %v5631_v26 }
0x10df   :  { %v5634_v1 = vmul.f32 %v7797_v37, %v5633_v41 }
0x10e1   :  { %v5635_v35 = vmul.f32 0.5, %v5634_v1 }
0x10e3   :  { %v5636_v31 = vsub.f32 1.5, %v5635_v35 }
0x10e4   :  { %v7799_v42 = vpop.eup %7798 }
0x10e5   :  { %v5637_v52 = vmul.f32 %v7797_v37, %v5636_v31  ;;  %v5643_v40 = vmul.f32 %v7799_v42, %v5631_v26  ;;  %vm5649_vm2 = vweird.f32 %v7799_v42 }
0x10e6   :  { %vm5650_vm4 = vmor %vm5648_vm3, %vm5649_vm2 }
0x10e7   :  { %v5644_v2 = vmul.f32 %v7799_v42, %v5643_v40  ;;  %v5641_v43 = vsel %vm5640_vm10, %v7797_v37, %v5637_v52 }
0x10e8   :  { %v5652_v25 = vmul.f32 %v5641_v43, %v5618_v12 }
0x10e9   :  { %v5645_v44 = vmul.f32 0.5, %v5644_v2 }
0x10ea   :  { %v5657_v46 = vmul.f32 %v7676_v14, %v5652_v25 }
0x10eb   :  { %v5646_v38 = vsub.f32 1.5, %v5645_v44 }
0x10ec   :  { %v5662_v20 = vadd.f32 %v7677_v36, %v5657_v46 }
0x10ed   :  { %v5647_v32 = vmul.f32 %v7799_v42, %v5646_v38 }
0x10ef   :  { %v5651_v30 = vsel %vm5650_vm4, %v7799_v42, %v5647_v32 }
0x10f0   :  { %v5653_v49 = vmul.f32 %v5651_v30, %v5619_v15 }
0x10f2   :  { %v5658_v51 = vmul.f32 %v7676_v14, %v5653_v49 }
0x10f4   :  { %v5663_v47 = vadd.f32 %v7677_v36, %v5658_v51 }
0x10f6   :  { %v5674_v53 = vsel %vm5673_vm5, %v5662_v20, %v5663_v47 }
0x10f7   :  { %7250 = vmatmul.msk.f32.vlgmr.msrb.gmra.mxu1 %vm499_vm1, %v5674_v53 }
0x1174   :  { %v5724_v55 = vpop.f32.mrf.mxu1 }
0x1175   :  { %v5725_v56 = vadd.f32 %v5724_v55, %v5701_v22 }
0x1177   :  { %v5730_v63 = vadd.f32 %v7678_v54, %v5725_v56 }
0x1179   :  { %v5731_v60 = vmax.f32 %v5730_v63, 0.0 }
0x117b   :  { %7251 = vmatmul.msk.f32.vlgmr.msrb.gmra.mxu2 %vm152_vm0, %v5731_v60 }
0x11fe   :  { %v5755_v33 = vpop.f32.mrf.mxu2 }
0x11ff   :  { %v5756_v61 = vadd.f32 %v7679_v59, %v5755_v33 }
0x1201   :  { %5758 = vst [vmem:[#allocation2] sm:$0x3] %v5756_v61 }
0x1202   :  { %7826 = shalt.err (!%p7823_p4)
}
0x1203   :  { %5769 = dma.vmem_to_hbm [thread:$0]  %s5765_s29, 32, %s5767_s15, [#allocation3]  }
0x1204   :  { %7827 = dma.done.wait [#allocation3], 32  }
0x1205   :  { %7828 = vsyncadd [#allocation3], 4294967264 }
0x1206   :  { %5774 = vsyncpa [#allocation3], 1 }

</bundles_post_ra>
